<compile_context>
chip_gen: v7x
topology: tpu7x:2x2x1
jax: 0.10.0
libtpu: 0.0.40
codegen_flags: <defaults>
</compile_context>

<pallas_src>
import functools

import jax
import jax.numpy as jnp
from jax import lax
from jax.experimental import pallas as pl
from jax.experimental.pallas import tpu as pltpu

LANE = 128      # vreg lane width
SUBLANE = 8     # vreg sublane count
MAX_B_BLK = 32  # cap: f32 gates tensor is (B_BLK/8)*(4*Hp/128) vregs


def _round_up(x, m):
    return ((x + m - 1) // m) * m


def _fused_encoder_kernel(*refs, n_layers, matmul_dtype):
    """Whole encoder (all layers, all time steps) for one batch block.

    refs = (x, W_x_0..W_x_{L-1}, W_h_0..W_h_{L-1}, bias, out, h_out, c_out, pre)
      x:      (T, B_BLK, D_pad)          time-major, zero padded, f32
      W_x_l:  (D_in_pad_l, 4*H_pad)      input-projection half, matmul_dtype
      W_h_l:  (H_pad, 4*H_pad)           recurrent half, matmul_dtype
      bias:   (n_layers, 1, 4*H_pad)     b_ih + b_hh, zero padded, f32
      out:    (T, B_BLK, H_pad)          also the inter-layer VMEM buffer
      h_out/c_out: (n_layers, B_BLK, H_pad) final states per layer
      pre:    (T, B_BLK, 4*H_pad)        VMEM scratch for hoisted projections
    """
    x_ref = refs[0]
    wx_refs = refs[1:1 + n_layers]
    wh_refs = refs[1 + n_layers:1 + 2 * n_layers]
    b_ref = refs[1 + 2 * n_layers]
    out_ref = refs[2 + 2 * n_layers]
    h_out_ref = refs[3 + 2 * n_layers]
    c_out_ref = refs[4 + 2 * n_layers]
    pre_ref = refs[5 + 2 * n_layers]

    T = out_ref.shape[0]
    b_blk = out_ref.shape[1]
    h_pad = out_ref.shape[2]

    for layer in range(n_layers):
        # Layer 0 reads the padded input; deeper layers read the previous
        # layer's hidden states in place from the VMEM-resident output block.
        in_ref = x_ref if layer == 0 else out_ref
        d_in = in_ref.shape[2]
        wx_ref = wx_refs[layer]
        wh_ref = wh_refs[layer]

        # --- Hoisted input projection: one MXU-efficient GEMM, M = T*B_BLK ---
        # (T,B,Din)->(T*B,Din) merges sublane-tile-aligned leading dims: free.
        x_all = in_ref[...].reshape(T * b_blk, d_in).astype(matmul_dtype)
        pre = jnp.dot(x_all, wx_ref[...], preferred_element_type=jnp.float32)
        pre = pre + b_ref[layer]                      # bias folded in, once
        pre_ref[...] = pre.reshape(T, b_blk, 4 * h_pad)

        # --- Serial recurrence: only h_prev @ W_hh remains per step ----------
        def step(t, carry, wh_ref=wh_ref):
            h_prev, c_prev = carry
            gates = pre_ref[t] + jnp.dot(
                h_prev.astype(matmul_dtype), wh_ref[...],
                preferred_element_type=jnp.float32)   # (b_blk, 4*h_pad) f32
            # Gate slices are 128-lane aligned (h_pad % 128 == 0); apply the
            # nonlinearity immediately after slicing to shorten live ranges.
            i_g = jax.nn.sigmoid(gates[:, 0 * h_pad:1 * h_pad])
            f_g = jax.nn.sigmoid(gates[:, 1 * h_pad:2 * h_pad])
            g_g = jnp.tanh(gates[:, 2 * h_pad:3 * h_pad])
            o_g = jax.nn.sigmoid(gates[:, 3 * h_pad:4 * h_pad])
            c_new = f_g * c_prev + i_g * g_g
            h_new = o_g * jnp.tanh(c_new)
            out_ref[t] = h_new                        # VMEM store
            return (h_new, c_new)

        zeros = jnp.zeros((b_blk, h_pad), jnp.float32)
        unroll = True if T <= 16 else 4               # LLO cross-step overlap
        h_T, c_T = lax.fori_loop(0, T, step, (zeros, zeros), unroll=unroll)
        h_out_ref[layer] = h_T
        c_out_ref[layer] = c_T


def init_music_encoder_params(key, input_dim, hidden_dim, n_layers):
    """PyTorch-layout LSTM params, uniform(-1/sqrt(H), 1/sqrt(H))."""
    params = []
    bound = 1.0 / float(hidden_dim) ** 0.5
    for layer in range(n_layers):
        d_in = input_dim if layer == 0 else hidden_dim
        key, k1, k2, k3, k4 = jax.random.split(key, 5)
        w_ih = jax.random.uniform(k1, (4 * hidden_dim, d_in), jnp.float32, -bound, bound)
        w_hh = jax.random.uniform(k2, (4 * hidden_dim, hidden_dim), jnp.float32, -bound, bound)
        b_ih = jax.random.uniform(k3, (4 * hidden_dim,), jnp.float32, -bound, bound)
        b_hh = jax.random.uniform(k4, (4 * hidden_dim,), jnp.float32, -bound, bound)
        params.append((w_ih, w_hh, b_ih, b_hh))
    return params


def prepare_params(raw_params, input_dim, hidden_dim, matmul_dtype=jnp.bfloat16):
    """Host-side, one-time: transpose, zero-pad to lane tiles, split into the
    input-projection half W_x and the recurrent half W_h, cast to matmul_dtype,
    and fuse b_ih + b_hh."""
    H = hidden_dim
    Hp = _round_up(H, LANE)
    w_x_list, w_h_list, b_list = [], [], []
    for layer, (w_ih, w_hh, b_ih, b_hh) in enumerate(raw_params):
        d_in = input_dim if layer == 0 else H
        d_in_p = _round_up(d_in, LANE)
        wx = jnp.zeros((d_in_p, 4 * Hp), jnp.float32)
        wh = jnp.zeros((Hp, 4 * Hp), jnp.float32)
        bf = jnp.zeros((4 * Hp,), jnp.float32)
        w_ih_t = jnp.transpose(w_ih).astype(jnp.float32)   # (d_in, 4H)
        w_hh_t = jnp.transpose(w_hh).astype(jnp.float32)   # (H, 4H)
        b = (b_ih + b_hh).astype(jnp.float32)
        for g in range(4):  # PyTorch gate order i, f, g, o
            wx = wx.at[:d_in, g * Hp:g * Hp + H].set(w_ih_t[:, g * H:(g + 1) * H])
            wh = wh.at[:H, g * Hp:g * Hp + H].set(w_hh_t[:, g * H:(g + 1) * H])
            bf = bf.at[g * Hp:g * Hp + H].set(b[g * H:(g + 1) * H])
        w_x_list.append(wx.astype(matmul_dtype))
        w_h_list.append(wh.astype(matmul_dtype))
        b_list.append(bf)
    bias_all = jnp.stack(b_list, axis=0)[:, None, :]       # (n_layers, 1, 4*Hp)
    return w_x_list, w_h_list, bias_all


def music_encoder_forward(music_sequence, w_x_list, w_h_list, bias_all, *,
                          hidden_dim, matmul_dtype=jnp.bfloat16):
    """music_sequence: (B, T, input_dim) batch_first, like the PyTorch module.

    Returns (outputs (B, T, H), hidden (n_layers, B, H), cell (n_layers, B, H)).
    """
    B, T, D = music_sequence.shape
    H = hidden_dim
    n_layers = len(w_x_list)
    Hp = _round_up(H, LANE)
    Dp = _round_up(D, LANE)

    # Fill the MXU M dimension; cap B_BLK for vreg pressure; grid = #blocks.
    B_BLK = min(_round_up(B, SUBLANE), MAX_B_BLK)
    Bp = _round_up(max(B, B_BLK), B_BLK)
    n_b = Bp // B_BLK

    # time-major, zero-padded input (T, Bp, Dp)
    x = jnp.transpose(music_sequence.astype(jnp.float32), (1, 0, 2))
    x = jnp.pad(x, ((0, 0), (0, Bp - B), (0, Dp - D)))

    kernel = functools.partial(_fused_encoder_kernel, n_layers=n_layers,
                               matmul_dtype=matmul_dtype)

    out_shapes = (
        jax.ShapeDtypeStruct((T, Bp, Hp), jnp.float32),         # per-step outputs
        jax.ShapeDtypeStruct((n_layers, Bp, Hp), jnp.float32),  # final hidden
        jax.ShapeDtypeStruct((n_layers, Bp, Hp), jnp.float32),  # final cell
    )

    # x is blocked over batch (pipelined); weights/bias are grid-constant, so
    # pass them as whole-array VMEM operands -> single copy, no double buffer.
    in_specs = [pl.BlockSpec((T, B_BLK, Dp), lambda b: (0, b, 0))]
    in_specs += [pl.BlockSpec(memory_space=pltpu.MemorySpace.VMEM)
                 for _ in range(2 * n_layers + 1)]

    out_specs = [
        pl.BlockSpec((T, B_BLK, Hp), lambda b: (0, b, 0)),
        pl.BlockSpec((n_layers, B_BLK, Hp), lambda b: (0, b, 0)),
        pl.BlockSpec((n_layers, B_BLK, Hp), lambda b: (0, b, 0)),
    ]

    # Explicit VMEM budget from the computed block sizes (generous margin),
    # clamped so it is valid on v5e/v6e (128 MiB) and v7x (64 MiB physical).
    f32b = 4
    w_bytes = sum(int(w.size) * w.dtype.itemsize for w in (list(w_x_list) + list(w_h_list)))
    bias_bytes = n_layers * SUBLANE * 4 * Hp * f32b
    blk_bytes = (T * B_BLK * Dp + T * B_BLK * Hp + 2 * n_layers * B_BLK * Hp) * f32b
    scratch_bytes = T * B_BLK * 4 * Hp * f32b
    vmem_limit = 2 * (2 * blk_bytes + w_bytes + bias_bytes + scratch_bytes) + (8 << 20)
    vmem_limit = int(min(max(vmem_limit, 16 << 20), 64 << 20))

    out, h_all, c_all = pl.pallas_call(
        kernel,
        out_shape=out_shapes,
        grid_spec=pltpu.PrefetchScalarGridSpec(
            num_scalar_prefetch=0,
            grid=(n_b,),                 # independent batch blocks
            in_specs=in_specs,
            out_specs=out_specs,
            scratch_shapes=[pltpu.VMEM((T, B_BLK, 4 * Hp), jnp.float32)],
        ),
        compiler_params=pltpu.CompilerParams(
            dimension_semantics=("parallel",),   # batch blocks -> v7x megacore
            vmem_limit_bytes=vmem_limit,
        ),
    )(x, *w_x_list, *w_h_list, bias_all)

    outputs = jnp.transpose(out, (1, 0, 2))[:B, :, :H]   # (B, T, H)
    hidden = h_all[:, :B, :H]                            # (n_layers, B, H)
    cell = c_all[:, :B, :H]                              # (n_layers, B, H)
    return outputs, hidden, cell


def music_encoder_reference(x_btd, raw_params, matmul_dtype=jnp.float32):
    """Pure-JAX reference (lax.scan) matching torch.nn.LSTM forward.

    matmul_dtype lets us build a reference whose matmul operands are quantized
    the same way as the kernel's (f32 accumulation either way)."""
    layer_in = x_btd.astype(jnp.float32)
    hs, cs = [], []
    for (w_ih, w_hh, b_ih, b_hh) in raw_params:
        B = layer_in.shape[0]
        H = w_hh.shape[1]
        w_ih_m = jnp.transpose(w_ih).astype(matmul_dtype)
        w_hh_m = jnp.transpose(w_hh).astype(matmul_dtype)
        b = (b_ih + b_hh).astype(jnp.float32)

        def step(carry, x_t, w_ih_m=w_ih_m, w_hh_m=w_hh_m, b=b):
            h, c = carry
            gates = (jnp.dot(x_t.astype(matmul_dtype), w_ih_m,
                             preferred_element_type=jnp.float32)
                     + jnp.dot(h.astype(matmul_dtype), w_hh_m,
                               preferred_element_type=jnp.float32)
                     + b)
            i, f, g, o = jnp.split(gates, 4, axis=-1)
            c = jax.nn.sigmoid(f) * c + jax.nn.sigmoid(i) * jnp.tanh(g)
            h = jax.nn.sigmoid(o) * jnp.tanh(c)
            return (h, c), h

        h0 = jnp.zeros((B, H), jnp.float32)
        (h_T, c_T), ys = lax.scan(step, (h0, h0), jnp.transpose(layer_in, (1, 0, 2)))
        layer_in = jnp.transpose(ys, (1, 0, 2))
        hs.append(h_T)
        cs.append(c_T)
    return layer_in, jnp.stack(hs, 0), jnp.stack(cs, 0)


def _max_err(a, b):
    return float(jnp.max(jnp.abs(a.astype(jnp.float32) - b.astype(jnp.float32))))


if __name__ == "__main__":
    batch, seq_len = 2, 8
    input_dim, hidden_dim, n_layers = 16, 32, 2

    key = jax.random.PRNGKey(0)
    key_x, key_p = jax.random.split(key)
    music_sequence = jax.random.normal(key_x, (batch, seq_len, input_dim), jnp.float32)

    raw_params = init_music_encoder_params(key_p, input_dim, hidden_dim, n_layers)
    w_x_list, w_h_list, bias_all = prepare_params(
        raw_params, input_dim, hidden_dim, matmul_dtype=jnp.bfloat16)

    outputs, hidden, cell = music_encoder_forward(
        music_sequence, w_x_list, w_h_list, bias_all,
        hidden_dim=hidden_dim, matmul_dtype=jnp.bfloat16)
    jax.block_until_ready((outputs, hidden, cell))

    assert outputs.shape == (batch, seq_len, hidden_dim)
    assert hidden.shape == (n_layers, batch, hidden_dim)
    assert cell.shape == (n_layers, batch, hidden_dim)

    # Tight functional check vs a reference with identically-quantized (bf16)
    # matmul operands: only f32 accumulation-order differences remain.
    ref_out, ref_h, ref_c = music_encoder_reference(
        music_sequence, raw_params, matmul_dtype=jnp.bfloat16)
    err_matched = max(_max_err(outputs, ref_out), _max_err(hidden, ref_h),
                      _max_err(cell, ref_c))
    assert err_matched < 5e-3, f"mismatch vs bf16-matched reference: {err_matched}"

    # Sanity check vs the exact f32 PyTorch-semantics reference; the bound is
    # the bf16 matmul-operand quantization error accumulated over T and layers.
    ref_out32, ref_h32, ref_c32 = music_encoder_reference(music_sequence, raw_params)
    err_f32 = max(_max_err(outputs, ref_out32), _max_err(hidden, ref_h32),
                  _max_err(cell, ref_c32))
    assert err_f32 < 1e-1, f"mismatch vs f32 reference: {err_f32}"

    print("KERNEL_OK")
</pallas_src>

<mosaic_0001>
module attributes {stable_mosaic.version = 11 : i64} {
  func.func @_fused_encoder_kernel(%arg0: i32, %arg1: memref<8x8x128xf32, #tpu.memory_space<vmem>>, %arg2: memref<128x512xbf16, #tpu.memory_space<vmem>>, %arg3: memref<128x512xbf16, #tpu.memory_space<vmem>>, %arg4: memref<128x512xbf16, #tpu.memory_space<vmem>>, %arg5: memref<128x512xbf16, #tpu.memory_space<vmem>>, %arg6: memref<2x1x512xf32, #tpu.memory_space<vmem>>, %arg7: memref<8x8x128xf32, #tpu.memory_space<vmem>>, %arg8: memref<2x8x128xf32, #tpu.memory_space<vmem>>, %arg9: memref<2x8x128xf32, #tpu.memory_space<vmem>>, %arg10: memref<8x8x512xf32, #tpu.memory_space<vmem>>) attributes {dimension_semantics = [#tpu.dimension_semantics<parallel>], iteration_bounds = array<i64: 1>, scalar_prefetch = 0 : i64, scratch_operands = 1 : i64, tpu.core_type = #tpu.core_type<tc>, window_params = [{transform_indices = @transform_0, window_bounds = array<i64: 8, 8, 128>}, {pipeline_mode = #tpu.pipeline_mode<synchronous>, transform_indices = @transform_1, window_bounds = array<i64: 128, 512>}, {pipeline_mode = #tpu.pipeline_mode<synchronous>, transform_indices = @transform_2, window_bounds = array<i64: 128, 512>}, {pipeline_mode = #tpu.pipeline_mode<synchronous>, transform_indices = @transform_3, window_bounds = array<i64: 128, 512>}, {pipeline_mode = #tpu.pipeline_mode<synchronous>, transform_indices = @transform_4, window_bounds = array<i64: 128, 512>}, {pipeline_mode = #tpu.pipeline_mode<synchronous>, transform_indices = @transform_5, window_bounds = array<i64: 2, 1, 512>}, {transform_indices = @transform_6, window_bounds = array<i64: 8, 8, 128>}, {transform_indices = @transform_7, window_bounds = array<i64: 2, 8, 128>}, {transform_indices = @transform_8, window_bounds = array<i64: 2, 8, 128>}]} {
    %c0 = arith.constant 0 : index
    %c0_0 = arith.constant 0 : index
    %c0_1 = arith.constant 0 : index
    %0 = vector.load %arg1[%c0, %c0_0, %c0_1] : memref<8x8x128xf32, #tpu.memory_space<vmem>>, vector<8x8x128xf32>
    %1 = vector.shape_cast %0 : vector<8x8x128xf32> to vector<64x128xf32>
    %2 = arith.truncf %1 : vector<64x128xf32> to vector<64x128xbf16>
    %c0_2 = arith.constant 0 : index
    %c0_3 = arith.constant 0 : index
    %3 = vector.load %arg2[%c0_2, %c0_3] : memref<128x512xbf16, #tpu.memory_space<vmem>>, vector<128x512xbf16>
    %cst = arith.constant dense<0.000000e+00> : vector<64x512xf32>
    %4 = tpu.matmul %2, %3, %cst {dimension_numbers = #tpu.dot_dimension_numbers<[1], [0], [0], [1], [0, 0, 1, 1], [], []>} : vector<64x128xbf16>, vector<128x512xbf16>, vector<64x512xf32> -> vector<64x512xf32>
    %c0_4 = arith.constant 0 : index
    %c0_5 = arith.constant 0 : index
    %c0_6 = arith.constant 0 : index
    %5 = vector.load %arg6[%c0_4, %c0_5, %c0_6] : memref<2x1x512xf32, #tpu.memory_space<vmem>>, vector<1x1x512xf32>
    %6 = vector.shape_cast %5 : vector<1x1x512xf32> to vector<1x512xf32>
    %7 = vector.broadcast %6 : vector<1x512xf32> to vector<64x512xf32>
    %8 = arith.addf %4, %7 : vector<64x512xf32>
    %9 = vector.shape_cast %8 : vector<64x512xf32> to vector<8x8x512xf32>
    %c0_7 = arith.constant 0 : index
    %c0_8 = arith.constant 0 : index
    %c0_9 = arith.constant 0 : index
    %10 = vector.load %arg10[%c0_7, %c0_8, %c0_9] : memref<8x8x512xf32, #tpu.memory_space<vmem>>, vector<8x8x512xf32>
    tpu.vector_store %arg10[%c0_7, %c0_8, %c0_9], %9 {strides = array<i32>} : memref<8x8x512xf32, #tpu.memory_space<vmem>>, vector<8x8x512xf32>,
    %cst_10 = arith.constant 0.000000e+00 : f32
    %11 = vector.broadcast %cst_10 : f32 to vector<8x128xf32>
    %c0_i32 = arith.constant 0 : i32
    %12 = arith.index_cast %c0_i32 : i32 to index
    %c0_11 = arith.constant 0 : index
    %c0_12 = arith.constant 0 : index
    %13 = vector.load %arg10[%12, %c0_11, %c0_12] : memref<8x8x512xf32, #tpu.memory_space<vmem>>, vector<1x8x512xf32>
    %14 = vector.shape_cast %13 : vector<1x8x512xf32> to vector<8x512xf32>
    %15 = arith.truncf %11 : vector<8x128xf32> to vector<8x128xbf16>
    %c0_13 = arith.constant 0 : index
    %c0_14 = arith.constant 0 : index
    %16 = vector.load %arg4[%c0_13, %c0_14] : memref<128x512xbf16, #tpu.memory_space<vmem>>, vector<128x512xbf16>
    %cst_15 = arith.constant dense<0.000000e+00> : vector<8x512xf32>
    %17 = tpu.matmul %15, %16, %cst_15 {dimension_numbers = #tpu.dot_dimension_numbers<[1], [0], [0], [1], [0, 0, 1, 1], [], []>} : vector<8x128xbf16>, vector<128x512xbf16>, vector<8x512xf32> -> vector<8x512xf32>
    %18 = arith.addf %14, %17 : vector<8x512xf32>
    %19 = vector.extract_strided_slice %18 {offsets = [0, 0], sizes = [8, 128], strides = [1, 1]} : vector<8x512xf32> to vector<8x128xf32>
    %20 = arith.negf %19 : vector<8x128xf32>
    %21 = math.exp %20 : vector<8x128xf32>
    %cst_16 = arith.constant 1.000000e+00 : f32
    %22 = vector.broadcast %cst_16 : f32 to vector<8x128xf32>
    %23 = arith.addf %22, %21 : vector<8x128xf32>
    %24 = arith.divf %22, %23 : vector<8x128xf32>
    %25 = vector.extract_strided_slice %18 {offsets = [0, 128], sizes = [8, 128], strides = [1, 1]} : vector<8x512xf32> to vector<8x128xf32>
    %26 = arith.negf %25 : vector<8x128xf32>
    %27 = math.exp %26 : vector<8x128xf32>
    %cst_17 = arith.constant 1.000000e+00 : f32
    %28 = vector.broadcast %cst_17 : f32 to vector<8x128xf32>
    %29 = arith.addf %28, %27 : vector<8x128xf32>
    %30 = arith.divf %28, %29 : vector<8x128xf32>
    %31 = vector.extract_strided_slice %18 {offsets = [0, 256], sizes = [8, 128], strides = [1, 1]} : vector<8x512xf32> to vector<8x128xf32>
    %32 = math.tanh %31 : vector<8x128xf32>
    %33 = vector.extract_strided_slice %18 {offsets = [0, 384], sizes = [8, 128], strides = [1, 1]} : vector<8x512xf32> to vector<8x128xf32>
    %34 = arith.negf %33 : vector<8x128xf32>
    %35 = math.exp %34 : vector<8x128xf32>
    %cst_18 = arith.constant 1.000000e+00 : f32
    %36 = vector.broadcast %cst_18 : f32 to vector<8x128xf32>
    %37 = arith.addf %36, %35 : vector<8x128xf32>
    %38 = arith.divf %36, %37 : vector<8x128xf32>
    %39 = arith.mulf %30, %11 : vector<8x128xf32>
    %40 = arith.mulf %24, %32 : vector<8x128xf32>
    %41 = arith.addf %39, %40 : vector<8x128xf32>
    %42 = math.tanh %41 : vector<8x128xf32>
    %43 = arith.mulf %38, %42 : vector<8x128xf32>
    %44 = arith.index_cast %c0_i32 : i32 to index
    %c0_19 = arith.constant 0 : index
    %c0_20 = arith.constant 0 : index
    %45 = vector.load %arg7[%44, %c0_19, %c0_20] : memref<8x8x128xf32, #tpu.memory_space<vmem>>, vector<1x8x128xf32>
    %46 = vector.shape_cast %45 : vector<1x8x128xf32> to vector<8x128xf32>
    %47 = vector.shape_cast %43 : vector<8x128xf32> to vector<1x8x128xf32>
    tpu.vector_store %arg7[%44, %c0_19, %c0_20], %47 {strides = array<i32>} : memref<8x8x128xf32, #tpu.memory_space<vmem>>, vector<1x8x128xf32>,
    %c1_i32 = arith.constant 1 : i32
    %48 = arith.index_cast %c1_i32 : i32 to index
    %c0_21 = arith.constant 0 : index
    %c0_22 = arith.constant 0 : index
    %49 = vector.load %arg10[%48, %c0_21, %c0_22] : memref<8x8x512xf32, #tpu.memory_space<vmem>>, vector<1x8x512xf32>
    %50 = vector.shape_cast %49 : vector<1x8x512xf32> to vector<8x512xf32>
    %51 = arith.truncf %43 : vector<8x128xf32> to vector<8x128xbf16>
    %c0_23 = arith.constant 0 : index
    %c0_24 = arith.constant 0 : index
    %52 = vector.load %arg4[%c0_23, %c0_24] : memref<128x512xbf16, #tpu.memory_space<vmem>>, vector<128x512xbf16>
    %cst_25 = arith.constant dense<0.000000e+00> : vector<8x512xf32>
    %53 = tpu.matmul %51, %52, %cst_25 {dimension_numbers = #tpu.dot_dimension_numbers<[1], [0], [0], [1], [0, 0, 1, 1], [], []>} : vector<8x128xbf16>, vector<128x512xbf16>, vector<8x512xf32> -> vector<8x512xf32>
    %54 = arith.addf %50, %53 : vector<8x512xf32>
    %55 = vector.extract_strided_slice %54 {offsets = [0, 0], sizes = [8, 128], strides = [1, 1]} : vector<8x512xf32> to vector<8x128xf32>
    %56 = arith.negf %55 : vector<8x128xf32>
    %57 = math.exp %56 : vector<8x128xf32>
    %cst_26 = arith.constant 1.000000e+00 : f32
    %58 = vector.broadcast %cst_26 : f32 to vector<8x128xf32>
    %59 = arith.addf %58, %57 : vector<8x128xf32>
    %60 = arith.divf %58, %59 : vector<8x128xf32>
    %61 = vector.extract_strided_slice %54 {offsets = [0, 128], sizes = [8, 128], strides = [1, 1]} : vector<8x512xf32> to vector<8x128xf32>
    %62 = arith.negf %61 : vector<8x128xf32>
    %63 = math.exp %62 : vector<8x128xf32>
    %cst_27 = arith.constant 1.000000e+00 : f32
    %64 = vector.broadcast %cst_27 : f32 to vector<8x128xf32>
    %65 = arith.addf %64, %63 : vector<8x128xf32>
    %66 = arith.divf %64, %65 : vector<8x128xf32>
    %67 = vector.extract_strided_slice %54 {offsets = [0, 256], sizes = [8, 128], strides = [1, 1]} : vector<8x512xf32> to vector<8x128xf32>
    %68 = math.tanh %67 : vector<8x128xf32>
    %69 = vector.extract_strided_slice %54 {offsets = [0, 384], sizes = [8, 128], strides = [1, 1]} : vector<8x512xf32> to vector<8x128xf32>
    %70 = arith.negf %69 : vector<8x128xf32>
    %71 = math.exp %70 : vector<8x128xf32>
    %cst_28 = arith.constant 1.000000e+00 : f32
    %72 = vector.broadcast %cst_28 : f32 to vector<8x128xf32>
    %73 = arith.addf %72, %71 : vector<8x128xf32>
    %74 = arith.divf %72, %73 : vector<8x128xf32>
    %75 = arith.mulf %66, %41 : vector<8x128xf32>
    %76 = arith.mulf %60, %68 : vector<8x128xf32>
    %77 = arith.addf %75, %76 : vector<8x128xf32>
    %78 = math.tanh %77 : vector<8x128xf32>
    %79 = arith.mulf %74, %78 : vector<8x128xf32>
    %80 = arith.index_cast %c1_i32 : i32 to index
    %c0_29 = arith.constant 0 : index
    %c0_30 = arith.constant 0 : index
    %81 = vector.load %arg7[%80, %c0_29, %c0_30] : memref<8x8x128xf32, #tpu.memory_space<vmem>>, vector<1x8x128xf32>
    %82 = vector.shape_cast %81 : vector<1x8x128xf32> to vector<8x128xf32>
    %83 = vector.shape_cast %79 : vector<8x128xf32> to vector<1x8x128xf32>
    tpu.vector_store %arg7[%80, %c0_29, %c0_30], %83 {strides = array<i32>} : memref<8x8x128xf32, #tpu.memory_space<vmem>>, vector<1x8x128xf32>,
    %c2_i32 = arith.constant 2 : i32
    %84 = arith.index_cast %c2_i32 : i32 to index
    %c0_31 = arith.constant 0 : index
    %c0_32 = arith.constant 0 : index
    %85 = vector.load %arg10[%84, %c0_31, %c0_32] : memref<8x8x512xf32, #tpu.memory_space<vmem>>, vector<1x8x512xf32>
    %86 = vector.shape_cast %85 : vector<1x8x512xf32> to vector<8x512xf32>
    %87 = arith.truncf %79 : vector<8x128xf32> to vector<8x128xbf16>
    %c0_33 = arith.constant 0 : index
    %c0_34 = arith.constant 0 : index
    %88 = vector.load %arg4[%c0_33, %c0_34] : memref<128x512xbf16, #tpu.memory_space<vmem>>, vector<128x512xbf16>
    %cst_35 = arith.constant dense<0.000000e+00> : vector<8x512xf32>
    %89 = tpu.matmul %87, %88, %cst_35 {dimension_numbers = #tpu.dot_dimension_numbers<[1], [0], [0], [1], [0, 0, 1, 1], [], []>} : vector<8x128xbf16>, vector<128x512xbf16>, vector<8x512xf32> -> vector<8x512xf32>
    %90 = arith.addf %86, %89 : vector<8x512xf32>
    %91 = vector.extract_strided_slice %90 {offsets = [0, 0], sizes = [8, 128], strides = [1, 1]} : vector<8x512xf32> to vector<8x128xf32>
    %92 = arith.negf %91 : vector<8x128xf32>
    %93 = math.exp %92 : vector<8x128xf32>
    %cst_36 = arith.constant 1.000000e+00 : f32
    %94 = vector.broadcast %cst_36 : f32 to vector<8x128xf32>
    %95 = arith.addf %94, %93 : vector<8x128xf32>
    %96 = arith.divf %94, %95 : vector<8x128xf32>
    %97 = vector.extract_strided_slice %90 {offsets = [0, 128], sizes = [8, 128], strides = [1, 1]} : vector<8x512xf32> to vector<8x128xf32>
    %98 = arith.negf %97 : vector<8x128xf32>
    %99 = math.exp %98 : vector<8x128xf32>
    %cst_37 = arith.constant 1.000000e+00 : f32
    %100 = vector.broadcast %cst_37 : f32 to vector<8x128xf32>
    %101 = arith.addf %100, %99 : vector<8x128xf32>
    %102 = arith.divf %100, %101 : vector<8x128xf32>
    %103 = vector.extract_strided_slice %90 {offsets = [0, 256], sizes = [8, 128], strides = [1, 1]} : vector<8x512xf32> to vector<8x128xf32>
    %104 = math.tanh %103 : vector<8x128xf32>
    %105 = vector.extract_strided_slice %90 {offsets = [0, 384], sizes = [8, 128], strides = [1, 1]} : vector<8x512xf32> to vector<8x128xf32>
    %106 = arith.negf %105 : vector<8x128xf32>
    %107 = math.exp %106 : vector<8x128xf32>
    %cst_38 = arith.constant 1.000000e+00 : f32
    %108 = vector.broadcast %cst_38 : f32 to vector<8x128xf32>
    %109 = arith.addf %108, %107 : vector<8x128xf32>
    %110 = arith.divf %108, %109 : vector<8x128xf32>
    %111 = arith.mulf %102, %77 : vector<8x128xf32>
    %112 = arith.mulf %96, %104 : vector<8x128xf32>
    %113 = arith.addf %111, %112 : vector<8x128xf32>
    %114 = math.tanh %113 : vector<8x128xf32>
    %115 = arith.mulf %110, %114 : vector<8x128xf32>
    %116 = arith.index_cast %c2_i32 : i32 to index
    %c0_39 = arith.constant 0 : index
    %c0_40 = arith.constant 0 : index
    %117 = vector.load %arg7[%116, %c0_39, %c0_40] : memref<8x8x128xf32, #tpu.memory_space<vmem>>, vector<1x8x128xf32>
    %118 = vector.shape_cast %117 : vector<1x8x128xf32> to vector<8x128xf32>
    %119 = vector.shape_cast %115 : vector<8x128xf32> to vector<1x8x128xf32>
    tpu.vector_store %arg7[%116, %c0_39, %c0_40], %119 {strides = array<i32>} : memref<8x8x128xf32, #tpu.memory_space<vmem>>, vector<1x8x128xf32>,
    %c3_i32 = arith.constant 3 : i32
    %120 = arith.index_cast %c3_i32 : i32 to index
    %c0_41 = arith.constant 0 : index
    %c0_42 = arith.constant 0 : index
    %121 = vector.load %arg10[%120, %c0_41, %c0_42] : memref<8x8x512xf32, #tpu.memory_space<vmem>>, vector<1x8x512xf32>
    %122 = vector.shape_cast %121 : vector<1x8x512xf32> to vector<8x512xf32>
    %123 = arith.truncf %115 : vector<8x128xf32> to vector<8x128xbf16>
    %c0_43 = arith.constant 0 : index
    %c0_44 = arith.constant 0 : index
    %124 = vector.load %arg4[%c0_43, %c0_44] : memref<128x512xbf16, #tpu.memory_space<vmem>>, vector<128x512xbf16>
    %cst_45 = arith.constant dense<0.000000e+00> : vector<8x512xf32>
    %125 = tpu.matmul %123, %124, %cst_45 {dimension_numbers = #tpu.dot_dimension_numbers<[1], [0], [0], [1], [0, 0, 1, 1], [], []>} : vector<8x128xbf16>, vector<128x512xbf16>, vector<8x512xf32> -> vector<8x512xf32>
    %126 = arith.addf %122, %125 : vector<8x512xf32>
    %127 = vector.extract_strided_slice %126 {offsets = [0, 0], sizes = [8, 128], strides = [1, 1]} : vector<8x512xf32> to vector<8x128xf32>
    %128 = arith.negf %127 : vector<8x128xf32>
    %129 = math.exp %128 : vector<8x128xf32>
    %cst_46 = arith.constant 1.000000e+00 : f32
    %130 = vector.broadcast %cst_46 : f32 to vector<8x128xf32>
    %131 = arith.addf %130, %129 : vector<8x128xf32>
    %132 = arith.divf %130, %131 : vector<8x128xf32>
    %133 = vector.extract_strided_slice %126 {offsets = [0, 128], sizes = [8, 128], strides = [1, 1]} : vector<8x512xf32> to vector<8x128xf32>
    %134 = arith.negf %133 : vector<8x128xf32>
    %135 = math.exp %134 : vector<8x128xf32>
    %cst_47 = arith.constant 1.000000e+00 : f32
    %136 = vector.broadcast %cst_47 : f32 to vector<8x128xf32>
    %137 = arith.addf %136, %135 : vector<8x128xf32>
    %138 = arith.divf %136, %137 : vector<8x128xf32>
    %139 = vector.extract_strided_slice %126 {offsets = [0, 256], sizes = [8, 128], strides = [1, 1]} : vector<8x512xf32> to vector<8x128xf32>
    %140 = math.tanh %139 : vector<8x128xf32>
    %141 = vector.extract_strided_slice %126 {offsets = [0, 384], sizes = [8, 128], strides = [1, 1]} : vector<8x512xf32> to vector<8x128xf32>
    %142 = arith.negf %141 : vector<8x128xf32>
    %143 = math.exp %142 : vector<8x128xf32>
    %cst_48 = arith.constant 1.000000e+00 : f32
    %144 = vector.broadcast %cst_48 : f32 to vector<8x128xf32>
    %145 = arith.addf %144, %143 : vector<8x128xf32>
    %146 = arith.divf %144, %145 : vector<8x128xf32>
    %147 = arith.mulf %138, %113 : vector<8x128xf32>
    %148 = arith.mulf %132, %140 : vector<8x128xf32>
    %149 = arith.addf %147, %148 : vector<8x128xf32>
    %150 = math.tanh %149 : vector<8x128xf32>
    %151 = arith.mulf %146, %150 : vector<8x128xf32>
    %152 = arith.index_cast %c3_i32 : i32 to index
    %c0_49 = arith.constant 0 : index
    %c0_50 = arith.constant 0 : index
    %153 = vector.load %arg7[%152, %c0_49, %c0_50] : memref<8x8x128xf32, #tpu.memory_space<vmem>>, vector<1x8x128xf32>
    %154 = vector.shape_cast %153 : vector<1x8x128xf32> to vector<8x128xf32>
    %155 = vector.shape_cast %151 : vector<8x128xf32> to vector<1x8x128xf32>
    tpu.vector_store %arg7[%152, %c0_49, %c0_50], %155 {strides = array<i32>} : memref<8x8x128xf32, #tpu.memory_space<vmem>>, vector<1x8x128xf32>,
    %c4_i32 = arith.constant 4 : i32
    %156 = arith.index_cast %c4_i32 : i32 to index
    %c0_51 = arith.constant 0 : index
    %c0_52 = arith.constant 0 : index
    %157 = vector.load %arg10[%156, %c0_51, %c0_52] : memref<8x8x512xf32, #tpu.memory_space<vmem>>, vector<1x8x512xf32>
    %158 = vector.shape_cast %157 : vector<1x8x512xf32> to vector<8x512xf32>
    %159 = arith.truncf %151 : vector<8x128xf32> to vector<8x128xbf16>
    %c0_53 = arith.constant 0 : index
    %c0_54 = arith.constant 0 : index
    %160 = vector.load %arg4[%c0_53, %c0_54] : memref<128x512xbf16, #tpu.memory_space<vmem>>, vector<128x512xbf16>
    %cst_55 = arith.constant dense<0.000000e+00> : vector<8x512xf32>
    %161 = tpu.matmul %159, %160, %cst_55 {dimension_numbers = #tpu.dot_dimension_numbers<[1], [0], [0], [1], [0, 0, 1, 1], [], []>} : vector<8x128xbf16>, vector<128x512xbf16>, vector<8x512xf32> -> vector<8x512xf32>
    %162 = arith.addf %158, %161 : vector<8x512xf32>
    %163 = vector.extract_strided_slice %162 {offsets = [0, 0], sizes = [8, 128], strides = [1, 1]} : vector<8x512xf32> to vector<8x128xf32>
    %164 = arith.negf %163 : vector<8x128xf32>
    %165 = math.exp %164 : vector<8x128xf32>
    %cst_56 = arith.constant 1.000000e+00 : f32
    %166 = vector.broadcast %cst_56 : f32 to vector<8x128xf32>
    %167 = arith.addf %166, %165 : vector<8x128xf32>
    %168 = arith.divf %166, %167 : vector<8x128xf32>
    %169 = vector.extract_strided_slice %162 {offsets = [0, 128], sizes = [8, 128], strides = [1, 1]} : vector<8x512xf32> to vector<8x128xf32>
    %170 = arith.negf %169 : vector<8x128xf32>
    %171 = math.exp %170 : vector<8x128xf32>
    %cst_57 = arith.constant 1.000000e+00 : f32
    %172 = vector.broadcast %cst_57 : f32 to vector<8x128xf32>
    %173 = arith.addf %172, %171 : vector<8x128xf32>
    %174 = arith.divf %172, %173 : vector<8x128xf32>
    %175 = vector.extract_strided_slice %162 {offsets = [0, 256], sizes = [8, 128], strides = [1, 1]} : vector<8x512xf32> to vector<8x128xf32>
    %176 = math.tanh %175 : vector<8x128xf32>
    %177 = vector.extract_strided_slice %162 {offsets = [0, 384], sizes = [8, 128], strides = [1, 1]} : vector<8x512xf32> to vector<8x128xf32>
    %178 = arith.negf %177 : vector<8x128xf32>
    %179 = math.exp %178 : vector<8x128xf32>
    %cst_58 = arith.constant 1.000000e+00 : f32
    %180 = vector.broadcast %cst_58 : f32 to vector<8x128xf32>
    %181 = arith.addf %180, %179 : vector<8x128xf32>
    %182 = arith.divf %180, %181 : vector<8x128xf32>
    %183 = arith.mulf %174, %149 : vector<8x128xf32>
    %184 = arith.mulf %168, %176 : vector<8x128xf32>
    %185 = arith.addf %183, %184 : vector<8x128xf32>
    %186 = math.tanh %185 : vector<8x128xf32>
    %187 = arith.mulf %182, %186 : vector<8x128xf32>
    %188 = arith.index_cast %c4_i32 : i32 to index
    %c0_59 = arith.constant 0 : index
    %c0_60 = arith.constant 0 : index
    %189 = vector.load %arg7[%188, %c0_59, %c0_60] : memref<8x8x128xf32, #tpu.memory_space<vmem>>, vector<1x8x128xf32>
    %190 = vector.shape_cast %189 : vector<1x8x128xf32> to vector<8x128xf32>
    %191 = vector.shape_cast %187 : vector<8x128xf32> to vector<1x8x128xf32>
    tpu.vector_store %arg7[%188, %c0_59, %c0_60], %191 {strides = array<i32>} : memref<8x8x128xf32, #tpu.memory_space<vmem>>, vector<1x8x128xf32>,
    %c5_i32 = arith.constant 5 : i32
    %192 = arith.index_cast %c5_i32 : i32 to index
    %c0_61 = arith.constant 0 : index
    %c0_62 = arith.constant 0 : index
    %193 = vector.load %arg10[%192, %c0_61, %c0_62] : memref<8x8x512xf32, #tpu.memory_space<vmem>>, vector<1x8x512xf32>
    %194 = vector.shape_cast %193 : vector<1x8x512xf32> to vector<8x512xf32>
    %195 = arith.truncf %187 : vector<8x128xf32> to vector<8x128xbf16>
    %c0_63 = arith.constant 0 : index
    %c0_64 = arith.constant 0 : index
    %196 = vector.load %arg4[%c0_63, %c0_64] : memref<128x512xbf16, #tpu.memory_space<vmem>>, vector<128x512xbf16>
    %cst_65 = arith.constant dense<0.000000e+00> : vector<8x512xf32>
    %197 = tpu.matmul %195, %196, %cst_65 {dimension_numbers = #tpu.dot_dimension_numbers<[1], [0], [0], [1], [0, 0, 1, 1], [], []>} : vector<8x128xbf16>, vector<128x512xbf16>, vector<8x512xf32> -> vector<8x512xf32>
    %198 = arith.addf %194, %197 : vector<8x512xf32>
    %199 = vector.extract_strided_slice %198 {offsets = [0, 0], sizes = [8, 128], strides = [1, 1]} : vector<8x512xf32> to vector<8x128xf32>
    %200 = arith.negf %199 : vector<8x128xf32>
    %201 = math.exp %200 : vector<8x128xf32>
    %cst_66 = arith.constant 1.000000e+00 : f32
    %202 = vector.broadcast %cst_66 : f32 to vector<8x128xf32>
    %203 = arith.addf %202, %201 : vector<8x128xf32>
    %204 = arith.divf %202, %203 : vector<8x128xf32>
    %205 = vector.extract_strided_slice %198 {offsets = [0, 128], sizes = [8, 128], strides = [1, 1]} : vector<8x512xf32> to vector<8x128xf32>
    %206 = arith.negf %205 : vector<8x128xf32>
    %207 = math.exp %206 : vector<8x128xf32>
    %cst_67 = arith.constant 1.000000e+00 : f32
    %208 = vector.broadcast %cst_67 : f32 to vector<8x128xf32>
    %209 = arith.addf %208, %207 : vector<8x128xf32>
    %210 = arith.divf %208, %209 : vector<8x128xf32>
    %211 = vector.extract_strided_slice %198 {offsets = [0, 256], sizes = [8, 128], strides = [1, 1]} : vector<8x512xf32> to vector<8x128xf32>
    %212 = math.tanh %211 : vector<8x128xf32>
    %213 = vector.extract_strided_slice %198 {offsets = [0, 384], sizes = [8, 128], strides = [1, 1]} : vector<8x512xf32> to vector<8x128xf32>
    %214 = arith.negf %213 : vector<8x128xf32>
    %215 = math.exp %214 : vector<8x128xf32>
    %cst_68 = arith.constant 1.000000e+00 : f32
    %216 = vector.broadcast %cst_68 : f32 to vector<8x128xf32>
    %217 = arith.addf %216, %215 : vector<8x128xf32>
    %218 = arith.divf %216, %217 : vector<8x128xf32>
    %219 = arith.mulf %210, %185 : vector<8x128xf32>
    %220 = arith.mulf %204, %212 : vector<8x128xf32>
    %221 = arith.addf %219, %220 : vector<8x128xf32>
    %222 = math.tanh %221 : vector<8x128xf32>
    %223 = arith.mulf %218, %222 : vector<8x128xf32>
    %224 = arith.index_cast %c5_i32 : i32 to index
    %c0_69 = arith.constant 0 : index
    %c0_70 = arith.constant 0 : index
    %225 = vector.load %arg7[%224, %c0_69, %c0_70] : memref<8x8x128xf32, #tpu.memory_space<vmem>>, vector<1x8x128xf32>
    %226 = vector.shape_cast %225 : vector<1x8x128xf32> to vector<8x128xf32>
    %227 = vector.shape_cast %223 : vector<8x128xf32> to vector<1x8x128xf32>
    tpu.vector_store %arg7[%224, %c0_69, %c0_70], %227 {strides = array<i32>} : memref<8x8x128xf32, #tpu.memory_space<vmem>>, vector<1x8x128xf32>,
    %c6_i32 = arith.constant 6 : i32
    %228 = arith.index_cast %c6_i32 : i32 to index
    %c0_71 = arith.constant 0 : index
    %c0_72 = arith.constant 0 : index
    %229 = vector.load %arg10[%228, %c0_71, %c0_72] : memref<8x8x512xf32, #tpu.memory_space<vmem>>, vector<1x8x512xf32>
    %230 = vector.shape_cast %229 : vector<1x8x512xf32> to vector<8x512xf32>
    %231 = arith.truncf %223 : vector<8x128xf32> to vector<8x128xbf16>
    %c0_73 = arith.constant 0 : index
    %c0_74 = arith.constant 0 : index
    %232 = vector.load %arg4[%c0_73, %c0_74] : memref<128x512xbf16, #tpu.memory_space<vmem>>, vector<128x512xbf16>
    %cst_75 = arith.constant dense<0.000000e+00> : vector<8x512xf32>
    %233 = tpu.matmul %231, %232, %cst_75 {dimension_numbers = #tpu.dot_dimension_numbers<[1], [0], [0], [1], [0, 0, 1, 1], [], []>} : vector<8x128xbf16>, vector<128x512xbf16>, vector<8x512xf32> -> vector<8x512xf32>
    %234 = arith.addf %230, %233 : vector<8x512xf32>
    %235 = vector.extract_strided_slice %234 {offsets = [0, 0], sizes = [8, 128], strides = [1, 1]} : vector<8x512xf32> to vector<8x128xf32>
    %236 = arith.negf %235 : vector<8x128xf32>
    %237 = math.exp %236 : vector<8x128xf32>
    %cst_76 = arith.constant 1.000000e+00 : f32
    %238 = vector.broadcast %cst_76 : f32 to vector<8x128xf32>
    %239 = arith.addf %238, %237 : vector<8x128xf32>
    %240 = arith.divf %238, %239 : vector<8x128xf32>
    %241 = vector.extract_strided_slice %234 {offsets = [0, 128], sizes = [8, 128], strides = [1, 1]} : vector<8x512xf32> to vector<8x128xf32>
    %242 = arith.negf %241 : vector<8x128xf32>
    %243 = math.exp %242 : vector<8x128xf32>
    %cst_77 = arith.constant 1.000000e+00 : f32
    %244 = vector.broadcast %cst_77 : f32 to vector<8x128xf32>
    %245 = arith.addf %244, %243 : vector<8x128xf32>
    %246 = arith.divf %244, %245 : vector<8x128xf32>
    %247 = vector.extract_strided_slice %234 {offsets = [0, 256], sizes = [8, 128], strides = [1, 1]} : vector<8x512xf32> to vector<8x128xf32>
    %248 = math.tanh %247 : vector<8x128xf32>
    %249 = vector.extract_strided_slice %234 {offsets = [0, 384], sizes = [8, 128], strides = [1, 1]} : vector<8x512xf32> to vector<8x128xf32>
    %250 = arith.negf %249 : vector<8x128xf32>
    %251 = math.exp %250 : vector<8x128xf32>
    %cst_78 = arith.constant 1.000000e+00 : f32
    %252 = vector.broadcast %cst_78 : f32 to vector<8x128xf32>
    %253 = arith.addf %252, %251 : vector<8x128xf32>
    %254 = arith.divf %252, %253 : vector<8x128xf32>
    %255 = arith.mulf %246, %221 : vector<8x128xf32>
    %256 = arith.mulf %240, %248 : vector<8x128xf32>
    %257 = arith.addf %255, %256 : vector<8x128xf32>
    %258 = math.tanh %257 : vector<8x128xf32>
    %259 = arith.mulf %254, %258 : vector<8x128xf32>
    %260 = arith.index_cast %c6_i32 : i32 to index
    %c0_79 = arith.constant 0 : index
    %c0_80 = arith.constant 0 : index
    %261 = vector.load %arg7[%260, %c0_79, %c0_80] : memref<8x8x128xf32, #tpu.memory_space<vmem>>, vector<1x8x128xf32>
    %262 = vector.shape_cast %261 : vector<1x8x128xf32> to vector<8x128xf32>
    %263 = vector.shape_cast %259 : vector<8x128xf32> to vector<1x8x128xf32>
    tpu.vector_store %arg7[%260, %c0_79, %c0_80], %263 {strides = array<i32>} : memref<8x8x128xf32, #tpu.memory_space<vmem>>, vector<1x8x128xf32>,
    %c7_i32 = arith.constant 7 : i32
    %264 = arith.index_cast %c7_i32 : i32 to index
    %c0_81 = arith.constant 0 : index
    %c0_82 = arith.constant 0 : index
    %265 = vector.load %arg10[%264, %c0_81, %c0_82] : memref<8x8x512xf32, #tpu.memory_space<vmem>>, vector<1x8x512xf32>
    %266 = vector.shape_cast %265 : vector<1x8x512xf32> to vector<8x512xf32>
    %267 = arith.truncf %259 : vector<8x128xf32> to vector<8x128xbf16>
    %c0_83 = arith.constant 0 : index
    %c0_84 = arith.constant 0 : index
    %268 = vector.load %arg4[%c0_83, %c0_84] : memref<128x512xbf16, #tpu.memory_space<vmem>>, vector<128x512xbf16>
    %cst_85 = arith.constant dense<0.000000e+00> : vector<8x512xf32>
    %269 = tpu.matmul %267, %268, %cst_85 {dimension_numbers = #tpu.dot_dimension_numbers<[1], [0], [0], [1], [0, 0, 1, 1], [], []>} : vector<8x128xbf16>, vector<128x512xbf16>, vector<8x512xf32> -> vector<8x512xf32>
    %270 = arith.addf %266, %269 : vector<8x512xf32>
    %271 = vector.extract_strided_slice %270 {offsets = [0, 0], sizes = [8, 128], strides = [1, 1]} : vector<8x512xf32> to vector<8x128xf32>
    %272 = arith.negf %271 : vector<8x128xf32>
    %273 = math.exp %272 : vector<8x128xf32>
    %cst_86 = arith.constant 1.000000e+00 : f32
    %274 = vector.broadcast %cst_86 : f32 to vector<8x128xf32>
    %275 = arith.addf %274, %273 : vector<8x128xf32>
    %276 = arith.divf %274, %275 : vector<8x128xf32>
    %277 = vector.extract_strided_slice %270 {offsets = [0, 128], sizes = [8, 128], strides = [1, 1]} : vector<8x512xf32> to vector<8x128xf32>
    %278 = arith.negf %277 : vector<8x128xf32>
    %279 = math.exp %278 : vector<8x128xf32>
    %cst_87 = arith.constant 1.000000e+00 : f32
    %280 = vector.broadcast %cst_87 : f32 to vector<8x128xf32>
    %281 = arith.addf %280, %279 : vector<8x128xf32>
    %282 = arith.divf %280, %281 : vector<8x128xf32>
    %283 = vector.extract_strided_slice %270 {offsets = [0, 256], sizes = [8, 128], strides = [1, 1]} : vector<8x512xf32> to vector<8x128xf32>
    %284 = math.tanh %283 : vector<8x128xf32>
    %285 = vector.extract_strided_slice %270 {offsets = [0, 384], sizes = [8, 128], strides = [1, 1]} : vector<8x512xf32> to vector<8x128xf32>
    %286 = arith.negf %285 : vector<8x128xf32>
    %287 = math.exp %286 : vector<8x128xf32>
    %cst_88 = arith.constant 1.000000e+00 : f32
    %288 = vector.broadcast %cst_88 : f32 to vector<8x128xf32>
    %289 = arith.addf %288, %287 : vector<8x128xf32>
    %290 = arith.divf %288, %289 : vector<8x128xf32>
    %291 = arith.mulf %282, %257 : vector<8x128xf32>
    %292 = arith.mulf %276, %284 : vector<8x128xf32>
    %293 = arith.addf %291, %292 : vector<8x128xf32>
    %294 = math.tanh %293 : vector<8x128xf32>
    %295 = arith.mulf %290, %294 : vector<8x128xf32>
    %296 = arith.index_cast %c7_i32 : i32 to index
    %c0_89 = arith.constant 0 : index
    %c0_90 = arith.constant 0 : index
    %297 = vector.load %arg7[%296, %c0_89, %c0_90] : memref<8x8x128xf32, #tpu.memory_space<vmem>>, vector<1x8x128xf32>
    %298 = vector.shape_cast %297 : vector<1x8x128xf32> to vector<8x128xf32>
    %299 = vector.shape_cast %295 : vector<8x128xf32> to vector<1x8x128xf32>
    tpu.vector_store %arg7[%296, %c0_89, %c0_90], %299 {strides = array<i32>} : memref<8x8x128xf32, #tpu.memory_space<vmem>>, vector<1x8x128xf32>,
    %c8_i32 = arith.constant 8 : i32
    %c0_91 = arith.constant 0 : index
    %c0_92 = arith.constant 0 : index
    %c0_93 = arith.constant 0 : index
    %300 = vector.load %arg8[%c0_91, %c0_92, %c0_93] : memref<2x8x128xf32, #tpu.memory_space<vmem>>, vector<1x8x128xf32>
    %301 = vector.shape_cast %300 : vector<1x8x128xf32> to vector<8x128xf32>
    %302 = vector.shape_cast %295 : vector<8x128xf32> to vector<1x8x128xf32>
    tpu.vector_store %arg8[%c0_91, %c0_92, %c0_93], %302 {strides = array<i32>} : memref<2x8x128xf32, #tpu.memory_space<vmem>>, vector<1x8x128xf32>,
    %c0_94 = arith.constant 0 : index
    %c0_95 = arith.constant 0 : index
    %c0_96 = arith.constant 0 : index
    %303 = vector.load %arg9[%c0_94, %c0_95, %c0_96] : memref<2x8x128xf32, #tpu.memory_space<vmem>>, vector<1x8x128xf32>
    %304 = vector.shape_cast %303 : vector<1x8x128xf32> to vector<8x128xf32>
    %305 = vector.shape_cast %293 : vector<8x128xf32> to vector<1x8x128xf32>
    tpu.vector_store %arg9[%c0_94, %c0_95, %c0_96], %305 {strides = array<i32>} : memref<2x8x128xf32, #tpu.memory_space<vmem>>, vector<1x8x128xf32>,
    %c0_97 = arith.constant 0 : index
    %c0_98 = arith.constant 0 : index
    %c0_99 = arith.constant 0 : index
    %306 = vector.load %arg7[%c0_97, %c0_98, %c0_99] : memref<8x8x128xf32, #tpu.memory_space<vmem>>, vector<8x8x128xf32>
    %307 = vector.shape_cast %306 : vector<8x8x128xf32> to vector<64x128xf32>
    %308 = arith.truncf %307 : vector<64x128xf32> to vector<64x128xbf16>
    %c0_100 = arith.constant 0 : index
    %c0_101 = arith.constant 0 : index
    %309 = vector.load %arg3[%c0_100, %c0_101] : memref<128x512xbf16, #tpu.memory_space<vmem>>, vector<128x512xbf16>
    %cst_102 = arith.constant dense<0.000000e+00> : vector<64x512xf32>
    %310 = tpu.matmul %308, %309, %cst_102 {dimension_numbers = #tpu.dot_dimension_numbers<[1], [0], [0], [1], [0, 0, 1, 1], [], []>} : vector<64x128xbf16>, vector<128x512xbf16>, vector<64x512xf32> -> vector<64x512xf32>
    %c1 = arith.constant 1 : index
    %c0_103 = arith.constant 0 : index
    %c0_104 = arith.constant 0 : index
    %311 = vector.load %arg6[%c1, %c0_103, %c0_104] : memref<2x1x512xf32, #tpu.memory_space<vmem>>, vector<1x1x512xf32>
    %312 = vector.shape_cast %311 : vector<1x1x512xf32> to vector<1x512xf32>
    %313 = vector.broadcast %312 : vector<1x512xf32> to vector<64x512xf32>
    %314 = arith.addf %310, %313 : vector<64x512xf32>
    %315 = vector.shape_cast %314 : vector<64x512xf32> to vector<8x8x512xf32>
    %c0_105 = arith.constant 0 : index
    %c0_106 = arith.constant 0 : index
    %c0_107 = arith.constant 0 : index
    %316 = vector.load %arg10[%c0_105, %c0_106, %c0_107] : memref<8x8x512xf32, #tpu.memory_space<vmem>>, vector<8x8x512xf32>
    tpu.vector_store %arg10[%c0_105, %c0_106, %c0_107], %315 {strides = array<i32>} : memref<8x8x512xf32, #tpu.memory_space<vmem>>, vector<8x8x512xf32>,
    %cst_108 = arith.constant 0.000000e+00 : f32
    %317 = vector.broadcast %cst_108 : f32 to vector<8x128xf32>
    %c0_i32_109 = arith.constant 0 : i32
    %318 = arith.index_cast %c0_i32_109 : i32 to index
    %c0_110 = arith.constant 0 : index
    %c0_111 = arith.constant 0 : index
    %319 = vector.load %arg10[%318, %c0_110, %c0_111] : memref<8x8x512xf32, #tpu.memory_space<vmem>>, vector<1x8x512xf32>
    %320 = vector.shape_cast %319 : vector<1x8x512xf32> to vector<8x512xf32>
    %321 = arith.truncf %317 : vector<8x128xf32> to vector<8x128xbf16>
    %c0_112 = arith.constant 0 : index
    %c0_113 = arith.constant 0 : index
    %322 = vector.load %arg5[%c0_112, %c0_113] : memref<128x512xbf16, #tpu.memory_space<vmem>>, vector<128x512xbf16>
    %cst_114 = arith.constant dense<0.000000e+00> : vector<8x512xf32>
    %323 = tpu.matmul %321, %322, %cst_114 {dimension_numbers = #tpu.dot_dimension_numbers<[1], [0], [0], [1], [0, 0, 1, 1], [], []>} : vector<8x128xbf16>, vector<128x512xbf16>, vector<8x512xf32> -> vector<8x512xf32>
    %324 = arith.addf %320, %323 : vector<8x512xf32>
    %325 = vector.extract_strided_slice %324 {offsets = [0, 0], sizes = [8, 128], strides = [1, 1]} : vector<8x512xf32> to vector<8x128xf32>
    %326 = arith.negf %325 : vector<8x128xf32>
    %327 = math.exp %326 : vector<8x128xf32>
    %cst_115 = arith.constant 1.000000e+00 : f32
    %328 = vector.broadcast %cst_115 : f32 to vector<8x128xf32>
    %329 = arith.addf %328, %327 : vector<8x128xf32>
    %330 = arith.divf %328, %329 : vector<8x128xf32>
    %331 = vector.extract_strided_slice %324 {offsets = [0, 128], sizes = [8, 128], strides = [1, 1]} : vector<8x512xf32> to vector<8x128xf32>
    %332 = arith.negf %331 : vector<8x128xf32>
    %333 = math.exp %332 : vector<8x128xf32>
    %cst_116 = arith.constant 1.000000e+00 : f32
    %334 = vector.broadcast %cst_116 : f32 to vector<8x128xf32>
    %335 = arith.addf %334, %333 : vector<8x128xf32>
    %336 = arith.divf %334, %335 : vector<8x128xf32>
    %337 = vector.extract_strided_slice %324 {offsets = [0, 256], sizes = [8, 128], strides = [1, 1]} : vector<8x512xf32> to vector<8x128xf32>
    %338 = math.tanh %337 : vector<8x128xf32>
    %339 = vector.extract_strided_slice %324 {offsets = [0, 384], sizes = [8, 128], strides = [1, 1]} : vector<8x512xf32> to vector<8x128xf32>
    %340 = arith.negf %339 : vector<8x128xf32>
    %341 = math.exp %340 : vector<8x128xf32>
    %cst_117 = arith.constant 1.000000e+00 : f32
    %342 = vector.broadcast %cst_117 : f32 to vector<8x128xf32>
    %343 = arith.addf %342, %341 : vector<8x128xf32>
    %344 = arith.divf %342, %343 : vector<8x128xf32>
    %345 = arith.mulf %336, %317 : vector<8x128xf32>
    %346 = arith.mulf %330, %338 : vector<8x128xf32>
    %347 = arith.addf %345, %346 : vector<8x128xf32>
    %348 = math.tanh %347 : vector<8x128xf32>
    %349 = arith.mulf %344, %348 : vector<8x128xf32>
    %350 = arith.index_cast %c0_i32_109 : i32 to index
    %c0_118 = arith.constant 0 : index
    %c0_119 = arith.constant 0 : index
    %351 = vector.load %arg7[%350, %c0_118, %c0_119] : memref<8x8x128xf32, #tpu.memory_space<vmem>>, vector<1x8x128xf32>
    %352 = vector.shape_cast %351 : vector<1x8x128xf32> to vector<8x128xf32>
    %353 = vector.shape_cast %349 : vector<8x128xf32> to vector<1x8x128xf32>
    tpu.vector_store %arg7[%350, %c0_118, %c0_119], %353 {strides = array<i32>} : memref<8x8x128xf32, #tpu.memory_space<vmem>>, vector<1x8x128xf32>,
    %c1_i32_120 = arith.constant 1 : i32
    %354 = arith.index_cast %c1_i32_120 : i32 to index
    %c0_121 = arith.constant 0 : index
    %c0_122 = arith.constant 0 : index
    %355 = vector.load %arg10[%354, %c0_121, %c0_122] : memref<8x8x512xf32, #tpu.memory_space<vmem>>, vector<1x8x512xf32>
    %356 = vector.shape_cast %355 : vector<1x8x512xf32> to vector<8x512xf32>
    %357 = arith.truncf %349 : vector<8x128xf32> to vector<8x128xbf16>
    %c0_123 = arith.constant 0 : index
    %c0_124 = arith.constant 0 : index
    %358 = vector.load %arg5[%c0_123, %c0_124] : memref<128x512xbf16, #tpu.memory_space<vmem>>, vector<128x512xbf16>
    %cst_125 = arith.constant dense<0.000000e+00> : vector<8x512xf32>
    %359 = tpu.matmul %357, %358, %cst_125 {dimension_numbers = #tpu.dot_dimension_numbers<[1], [0], [0], [1], [0, 0, 1, 1], [], []>} : vector<8x128xbf16>, vector<128x512xbf16>, vector<8x512xf32> -> vector<8x512xf32>
    %360 = arith.addf %356, %359 : vector<8x512xf32>
    %361 = vector.extract_strided_slice %360 {offsets = [0, 0], sizes = [8, 128], strides = [1, 1]} : vector<8x512xf32> to vector<8x128xf32>
    %362 = arith.negf %361 : vector<8x128xf32>
    %363 = math.exp %362 : vector<8x128xf32>
    %cst_126 = arith.constant 1.000000e+00 : f32
    %364 = vector.broadcast %cst_126 : f32 to vector<8x128xf32>
    %365 = arith.addf %364, %363 : vector<8x128xf32>
    %366 = arith.divf %364, %365 : vector<8x128xf32>
    %367 = vector.extract_strided_slice %360 {offsets = [0, 128], sizes = [8, 128], strides = [1, 1]} : vector<8x512xf32> to vector<8x128xf32>
    %368 = arith.negf %367 : vector<8x128xf32>
    %369 = math.exp %368 : vector<8x128xf32>
    %cst_127 = arith.constant 1.000000e+00 : f32
    %370 = vector.broadcast %cst_127 : f32 to vector<8x128xf32>
    %371 = arith.addf %370, %369 : vector<8x128xf32>
    %372 = arith.divf %370, %371 : vector<8x128xf32>
    %373 = vector.extract_strided_slice %360 {offsets = [0, 256], sizes = [8, 128], strides = [1, 1]} : vector<8x512xf32> to vector<8x128xf32>
    %374 = math.tanh %373 : vector<8x128xf32>
    %375 = vector.extract_strided_slice %360 {offsets = [0, 384], sizes = [8, 128], strides = [1, 1]} : vector<8x512xf32> to vector<8x128xf32>
    %376 = arith.negf %375 : vector<8x128xf32>
    %377 = math.exp %376 : vector<8x128xf32>
    %cst_128 = arith.constant 1.000000e+00 : f32
    %378 = vector.broadcast %cst_128 : f32 to vector<8x128xf32>
    %379 = arith.addf %378, %377 : vector<8x128xf32>
    %380 = arith.divf %378, %379 : vector<8x128xf32>
    %381 = arith.mulf %372, %347 : vector<8x128xf32>
    %382 = arith.mulf %366, %374 : vector<8x128xf32>
    %383 = arith.addf %381, %382 : vector<8x128xf32>
    %384 = math.tanh %383 : vector<8x128xf32>
    %385 = arith.mulf %380, %384 : vector<8x128xf32>
    %386 = arith.index_cast %c1_i32_120 : i32 to index
    %c0_129 = arith.constant 0 : index
    %c0_130 = arith.constant 0 : index
    %387 = vector.load %arg7[%386, %c0_129, %c0_130] : memref<8x8x128xf32, #tpu.memory_space<vmem>>, vector<1x8x128xf32>
    %388 = vector.shape_cast %387 : vector<1x8x128xf32> to vector<8x128xf32>
    %389 = vector.shape_cast %385 : vector<8x128xf32> to vector<1x8x128xf32>
    tpu.vector_store %arg7[%386, %c0_129, %c0_130], %389 {strides = array<i32>} : memref<8x8x128xf32, #tpu.memory_space<vmem>>, vector<1x8x128xf32>,
    %c2_i32_131 = arith.constant 2 : i32
    %390 = arith.index_cast %c2_i32_131 : i32 to index
    %c0_132 = arith.constant 0 : index
    %c0_133 = arith.constant 0 : index
    %391 = vector.load %arg10[%390, %c0_132, %c0_133] : memref<8x8x512xf32, #tpu.memory_space<vmem>>, vector<1x8x512xf32>
    %392 = vector.shape_cast %391 : vector<1x8x512xf32> to vector<8x512xf32>
    %393 = arith.truncf %385 : vector<8x128xf32> to vector<8x128xbf16>
    %c0_134 = arith.constant 0 : index
    %c0_135 = arith.constant 0 : index
    %394 = vector.load %arg5[%c0_134, %c0_135] : memref<128x512xbf16, #tpu.memory_space<vmem>>, vector<128x512xbf16>
    %cst_136 = arith.constant dense<0.000000e+00> : vector<8x512xf32>
    %395 = tpu.matmul %393, %394, %cst_136 {dimension_numbers = #tpu.dot_dimension_numbers<[1], [0], [0], [1], [0, 0, 1, 1], [], []>} : vector<8x128xbf16>, vector<128x512xbf16>, vector<8x512xf32> -> vector<8x512xf32>
    %396 = arith.addf %392, %395 : vector<8x512xf32>
    %397 = vector.extract_strided_slice %396 {offsets = [0, 0], sizes = [8, 128], strides = [1, 1]} : vector<8x512xf32> to vector<8x128xf32>
    %398 = arith.negf %397 : vector<8x128xf32>
    %399 = math.exp %398 : vector<8x128xf32>
    %cst_137 = arith.constant 1.000000e+00 : f32
    %400 = vector.broadcast %cst_137 : f32 to vector<8x128xf32>
    %401 = arith.addf %400, %399 : vector<8x128xf32>
    %402 = arith.divf %400, %401 : vector<8x128xf32>
    %403 = vector.extract_strided_slice %396 {offsets = [0, 128], sizes = [8, 128], strides = [1, 1]} : vector<8x512xf32> to vector<8x128xf32>
    %404 = arith.negf %403 : vector<8x128xf32>
    %405 = math.exp %404 : vector<8x128xf32>
    %cst_138 = arith.constant 1.000000e+00 : f32
    %406 = vector.broadcast %cst_138 : f32 to vector<8x128xf32>
    %407 = arith.addf %406, %405 : vector<8x128xf32>
    %408 = arith.divf %406, %407 : vector<8x128xf32>
    %409 = vector.extract_strided_slice %396 {offsets = [0, 256], sizes = [8, 128], strides = [1, 1]} : vector<8x512xf32> to vector<8x128xf32>
    %410 = math.tanh %409 : vector<8x128xf32>
    %411 = vector.extract_strided_slice %396 {offsets = [0, 384], sizes = [8, 128], strides = [1, 1]} : vector<8x512xf32> to vector<8x128xf32>
    %412 = arith.negf %411 : vector<8x128xf32>
    %413 = math.exp %412 : vector<8x128xf32>
    %cst_139 = arith.constant 1.000000e+00 : f32
    %414 = vector.broadcast %cst_139 : f32 to vector<8x128xf32>
    %415 = arith.addf %414, %413 : vector<8x128xf32>
    %416 = arith.divf %414, %415 : vector<8x128xf32>
    %417 = arith.mulf %408, %383 : vector<8x128xf32>
    %418 = arith.mulf %402, %410 : vector<8x128xf32>
    %419 = arith.addf %417, %418 : vector<8x128xf32>
    %420 = math.tanh %419 : vector<8x128xf32>
    %421 = arith.mulf %416, %420 : vector<8x128xf32>
    %422 = arith.index_cast %c2_i32_131 : i32 to index
    %c0_140 = arith.constant 0 : index
    %c0_141 = arith.constant 0 : index
    %423 = vector.load %arg7[%422, %c0_140, %c0_141] : memref<8x8x128xf32, #tpu.memory_space<vmem>>, vector<1x8x128xf32>
    %424 = vector.shape_cast %423 : vector<1x8x128xf32> to vector<8x128xf32>
    %425 = vector.shape_cast %421 : vector<8x128xf32> to vector<1x8x128xf32>
    tpu.vector_store %arg7[%422, %c0_140, %c0_141], %425 {strides = array<i32>} : memref<8x8x128xf32, #tpu.memory_space<vmem>>, vector<1x8x128xf32>,
    %c3_i32_142 = arith.constant 3 : i32
    %426 = arith.index_cast %c3_i32_142 : i32 to index
    %c0_143 = arith.constant 0 : index
    %c0_144 = arith.constant 0 : index
    %427 = vector.load %arg10[%426, %c0_143, %c0_144] : memref<8x8x512xf32, #tpu.memory_space<vmem>>, vector<1x8x512xf32>
    %428 = vector.shape_cast %427 : vector<1x8x512xf32> to vector<8x512xf32>
    %429 = arith.truncf %421 : vector<8x128xf32> to vector<8x128xbf16>
    %c0_145 = arith.constant 0 : index
    %c0_146 = arith.constant 0 : index
    %430 = vector.load %arg5[%c0_145, %c0_146] : memref<128x512xbf16, #tpu.memory_space<vmem>>, vector<128x512xbf16>
    %cst_147 = arith.constant dense<0.000000e+00> : vector<8x512xf32>
    %431 = tpu.matmul %429, %430, %cst_147 {dimension_numbers = #tpu.dot_dimension_numbers<[1], [0], [0], [1], [0, 0, 1, 1], [], []>} : vector<8x128xbf16>, vector<128x512xbf16>, vector<8x512xf32> -> vector<8x512xf32>
    %432 = arith.addf %428, %431 : vector<8x512xf32>
    %433 = vector.extract_strided_slice %432 {offsets = [0, 0], sizes = [8, 128], strides = [1, 1]} : vector<8x512xf32> to vector<8x128xf32>
    %434 = arith.negf %433 : vector<8x128xf32>
    %435 = math.exp %434 : vector<8x128xf32>
    %cst_148 = arith.constant 1.000000e+00 : f32
    %436 = vector.broadcast %cst_148 : f32 to vector<8x128xf32>
    %437 = arith.addf %436, %435 : vector<8x128xf32>
    %438 = arith.divf %436, %437 : vector<8x128xf32>
    %439 = vector.extract_strided_slice %432 {offsets = [0, 128], sizes = [8, 128], strides = [1, 1]} : vector<8x512xf32> to vector<8x128xf32>
    %440 = arith.negf %439 : vector<8x128xf32>
    %441 = math.exp %440 : vector<8x128xf32>
    %cst_149 = arith.constant 1.000000e+00 : f32
    %442 = vector.broadcast %cst_149 : f32 to vector<8x128xf32>
    %443 = arith.addf %442, %441 : vector<8x128xf32>
    %444 = arith.divf %442, %443 : vector<8x128xf32>
    %445 = vector.extract_strided_slice %432 {offsets = [0, 256], sizes = [8, 128], strides = [1, 1]} : vector<8x512xf32> to vector<8x128xf32>
    %446 = math.tanh %445 : vector<8x128xf32>
    %447 = vector.extract_strided_slice %432 {offsets = [0, 384], sizes = [8, 128], strides = [1, 1]} : vector<8x512xf32> to vector<8x128xf32>
    %448 = arith.negf %447 : vector<8x128xf32>
    %449 = math.exp %448 : vector<8x128xf32>
    %cst_150 = arith.constant 1.000000e+00 : f32
    %450 = vector.broadcast %cst_150 : f32 to vector<8x128xf32>
    %451 = arith.addf %450, %449 : vector<8x128xf32>
    %452 = arith.divf %450, %451 : vector<8x128xf32>
    %453 = arith.mulf %444, %419 : vector<8x128xf32>
    %454 = arith.mulf %438, %446 : vector<8x128xf32>
    %455 = arith.addf %453, %454 : vector<8x128xf32>
    %456 = math.tanh %455 : vector<8x128xf32>
    %457 = arith.mulf %452, %456 : vector<8x128xf32>
    %458 = arith.index_cast %c3_i32_142 : i32 to index
    %c0_151 = arith.constant 0 : index
    %c0_152 = arith.constant 0 : index
    %459 = vector.load %arg7[%458, %c0_151, %c0_152] : memref<8x8x128xf32, #tpu.memory_space<vmem>>, vector<1x8x128xf32>
    %460 = vector.shape_cast %459 : vector<1x8x128xf32> to vector<8x128xf32>
    %461 = vector.shape_cast %457 : vector<8x128xf32> to vector<1x8x128xf32>
    tpu.vector_store %arg7[%458, %c0_151, %c0_152], %461 {strides = array<i32>} : memref<8x8x128xf32, #tpu.memory_space<vmem>>, vector<1x8x128xf32>,
    %c4_i32_153 = arith.constant 4 : i32
    %462 = arith.index_cast %c4_i32_153 : i32 to index
    %c0_154 = arith.constant 0 : index
    %c0_155 = arith.constant 0 : index
    %463 = vector.load %arg10[%462, %c0_154, %c0_155] : memref<8x8x512xf32, #tpu.memory_space<vmem>>, vector<1x8x512xf32>
    %464 = vector.shape_cast %463 : vector<1x8x512xf32> to vector<8x512xf32>
    %465 = arith.truncf %457 : vector<8x128xf32> to vector<8x128xbf16>
    %c0_156 = arith.constant 0 : index
    %c0_157 = arith.constant 0 : index
    %466 = vector.load %arg5[%c0_156, %c0_157] : memref<128x512xbf16, #tpu.memory_space<vmem>>, vector<128x512xbf16>
    %cst_158 = arith.constant dense<0.000000e+00> : vector<8x512xf32>
    %467 = tpu.matmul %465, %466, %cst_158 {dimension_numbers = #tpu.dot_dimension_numbers<[1], [0], [0], [1], [0, 0, 1, 1], [], []>} : vector<8x128xbf16>, vector<128x512xbf16>, vector<8x512xf32> -> vector<8x512xf32>
    %468 = arith.addf %464, %467 : vector<8x512xf32>
    %469 = vector.extract_strided_slice %468 {offsets = [0, 0], sizes = [8, 128], strides = [1, 1]} : vector<8x512xf32> to vector<8x128xf32>
    %470 = arith.negf %469 : vector<8x128xf32>
    %471 = math.exp %470 : vector<8x128xf32>
    %cst_159 = arith.constant 1.000000e+00 : f32
    %472 = vector.broadcast %cst_159 : f32 to vector<8x128xf32>
    %473 = arith.addf %472, %471 : vector<8x128xf32>
    %474 = arith.divf %472, %473 : vector<8x128xf32>
    %475 = vector.extract_strided_slice %468 {offsets = [0, 128], sizes = [8, 128], strides = [1, 1]} : vector<8x512xf32> to vector<8x128xf32>
    %476 = arith.negf %475 : vector<8x128xf32>
    %477 = math.exp %476 : vector<8x128xf32>
    %cst_160 = arith.constant 1.000000e+00 : f32
    %478 = vector.broadcast %cst_160 : f32 to vector<8x128xf32>
    %479 = arith.addf %478, %477 : vector<8x128xf32>
    %480 = arith.divf %478, %479 : vector<8x128xf32>
    %481 = vector.extract_strided_slice %468 {offsets = [0, 256], sizes = [8, 128], strides = [1, 1]} : vector<8x512xf32> to vector<8x128xf32>
    %482 = math.tanh %481 : vector<8x128xf32>
    %483 = vector.extract_strided_slice %468 {offsets = [0, 384], sizes = [8, 128], strides = [1, 1]} : vector<8x512xf32> to vector<8x128xf32>
    %484 = arith.negf %483 : vector<8x128xf32>
    %485 = math.exp %484 : vector<8x128xf32>
    %cst_161 = arith.constant 1.000000e+00 : f32
    %486 = vector.broadcast %cst_161 : f32 to vector<8x128xf32>
    %487 = arith.addf %486, %485 : vector<8x128xf32>
    %488 = arith.divf %486, %487 : vector<8x128xf32>
    %489 = arith.mulf %480, %455 : vector<8x128xf32>
    %490 = arith.mulf %474, %482 : vector<8x128xf32>
    %491 = arith.addf %489, %490 : vector<8x128xf32>
    %492 = math.tanh %491 : vector<8x128xf32>
    %493 = arith.mulf %488, %492 : vector<8x128xf32>
    %494 = arith.index_cast %c4_i32_153 : i32 to index
    %c0_162 = arith.constant 0 : index
    %c0_163 = arith.constant 0 : index
    %495 = vector.load %arg7[%494, %c0_162, %c0_163] : memref<8x8x128xf32, #tpu.memory_space<vmem>>, vector<1x8x128xf32>
    %496 = vector.shape_cast %495 : vector<1x8x128xf32> to vector<8x128xf32>
    %497 = vector.shape_cast %493 : vector<8x128xf32> to vector<1x8x128xf32>
    tpu.vector_store %arg7[%494, %c0_162, %c0_163], %497 {strides = array<i32>} : memref<8x8x128xf32, #tpu.memory_space<vmem>>, vector<1x8x128xf32>,
    %c5_i32_164 = arith.constant 5 : i32
    %498 = arith.index_cast %c5_i32_164 : i32 to index
    %c0_165 = arith.constant 0 : index
    %c0_166 = arith.constant 0 : index
    %499 = vector.load %arg10[%498, %c0_165, %c0_166] : memref<8x8x512xf32, #tpu.memory_space<vmem>>, vector<1x8x512xf32>
    %500 = vector.shape_cast %499 : vector<1x8x512xf32> to vector<8x512xf32>
    %501 = arith.truncf %493 : vector<8x128xf32> to vector<8x128xbf16>
    %c0_167 = arith.constant 0 : index
    %c0_168 = arith.constant 0 : index
    %502 = vector.load %arg5[%c0_167, %c0_168] : memref<128x512xbf16, #tpu.memory_space<vmem>>, vector<128x512xbf16>
    %cst_169 = arith.constant dense<0.000000e+00> : vector<8x512xf32>
    %503 = tpu.matmul %501, %502, %cst_169 {dimension_numbers = #tpu.dot_dimension_numbers<[1], [0], [0], [1], [0, 0, 1, 1], [], []>} : vector<8x128xbf16>, vector<128x512xbf16>, vector<8x512xf32> -> vector<8x512xf32>
    %504 = arith.addf %500, %503 : vector<8x512xf32>
    %505 = vector.extract_strided_slice %504 {offsets = [0, 0], sizes = [8, 128], strides = [1, 1]} : vector<8x512xf32> to vector<8x128xf32>
    %506 = arith.negf %505 : vector<8x128xf32>
    %507 = math.exp %506 : vector<8x128xf32>
    %cst_170 = arith.constant 1.000000e+00 : f32
    %508 = vector.broadcast %cst_170 : f32 to vector<8x128xf32>
    %509 = arith.addf %508, %507 : vector<8x128xf32>
    %510 = arith.divf %508, %509 : vector<8x128xf32>
    %511 = vector.extract_strided_slice %504 {offsets = [0, 128], sizes = [8, 128], strides = [1, 1]} : vector<8x512xf32> to vector<8x128xf32>
    %512 = arith.negf %511 : vector<8x128xf32>
    %513 = math.exp %512 : vector<8x128xf32>
    %cst_171 = arith.constant 1.000000e+00 : f32
    %514 = vector.broadcast %cst_171 : f32 to vector<8x128xf32>
    %515 = arith.addf %514, %513 : vector<8x128xf32>
    %516 = arith.divf %514, %515 : vector<8x128xf32>
    %517 = vector.extract_strided_slice %504 {offsets = [0, 256], sizes = [8, 128], strides = [1, 1]} : vector<8x512xf32> to vector<8x128xf32>
    %518 = math.tanh %517 : vector<8x128xf32>
    %519 = vector.extract_strided_slice %504 {offsets = [0, 384], sizes = [8, 128], strides = [1, 1]} : vector<8x512xf32> to vector<8x128xf32>
    %520 = arith.negf %519 : vector<8x128xf32>
    %521 = math.exp %520 : vector<8x128xf32>
    %cst_172 = arith.constant 1.000000e+00 : f32
    %522 = vector.broadcast %cst_172 : f32 to vector<8x128xf32>
    %523 = arith.addf %522, %521 : vector<8x128xf32>
    %524 = arith.divf %522, %523 : vector<8x128xf32>
    %525 = arith.mulf %516, %491 : vector<8x128xf32>
    %526 = arith.mulf %510, %518 : vector<8x128xf32>
    %527 = arith.addf %525, %526 : vector<8x128xf32>
    %528 = math.tanh %527 : vector<8x128xf32>
    %529 = arith.mulf %524, %528 : vector<8x128xf32>
    %530 = arith.index_cast %c5_i32_164 : i32 to index
    %c0_173 = arith.constant 0 : index
    %c0_174 = arith.constant 0 : index
    %531 = vector.load %arg7[%530, %c0_173, %c0_174] : memref<8x8x128xf32, #tpu.memory_space<vmem>>, vector<1x8x128xf32>
    %532 = vector.shape_cast %531 : vector<1x8x128xf32> to vector<8x128xf32>
    %533 = vector.shape_cast %529 : vector<8x128xf32> to vector<1x8x128xf32>
    tpu.vector_store %arg7[%530, %c0_173, %c0_174], %533 {strides = array<i32>} : memref<8x8x128xf32, #tpu.memory_space<vmem>>, vector<1x8x128xf32>,
    %c6_i32_175 = arith.constant 6 : i32
    %534 = arith.index_cast %c6_i32_175 : i32 to index
    %c0_176 = arith.constant 0 : index
    %c0_177 = arith.constant 0 : index
    %535 = vector.load %arg10[%534, %c0_176, %c0_177] : memref<8x8x512xf32, #tpu.memory_space<vmem>>, vector<1x8x512xf32>
    %536 = vector.shape_cast %535 : vector<1x8x512xf32> to vector<8x512xf32>
    %537 = arith.truncf %529 : vector<8x128xf32> to vector<8x128xbf16>
    %c0_178 = arith.constant 0 : index
    %c0_179 = arith.constant 0 : index
    %538 = vector.load %arg5[%c0_178, %c0_179] : memref<128x512xbf16, #tpu.memory_space<vmem>>, vector<128x512xbf16>
    %cst_180 = arith.constant dense<0.000000e+00> : vector<8x512xf32>
    %539 = tpu.matmul %537, %538, %cst_180 {dimension_numbers = #tpu.dot_dimension_numbers<[1], [0], [0], [1], [0, 0, 1, 1], [], []>} : vector<8x128xbf16>, vector<128x512xbf16>, vector<8x512xf32> -> vector<8x512xf32>
    %540 = arith.addf %536, %539 : vector<8x512xf32>
    %541 = vector.extract_strided_slice %540 {offsets = [0, 0], sizes = [8, 128], strides = [1, 1]} : vector<8x512xf32> to vector<8x128xf32>
    %542 = arith.negf %541 : vector<8x128xf32>
    %543 = math.exp %542 : vector<8x128xf32>
    %cst_181 = arith.constant 1.000000e+00 : f32
    %544 = vector.broadcast %cst_181 : f32 to vector<8x128xf32>
    %545 = arith.addf %544, %543 : vector<8x128xf32>
    %546 = arith.divf %544, %545 : vector<8x128xf32>
    %547 = vector.extract_strided_slice %540 {offsets = [0, 128], sizes = [8, 128], strides = [1, 1]} : vector<8x512xf32> to vector<8x128xf32>
    %548 = arith.negf %547 : vector<8x128xf32>
    %549 = math.exp %548 : vector<8x128xf32>
    %cst_182 = arith.constant 1.000000e+00 : f32
    %550 = vector.broadcast %cst_182 : f32 to vector<8x128xf32>
    %551 = arith.addf %550, %549 : vector<8x128xf32>
    %552 = arith.divf %550, %551 : vector<8x128xf32>
    %553 = vector.extract_strided_slice %540 {offsets = [0, 256], sizes = [8, 128], strides = [1, 1]} : vector<8x512xf32> to vector<8x128xf32>
    %554 = math.tanh %553 : vector<8x128xf32>
    %555 = vector.extract_strided_slice %540 {offsets = [0, 384], sizes = [8, 128], strides = [1, 1]} : vector<8x512xf32> to vector<8x128xf32>
    %556 = arith.negf %555 : vector<8x128xf32>
    %557 = math.exp %556 : vector<8x128xf32>
    %cst_183 = arith.constant 1.000000e+00 : f32
    %558 = vector.broadcast %cst_183 : f32 to vector<8x128xf32>
    %559 = arith.addf %558, %557 : vector<8x128xf32>
    %560 = arith.divf %558, %559 : vector<8x128xf32>
    %561 = arith.mulf %552, %527 : vector<8x128xf32>
    %562 = arith.mulf %546, %554 : vector<8x128xf32>
    %563 = arith.addf %561, %562 : vector<8x128xf32>
    %564 = math.tanh %563 : vector<8x128xf32>
    %565 = arith.mulf %560, %564 : vector<8x128xf32>
    %566 = arith.index_cast %c6_i32_175 : i32 to index
    %c0_184 = arith.constant 0 : index
    %c0_185 = arith.constant 0 : index
    %567 = vector.load %arg7[%566, %c0_184, %c0_185] : memref<8x8x128xf32, #tpu.memory_space<vmem>>, vector<1x8x128xf32>
    %568 = vector.shape_cast %567 : vector<1x8x128xf32> to vector<8x128xf32>
    %569 = vector.shape_cast %565 : vector<8x128xf32> to vector<1x8x128xf32>
    tpu.vector_store %arg7[%566, %c0_184, %c0_185], %569 {strides = array<i32>} : memref<8x8x128xf32, #tpu.memory_space<vmem>>, vector<1x8x128xf32>,
    %c7_i32_186 = arith.constant 7 : i32
    %570 = arith.index_cast %c7_i32_186 : i32 to index
    %c0_187 = arith.constant 0 : index
    %c0_188 = arith.constant 0 : index
    %571 = vector.load %arg10[%570, %c0_187, %c0_188] : memref<8x8x512xf32, #tpu.memory_space<vmem>>, vector<1x8x512xf32>
    %572 = vector.shape_cast %571 : vector<1x8x512xf32> to vector<8x512xf32>
    %573 = arith.truncf %565 : vector<8x128xf32> to vector<8x128xbf16>
    %c0_189 = arith.constant 0 : index
    %c0_190 = arith.constant 0 : index
    %574 = vector.load %arg5[%c0_189, %c0_190] : memref<128x512xbf16, #tpu.memory_space<vmem>>, vector<128x512xbf16>
    %cst_191 = arith.constant dense<0.000000e+00> : vector<8x512xf32>
    %575 = tpu.matmul %573, %574, %cst_191 {dimension_numbers = #tpu.dot_dimension_numbers<[1], [0], [0], [1], [0, 0, 1, 1], [], []>} : vector<8x128xbf16>, vector<128x512xbf16>, vector<8x512xf32> -> vector<8x512xf32>
    %576 = arith.addf %572, %575 : vector<8x512xf32>
    %577 = vector.extract_strided_slice %576 {offsets = [0, 0], sizes = [8, 128], strides = [1, 1]} : vector<8x512xf32> to vector<8x128xf32>
    %578 = arith.negf %577 : vector<8x128xf32>
    %579 = math.exp %578 : vector<8x128xf32>
    %cst_192 = arith.constant 1.000000e+00 : f32
    %580 = vector.broadcast %cst_192 : f32 to vector<8x128xf32>
    %581 = arith.addf %580, %579 : vector<8x128xf32>
    %582 = arith.divf %580, %581 : vector<8x128xf32>
    %583 = vector.extract_strided_slice %576 {offsets = [0, 128], sizes = [8, 128], strides = [1, 1]} : vector<8x512xf32> to vector<8x128xf32>
    %584 = arith.negf %583 : vector<8x128xf32>
    %585 = math.exp %584 : vector<8x128xf32>
    %cst_193 = arith.constant 1.000000e+00 : f32
    %586 = vector.broadcast %cst_193 : f32 to vector<8x128xf32>
    %587 = arith.addf %586, %585 : vector<8x128xf32>
    %588 = arith.divf %586, %587 : vector<8x128xf32>
    %589 = vector.extract_strided_slice %576 {offsets = [0, 256], sizes = [8, 128], strides = [1, 1]} : vector<8x512xf32> to vector<8x128xf32>
    %590 = math.tanh %589 : vector<8x128xf32>
    %591 = vector.extract_strided_slice %576 {offsets = [0, 384], sizes = [8, 128], strides = [1, 1]} : vector<8x512xf32> to vector<8x128xf32>
    %592 = arith.negf %591 : vector<8x128xf32>
    %593 = math.exp %592 : vector<8x128xf32>
    %cst_194 = arith.constant 1.000000e+00 : f32
    %594 = vector.broadcast %cst_194 : f32 to vector<8x128xf32>
    %595 = arith.addf %594, %593 : vector<8x128xf32>
    %596 = arith.divf %594, %595 : vector<8x128xf32>
    %597 = arith.mulf %588, %563 : vector<8x128xf32>
    %598 = arith.mulf %582, %590 : vector<8x128xf32>
    %599 = arith.addf %597, %598 : vector<8x128xf32>
    %600 = math.tanh %599 : vector<8x128xf32>
    %601 = arith.mulf %596, %600 : vector<8x128xf32>
    %602 = arith.index_cast %c7_i32_186 : i32 to index
    %c0_195 = arith.constant 0 : index
    %c0_196 = arith.constant 0 : index
    %603 = vector.load %arg7[%602, %c0_195, %c0_196] : memref<8x8x128xf32, #tpu.memory_space<vmem>>, vector<1x8x128xf32>
    %604 = vector.shape_cast %603 : vector<1x8x128xf32> to vector<8x128xf32>
    %605 = vector.shape_cast %601 : vector<8x128xf32> to vector<1x8x128xf32>
    tpu.vector_store %arg7[%602, %c0_195, %c0_196], %605 {strides = array<i32>} : memref<8x8x128xf32, #tpu.memory_space<vmem>>, vector<1x8x128xf32>,
    %c8_i32_197 = arith.constant 8 : i32
    %c1_198 = arith.constant 1 : index
    %c0_199 = arith.constant 0 : index
    %c0_200 = arith.constant 0 : index
    %606 = vector.load %arg8[%c1_198, %c0_199, %c0_200] : memref<2x8x128xf32, #tpu.memory_space<vmem>>, vector<1x8x128xf32>
    %607 = vector.shape_cast %606 : vector<1x8x128xf32> to vector<8x128xf32>
    %608 = vector.shape_cast %601 : vector<8x128xf32> to vector<1x8x128xf32>
    tpu.vector_store %arg8[%c1_198, %c0_199, %c0_200], %608 {strides = array<i32>} : memref<2x8x128xf32, #tpu.memory_space<vmem>>, vector<1x8x128xf32>,
    %c1_201 = arith.constant 1 : index
    %c0_202 = arith.constant 0 : index
    %c0_203 = arith.constant 0 : index
    %609 = vector.load %arg9[%c1_201, %c0_202, %c0_203] : memref<2x8x128xf32, #tpu.memory_space<vmem>>, vector<1x8x128xf32>
    %610 = vector.shape_cast %609 : vector<1x8x128xf32> to vector<8x128xf32>
    %611 = vector.shape_cast %599 : vector<8x128xf32> to vector<1x8x128xf32>
    tpu.vector_store %arg9[%c1_201, %c0_202, %c0_203], %611 {strides = array<i32>} : memref<2x8x128xf32, #tpu.memory_space<vmem>>, vector<1x8x128xf32>,
    return
  }
  func.func @transform_0(%arg0: i32) -> (i32, i32, i32) {
    %c0_i32 = arith.constant 0 : i32
    %c0_i32_0 = arith.constant 0 : i32
    %c0_i32_1 = arith.constant 0 : i32
    return %c0_i32, %arg0, %c0_i32_0 : i32, i32, i32
  }
  func.func @transform_1(%arg0: i32) -> (i32, i32) {
    %c0_i32 = arith.constant 0 : i32
    %c0_i32_0 = arith.constant 0 : i32
    %c0_i32_1 = arith.constant 0 : i32
    return %c0_i32, %c0_i32_0 : i32, i32
  }
  func.func @transform_2(%arg0: i32) -> (i32, i32) {
    %c0_i32 = arith.constant 0 : i32
    %c0_i32_0 = arith.constant 0 : i32
    %c0_i32_1 = arith.constant 0 : i32
    return %c0_i32, %c0_i32_0 : i32, i32
  }
  func.func @transform_3(%arg0: i32) -> (i32, i32) {
    %c0_i32 = arith.constant 0 : i32
    %c0_i32_0 = arith.constant 0 : i32
    %c0_i32_1 = arith.constant 0 : i32
    return %c0_i32, %c0_i32_0 : i32, i32
  }
  func.func @transform_4(%arg0: i32) -> (i32, i32) {
    %c0_i32 = arith.constant 0 : i32
    %c0_i32_0 = arith.constant 0 : i32
    %c0_i32_1 = arith.constant 0 : i32
    return %c0_i32, %c0_i32_0 : i32, i32
  }
  func.func @transform_5(%arg0: i32) -> (i32, i32, i32) {
    %c0_i32 = arith.constant 0 : i32
    %c0_i32_0 = arith.constant 0 : i32
    %c0_i32_1 = arith.constant 0 : i32
    %c0_i32_2 = arith.constant 0 : i32
    return %c0_i32, %c0_i32_0, %c0_i32_1 : i32, i32, i32
  }
  func.func @transform_6(%arg0: i32) -> (i32, i32, i32) {
    %c0_i32 = arith.constant 0 : i32
    %c0_i32_0 = arith.constant 0 : i32
    %c0_i32_1 = arith.constant 0 : i32
    return %c0_i32, %arg0, %c0_i32_0 : i32, i32, i32
  }
  func.func @transform_7(%arg0: i32) -> (i32, i32, i32) {
    %c0_i32 = arith.constant 0 : i32
    %c0_i32_0 = arith.constant 0 : i32
    %c0_i32_1 = arith.constant 0 : i32
    return %c0_i32, %arg0, %c0_i32_0 : i32, i32, i32
  }
  func.func @transform_8(%arg0: i32) -> (i32, i32, i32) {
    %c0_i32 = arith.constant 0 : i32
    %c0_i32_0 = arith.constant 0 : i32
    %c0_i32_1 = arith.constant 0 : i32
    return %c0_i32, %arg0, %c0_i32_0 : i32, i32, i32
  }
}

</mosaic_0001>

<bundles_post_ra>
// kernel: tpu_custom_call.1
= control target key start
LH: loop header
LB: loop body
LE: loop exit
PB: predicated region body
PF: predicated region fallthrough
CT: control target
= control target key end

     0   :  { %14 = vsyncpa [#allocation4], 0  ;;  %s8628_s0 = inlined_call_operand.hbm [shape: f32[8,8,128], index: 0, kind: input, shape index: {}]   ;;  %s8629_s1 = inlined_call_operand.hbm [shape: bf16[128,512], index: 1, kind: input, shape index: {}]   ;;  %s8630_s2 = inlined_call_operand.hbm [shape: bf16[128,512], index: 2, kind: input, shape index: {}]   ;;  %s8631_s3 = inlined_call_operand.hbm [shape: bf16[128,512], index: 3, kind: input, shape index: {}]   ;;  %s8632_s4 = inlined_call_operand.hbm [shape: bf16[128,512], index: 4, kind: input, shape index: {}]   ;;  %s8633_s5 = inlined_call_operand.vmem [shape: f32[2,1,512], index: 5, kind: input, shape index: {}]   ;;  %s8634_s6 = inlined_call_operand.hbm [shape: f32[8,8,128], index: 6, kind: output, shape index: {0}]   ;;  %s8635_s7 = inlined_call_operand.hbm [shape: f32[2,8,128], index: 7, kind: output, shape index: {1}]   ;;  %s8636_s8 = inlined_call_operand.hbm [shape: f32[2,8,128], index: 8, kind: output, shape index: {2}]  }
   0x1   :  { %15 = vsyncpa [#allocation7], 0 }
   0x2   :  { %16 = vsyncpa [#allocation10], 0 }
   0x3   :  { %17 = vsyncpa [#allocation5], 0 }
   0x4   :  { %18 = vsyncpa [#allocation14], 0  ;;  %s7270_s27 = smov [#allocation6]   ;;  %s7084_s9 = scalar_lea.hbm %s8629_s1, 4096 }
   0x5   :  { %s36_s28 = sshll.u32 %s7270_s27, 4  ;;  %p7085_p0 = scmp.ne.s32.totalorder %s8629_s1, %s7084_s9  ;;  %s37_s28 = int_to_ptr.vmem [resolvable:$true] %s36_s28 }
   0x6   :  { %p7088_p1 = scmp.lt.u32.totalorder %s7084_s9, %s8629_s1 }
   0x8   :  { %p7090_p2 = pnand %p7088_p1, %p7085_p0 }
   0xa   :  { %7093 = shalt.err (!%p7090_p2)
}
   0xb   :  { %s7094_s14 = scalar_lea.vmem %s37_s28, 4096  ;;  %p7099_p4 = scmp.lt.s32.totalorder %s37_s28, %s37_s28 }
   0xc   :  { %p7095_p3 = scmp.ne.s32.totalorder %s37_s28, %s7094_s14  ;;  %p7100_p5 = scmp.lt.s32.totalorder %s7094_s14, %s7094_s14 }
   0xe   :  { %p7101_p6 = por %p7100_p5, %p7099_p4 }
  0x10   :  { %p7102_p7 = pnand %p7101_p6, %p7095_p3 }
  0x12   :  { %7105 = shalt.err (!%p7102_p7)
}
  0x13   :  { %s7271_s15 = smov 256   ;;  %s7272_s16 = smov 16  }
  0x14   :  { %42 = dma.hbm_to_vmem [thread:$0]  %s8629_s1, 4096, %s37_s28, [#allocation7], %s7271_s15, %s7271_s15, %s7272_s16  }
  0x15   :  { %s7273_s19 = smov [#allocation9]   ;;  %s7274_s21 = smov [#allocation3]  }
  0x16   :  { %s60_s20 = sshll.u32 %s7273_s19, 4  ;;  %s24_s22 = sshll.u32 %s7274_s21, 4  ;;  %s61_s20 = int_to_ptr.vmem [resolvable:$true] %s60_s20  ;;  %s25_s22 = int_to_ptr.vmem [resolvable:$true] %s24_s22 }
  0x17   :  { %s7106_s25 = scalar_lea.hbm %s8631_s3, 4096 }
  0x18   :  { %p7107_p8 = scmp.ne.s32.totalorder %s8631_s3, %s7106_s25  ;;  %p7110_p9 = scmp.lt.u32.totalorder %s7106_s25, %s8631_s3 }
  0x1a   :  { %p7112_p10 = pnand %p7110_p9, %p7107_p8 }
  0x1c   :  { %7115 = shalt.err (!%p7112_p10)
}
  0x1d   :  { %s7116_s1 = scalar_lea.vmem %s61_s20, 4096  ;;  %p7121_p12 = scmp.lt.s32.totalorder %s61_s20, %s61_s20 }
  0x1e   :  { %p7117_p11 = scmp.ne.s32.totalorder %s61_s20, %s7116_s1  ;;  %p7122_p13 = scmp.lt.s32.totalorder %s7116_s1, %s7116_s1 }
  0x20   :  { %p7123_p0 = por %p7122_p13, %p7121_p12 }
  0x22   :  { %p7124_p1 = pnand %p7123_p0, %p7117_p11 }
  0x24   :  { %7127 = shalt.err (!%p7124_p1)
}
  0x25   :  { %66 = dma.hbm_to_vmem [thread:$0]  %s8631_s3, 4096, %s61_s20, [#allocation10], %s7271_s15, %s7271_s15, %s7272_s16  }
  0x26   :  { %s7128_s12 = scalar_lea.hbm %s8628_s0, 1024 }
  0x27   :  { %p7129_p2 = scmp.ne.s32.totalorder %s8628_s0, %s7128_s12  ;;  %p7132_p3 = scmp.lt.u32.totalorder %s7128_s12, %s8628_s0 }
  0x29   :  { %p7134_p4 = pnand %p7132_p3, %p7129_p2 }
  0x2b   :  { %7137 = shalt.err (!%p7134_p4)
}
  0x2c   :  { %s7138_s19 = scalar_lea.vmem %s25_s22, 1024  ;;  %p7143_p6 = scmp.lt.s32.totalorder %s25_s22, %s25_s22 }
  0x2d   :  { %p7139_p5 = scmp.ne.s32.totalorder %s25_s22, %s7138_s19  ;;  %p7144_p7 = scmp.lt.s32.totalorder %s7138_s19, %s7138_s19 }
  0x2f   :  { %p7145_p8 = por %p7144_p7, %p7143_p6 }
  0x31   :  { %p7146_p9 = pnand %p7145_p8, %p7139_p5 }
  0x33   :  { %7149 = shalt.err (!%p7146_p9)
}
  0x34   :  { %s7275_s3 = smov 128   ;;  %s7276_s20 = smov 8  }
  0x35   :  { %30 = dma.hbm_to_vmem [thread:$0]  %s8628_s0, 1024, %s25_s22, [#allocation4], %s7275_s3, %s7275_s3, %s7276_s20  }
  0x36   :  { %s7277_s24 = smov [#allocation8]   ;;  %s7278_s26 = smov [#allocation11]  }
  0x37   :  { %s48_s25 = sshll.u32 %s7277_s24, 4  ;;  %s72_s27 = sshll.u32 %s7278_s26, 4  ;;  %s49_s25 = int_to_ptr.vmem [resolvable:$true] %s48_s25  ;;  %s73_s27 = int_to_ptr.vmem [resolvable:$true] %s72_s27 }
  0x38   :  { %s7150_s1 = scalar_lea.hbm %s8630_s2, 4096 }
  0x39   :  { %p7151_p10 = scmp.ne.s32.totalorder %s8630_s2, %s7150_s1  ;;  %p7154_p11 = scmp.lt.u32.totalorder %s7150_s1, %s8630_s2 }
  0x3b   :  { %p7156_p12 = pnand %p7154_p11, %p7151_p10 }
  0x3d   :  { %7159 = shalt.err (!%p7156_p12)
}
  0x3e   :  { %s7160_s0 = scalar_lea.vmem %s49_s25, 4096  ;;  %p7165_p0 = scmp.lt.s32.totalorder %s49_s25, %s49_s25 }
  0x3f   :  { %p7161_p13 = scmp.ne.s32.totalorder %s49_s25, %s7160_s0  ;;  %p7166_p1 = scmp.lt.s32.totalorder %s7160_s0, %s7160_s0 }
  0x41   :  { %p7167_p2 = por %p7166_p1, %p7165_p0 }
  0x43   :  { %p7168_p3 = pnand %p7167_p2, %p7161_p13 }
  0x45   :  { %7171 = shalt.err (!%p7168_p3)
}
  0x46   :  { %54 = dma.hbm_to_vmem [thread:$0]  %s8630_s2, 4096, %s49_s25, [#allocation7], %s7271_s15, %s7271_s15, %s7272_s16  }
  0x47   :  { %s7172_s17 = scalar_lea.hbm %s8632_s4, 4096 }
  0x48   :  { %p7173_p4 = scmp.ne.s32.totalorder %s8632_s4, %s7172_s17  ;;  %p7176_p5 = scmp.lt.u32.totalorder %s7172_s17, %s8632_s4 }
  0x4a   :  { %p7178_p6 = pnand %p7176_p5, %p7173_p4 }
  0x4c   :  { %7181 = shalt.err (!%p7178_p6)
}
  0x4d   :  { %s7182_s24 = scalar_lea.vmem %s73_s27, 4096  ;;  %p7187_p8 = scmp.lt.s32.totalorder %s73_s27, %s73_s27 }
  0x4e   :  { %p7183_p7 = scmp.ne.s32.totalorder %s73_s27, %s7182_s24  ;;  %p7188_p9 = scmp.lt.s32.totalorder %s7182_s24, %s7182_s24 }
  0x50   :  { %p7189_p10 = por %p7188_p9, %p7187_p8 }
  0x52   :  { %p7190_p11 = pnand %p7189_p10, %p7183_p7 }
  0x54   :  { %7193 = shalt.err (!%p7190_p11)
}
  0x55   :  { %78 = dma.hbm_to_vmem [thread:$0]  %s8632_s4, 4096, %s73_s27, [#allocation10], %s7271_s15, %s7271_s15, %s7272_s16  }
  0x56   :  { %7260 = dma.done.wait [#allocation4], 1024  }
  0x57   :  { %7261 = vsyncadd [#allocation4], 4294966272 }
  0x58   :  { %7262 = dma.done.wait [#allocation7], 8192  }
  0x59   :  { %7263 = vsyncadd [#allocation7], 4294959104 }
  0x5a   :  { %7264 = dma.done.wait [#allocation10], 8192  }
  0x5b   :  { %7265 = vsyncadd [#allocation10], 4294959104  ;;  %v8641_v0 = vmov 0   ;;  %v6540_v1 = vld [vmem:[#allocation6 + $0x4] ss:$16 sps:$4 sm:$0xff]   ;;  %v98_v34 = vld [vmem:[#allocation3 + $0x8] sm:$0xff] }
  0x5c   :  { %355 = vmatprep.mubr.bf16.mxu0 %v8641_v0  ;;  %428 = vmatprep.mubr.bf16.mxu1 %v8641_v0  ;;  %v6542_v2 = vld [vmem:[#allocation6 + $0xc] ss:$16 sps:$4 sm:$0xff]   ;;  %v6544_v3 = vld [vmem:[#allocation6] ss:$16 sps:$4 sm:$0xff]   ;;  %v6545_v4 = vld [vmem:[#allocation6 + $0x8] ss:$16 sps:$4 sm:$0xff]  }
  0x5d   :  { %323 = vmatprep.subr.bf16.mxu0 %v6540_v1  ;;  %396 = vmatprep.subr.bf16.mxu1 %v6542_v2  ;;  %v6546_v5 = vld [vmem:[#allocation6 + $0x24] ss:$16 sps:$4 sm:$0xff]   ;;  %v6548_v6 = vld [vmem:[#allocation6 + $0x2c] ss:$16 sps:$4 sm:$0xff]   ;;  %v6550_v7 = vld [vmem:[#allocation6 + $0x20] ss:$16 sps:$4 sm:$0xff]  }
  0x5e   :  { %324 = vmatpush1.bf16.msra.mxu0 %v6544_v3  ;;  %397 = vmatpush1.bf16.msra.mxu1 %v6545_v4  ;;  %v6551_v8 = vld [vmem:[#allocation6 + $0x28] ss:$16 sps:$4 sm:$0xff]   ;;  %v6552_v9 = vld [vmem:[#allocation6 + $0x44] ss:$16 sps:$4 sm:$0xff]   ;;  %v6554_v10 = vld [vmem:[#allocation6 + $0x4c] ss:$16 sps:$4 sm:$0xff]  }
  0x5f   :  { %325 = vmatprep.subr.bf16.mxu0 %v6546_v5  ;;  %398 = vmatprep.subr.bf16.mxu1 %v6548_v6  ;;  %v6556_v11 = vld [vmem:[#allocation6 + $0x40] ss:$16 sps:$4 sm:$0xff]   ;;  %v6557_v12 = vld [vmem:[#allocation6 + $0x48] ss:$16 sps:$4 sm:$0xff]   ;;  %v6558_v13 = vld [vmem:[#allocation6 + $0x64] ss:$16 sps:$4 sm:$0xff]  }
  0x60   :  { %v6560_v14 = vld [vmem:[#allocation6 + $0x6c] ss:$16 sps:$4 sm:$0xff]   ;;  %v6562_v15 = vld [vmem:[#allocation6 + $0x60] ss:$16 sps:$4 sm:$0xff]   ;;  %v6563_v16 = vld [vmem:[#allocation6 + $0x68] ss:$16 sps:$4 sm:$0xff]  }
  0x61   :  { %v6564_v17 = vld [vmem:[#allocation6 + $0x84] ss:$16 sps:$4 sm:$0xff]   ;;  %v6566_v18 = vld [vmem:[#allocation6 + $0x8c] ss:$16 sps:$4 sm:$0xff]   ;;  %v6568_v19 = vld [vmem:[#allocation6 + $0x80] ss:$16 sps:$4 sm:$0xff]  }
  0x62   :  { %326 = vmatpush1.bf16.msra.mxu0 %v6550_v7  ;;  %399 = vmatpush1.bf16.msra.mxu1 %v6551_v8  ;;  %v6569_v20 = vld [vmem:[#allocation6 + $0x88] ss:$16 sps:$4 sm:$0xff]   ;;  %v6570_v21 = vld [vmem:[#allocation6 + $0xa4] ss:$16 sps:$4 sm:$0xff]   ;;  %v6572_v22 = vld [vmem:[#allocation6 + $0xac] ss:$16 sps:$4 sm:$0xff]  }
  0x63   :  { %327 = vmatprep.subr.bf16.mxu0 %v6552_v9  ;;  %400 = vmatprep.subr.bf16.mxu1 %v6554_v10  ;;  %v6574_v23 = vld [vmem:[#allocation6 + $0xa0] ss:$16 sps:$4 sm:$0xff]   ;;  %v6575_v24 = vld [vmem:[#allocation6 + $0xa8] ss:$16 sps:$4 sm:$0xff]   ;;  %v6576_v25 = vld [vmem:[#allocation6 + $0xc4] ss:$16 sps:$4 sm:$0xff]  }
  0x64   :  { %v6578_v26 = vld [vmem:[#allocation6 + $0xcc] ss:$16 sps:$4 sm:$0xff]   ;;  %v6580_v27 = vld [vmem:[#allocation6 + $0xc0] ss:$16 sps:$4 sm:$0xff]   ;;  %v6581_v28 = vld [vmem:[#allocation6 + $0xc8] ss:$16 sps:$4 sm:$0xff]  }
  0x65   :  { %v6582_v29 = vld [vmem:[#allocation6 + $0xe4] ss:$16 sps:$4 sm:$0xff]   ;;  %v6584_v30 = vld [vmem:[#allocation6 + $0xec] ss:$16 sps:$4 sm:$0xff]   ;;  %v6586_v31 = vld [vmem:[#allocation6 + $0xe0] ss:$16 sps:$4 sm:$0xff]  }
  0x66   :  { %328 = vmatpush1.bf16.msra.mxu0 %v6556_v11  ;;  %401 = vmatpush1.bf16.msra.mxu1 %v6557_v12  ;;  %v6587_v32 = vld [vmem:[#allocation6 + $0xe8] ss:$16 sps:$4 sm:$0xff]   ;;  %v97_v33 = vld [vmem:[#allocation3] sm:$0xff]  ;;  %v7407_v36 = vld [vmem:[#allocation9 + $0xc] ss:$16 sps:$4 sm:$0xff]   ;;  %s7281_s29 = smov [#allocation12]  }
  0x67   :  { %329 = vmatprep.subr.bf16.mxu0 %v6558_v13  ;;  %402 = vmatprep.subr.bf16.mxu1 %v6560_v14  ;;  %v7405_v35 = vld [vmem:[#allocation9 + $0x4] ss:$16 sps:$4 sm:$0xff]   ;;  %v105_v37 = vpack.c.bf16 %v98_v34, %v97_v33  ;;  %v7409_v38 = vld [vmem:[#allocation9] ss:$16 sps:$4 sm:$0xff]   ;;  %v7411_v39 = vld [vmem:[#allocation9 + $0x8] ss:$16 sps:$4 sm:$0xff]   ;;  %v143_v14 = vlaneseq }
  0x68   :  { %v7415_v40 = vld [vmem:[#allocation9 + $0x24] ss:$16 sps:$4 sm:$0xff]   ;;  %v7417_v41 = vld [vmem:[#allocation9 + $0x2c] ss:$16 sps:$4 sm:$0xff]   ;;  %v7419_v42 = vld [vmem:[#allocation9 + $0x20] ss:$16 sps:$4 sm:$0xff]  }
  0x69   :  { %v7421_v43 = vld [vmem:[#allocation9 + $0x28] ss:$16 sps:$4 sm:$0xff]   ;;  %v99_v44 = vld [vmem:[#allocation3 + $0x10] sm:$0xff]  ;;  %v7429_v47 = vld [vmem:[#allocation9 + $0x4c] ss:$16 sps:$4 sm:$0xff]   ;;  %s5857_s30 = sshll.u32 %s7281_s29, 4  ;;  %s8569_s30 = int_to_ptr.vmem [resolvable:$true] %s5857_s30 }
  0x6a   :  { %330 = vmatpush1.bf16.msra.mxu0 %v6562_v15  ;;  %403 = vmatpush1.bf16.msra.mxu1 %v6563_v16  ;;  %v100_v45 = vld [vmem:[#allocation3 + $0x18] sm:$0xff]  ;;  %v7427_v46 = vld [vmem:[#allocation9 + $0x44] ss:$16 sps:$4 sm:$0xff]   ;;  %v7433_v49 = vld [vmem:[#allocation9 + $0x40] ss:$16 sps:$4 sm:$0xff]   ;;  %v7547_v15 = vshrl.u32 %v143_v14, 7 }
  0x6b   :  { %331 = vmatprep.subr.bf16.mxu0 %v6564_v17  ;;  %404 = vmatprep.subr.bf16.mxu1 %v6566_v18  ;;  %v106_v48 = vpack.c.bf16 %v100_v45, %v99_v44  ;;  %v7435_v50 = vld [vmem:[#allocation9 + $0x48] ss:$16 sps:$4 sm:$0xff]   ;;  %v7439_v51 = vld [vmem:[#allocation9 + $0x64] ss:$16 sps:$4 sm:$0xff]   ;;  %v7443_v52 = vld [vmem:[#allocation9 + $0x6c] ss:$16 sps:$4 sm:$0xff]  }
  0x6c   :  { %v7445_v53 = vld [vmem:[#allocation9 + $0x60] ss:$16 sps:$4 sm:$0xff]   ;;  %v7447_v54 = vld [vmem:[#allocation9 + $0x68] ss:$16 sps:$4 sm:$0xff]   ;;  %v7453_v57 = vld [vmem:[#allocation9 + $0x84] ss:$16 sps:$4 sm:$0xff]  }
  0x6d   :  { %v101_v55 = vld [vmem:[#allocation3 + $0x20] sm:$0xff]  ;;  %v102_v56 = vld [vmem:[#allocation3 + $0x28] sm:$0xff]  ;;  %v103_v3 = vld [vmem:[#allocation3 + $0x30] sm:$0xff]  ;;  %8645 = vst [vmem:[#allocation21_spill] sm:$0xff] %v7547_v15  ;;  %v8639_v16 = vsub.s32 2, %v7547_v15  ;;  %v8637_v17 = vsub.s32 3, %v7547_v15 }
  0x6e   :  { %332 = vmatpush1.bf16.msra.mxu0 %v6568_v19  ;;  %405 = vmatpush1.bf16.msra.mxu1 %v6569_v20  ;;  %v7455_v58 = vld [vmem:[#allocation9 + $0x8c] ss:$16 sps:$4 sm:$0xff]   ;;  %v7459_v59 = vld [vmem:[#allocation9 + $0x80] ss:$16 sps:$4 sm:$0xff]   ;;  %v7461_v60 = vld [vmem:[#allocation9 + $0x88] ss:$16 sps:$4 sm:$0xff]   ;;  %v107_v61 = vpack.c.bf16 %v102_v56, %v101_v55 }
  0x6f   :  { %333 = vmatprep.subr.bf16.mxu0 %v6570_v21  ;;  %406 = vmatprep.subr.bf16.mxu1 %v6572_v22  ;;  %v7463_v62 = vld [vmem:[#allocation9 + $0xa4] ss:$16 sps:$4 sm:$0xff]   ;;  %v7465_v63 = vld [vmem:[#allocation9 + $0xac] ss:$16 sps:$4 sm:$0xff]   ;;  %v7471_v1 = vld [vmem:[#allocation9 + $0xa0] ss:$16 sps:$4 sm:$0xff]  }
  0x70   :  { %v7473_v2 = vld [vmem:[#allocation9 + $0xa8] ss:$16 sps:$4 sm:$0xff]   ;;  %v7475_v5 = vld [vmem:[#allocation9 + $0xc4] ss:$16 sps:$4 sm:$0xff]   ;;  %v7477_v6 = vld [vmem:[#allocation9 + $0xcc] ss:$16 sps:$4 sm:$0xff]  }
  0x71   :  { %v104_v4 = vld [vmem:[#allocation3 + $0x38] sm:$0xff]  ;;  %v7485_v7 = vld [vmem:[#allocation9 + $0xc0] ss:$16 sps:$4 sm:$0xff]   ;;  %v7489_v10 = vld [vmem:[#allocation9 + $0xe4] ss:$16 sps:$4 sm:$0xff]   ;;  %v8640_v18 = vsub.s32 0, %v7547_v15 }
  0x72   :  { %334 = vmatpush1.bf16.msra.mxu0 %v6574_v23  ;;  %407 = vmatpush1.bf16.msra.mxu1 %v6575_v24  ;;  %v7487_v8 = vld [vmem:[#allocation9 + $0xc8] ss:$16 sps:$4 sm:$0xff]   ;;  %v108_v9 = vpack.c.bf16 %v104_v4, %v103_v3  ;;  %v7491_v11 = vld [vmem:[#allocation9 + $0xec] ss:$16 sps:$4 sm:$0xff]   ;;  %v7497_v12 = vld [vmem:[#allocation9 + $0xe0] ss:$16 sps:$4 sm:$0xff]  }
  0x73   :  { %335 = vmatprep.subr.bf16.mxu0 %v6576_v25  ;;  %408 = vmatprep.subr.bf16.mxu1 %v6578_v26  ;;  %v7499_v13 = vld [vmem:[#allocation9 + $0xe8] ss:$16 sps:$4 sm:$0xff]   ;;  %v141_v19 = vld [vmem:[%s8633_s5] sm:$0xf]  ;;  %v8638_v20 = vsub.s32 1, %v7547_v15  ;;  %s7282_s1 = smov [#allocation15]  }
  0x74   :  { %v7558_v21 = vrot.slane %v141_v19, %v8639_v16  ;;  %v7566_v24 = vrot.slane %v141_v19, %v8637_v17  ;;  %v146_v25 = vrot.slane %v141_v19, %v8640_v18  ;;  %s5881_s28 = sshll.u32 %s7282_s1, 4  ;;  %s8571_s28 = int_to_ptr.vmem [resolvable:$true] %s5881_s28 }
  0x76   :  { %336 = vmatpush1.bf16.msra.mxu0 %v6580_v27  ;;  %409 = vmatpush1.bf16.msra.mxu1 %v6581_v28  ;;  %v150_v28 = vrot.slane %v141_v19, %v8638_v20 }
  0x77   :  { %337 = vmatprep.subr.bf16.mxu0 %v6582_v29  ;;  %410 = vmatprep.subr.bf16.mxu1 %v6584_v30 }
  0x7a   :  { %338 = vmatpush1.bf16.msra.mxu0 %v6586_v31  ;;  %411 = vmatpush1.bf16.msra.mxu1 %v6587_v32 }
  0x7b   :  { %697 = vmatprep.subr.bf16.mxu0 %v7405_v35  ;;  %738 = vmatprep.subr.bf16.mxu1 %v7407_v36 }
  0x7d   :  { %356 = vmatmul.mubr.bf16.vlgmr.msra.gmra.mrb[0].mxu0 %v105_v37  ;;  %429 = vmatmul.mubr.bf16.vlgmr.msra.gmra.mrb[0].mxu1 %v105_v37 }
  0x7e   :  { %698 = vmatpush1.bf16.msra.mxu0 %v7409_v38  ;;  %739 = vmatpush1.bf16.msra.mxu1 %v7411_v39 }
  0x7f   :  { %699 = vmatprep.subr.bf16.mxu0 %v7415_v40  ;;  %740 = vmatprep.subr.bf16.mxu1 %v7417_v41 }
  0x80   :  { %365 = vmatprep.mubr.bf16.mxu0 %v8641_v0  ;;  %438 = vmatprep.mubr.bf16.mxu1 %v8641_v0 }
  0x82   :  { %700 = vmatpush1.bf16.msra.mxu0 %v7419_v42  ;;  %741 = vmatpush1.bf16.msra.mxu1 %v7421_v43 }
  0x83   :  { %701 = vmatprep.subr.bf16.mxu0 %v7427_v46  ;;  %742 = vmatprep.subr.bf16.mxu1 %v7429_v47 }
  0x85   :  { %366 = vmatmul.mubr.bf16.gmra.mrb[4].mxu0 %v106_v48  ;;  %439 = vmatmul.mubr.bf16.gmra.mrb[4].mxu1 %v106_v48 }
  0x86   :  { %702 = vmatpush1.bf16.msra.mxu0 %v7433_v49  ;;  %743 = vmatpush1.bf16.msra.mxu1 %v7435_v50 }
  0x87   :  { %703 = vmatprep.subr.bf16.mxu0 %v7439_v51  ;;  %744 = vmatprep.subr.bf16.mxu1 %v7443_v52 }
  0x88   :  { %375 = vmatprep.mubr.bf16.mxu0 %v8641_v0  ;;  %448 = vmatprep.mubr.bf16.mxu1 %v8641_v0 }
  0x8a   :  { %704 = vmatpush1.bf16.msra.mxu0 %v7445_v53  ;;  %745 = vmatpush1.bf16.msra.mxu1 %v7447_v54 }
  0x8b   :  { %705 = vmatprep.subr.bf16.mxu0 %v7453_v57  ;;  %746 = vmatprep.subr.bf16.mxu1 %v7455_v58 }
  0x8d   :  { %376 = vmatmul.mubr.bf16.gmra.mrb[8].mxu0 %v107_v61  ;;  %449 = vmatmul.mubr.bf16.gmra.mrb[8].mxu1 %v107_v61 }
  0x8e   :  { %706 = vmatpush1.bf16.msra.mxu0 %v7459_v59  ;;  %747 = vmatpush1.bf16.msra.mxu1 %v7461_v60 }
  0x8f   :  { %707 = vmatprep.subr.bf16.mxu0 %v7463_v62  ;;  %748 = vmatprep.subr.bf16.mxu1 %v7465_v63 }
  0x90   :  { %385 = vmatprep.mubr.bf16.mxu0 %v8641_v0  ;;  %458 = vmatprep.mubr.bf16.mxu1 %v8641_v0 }
  0x92   :  { %708 = vmatpush1.bf16.msra.mxu0 %v7471_v1  ;;  %749 = vmatpush1.bf16.msra.mxu1 %v7473_v2 }
  0x93   :  { %709 = vmatprep.subr.bf16.mxu0 %v7475_v5  ;;  %750 = vmatprep.subr.bf16.mxu1 %v7477_v6 }
  0x95   :  { %386 = vmatmul.mubr.bf16.gmra.mrb[12].mxu0 %v108_v9  ;;  %459 = vmatmul.mubr.bf16.gmra.mrb[12].mxu1 %v108_v9 }
  0x96   :  { %710 = vmatpush1.bf16.msra.mxu0 %v7485_v7  ;;  %751 = vmatpush1.bf16.msra.mxu1 %v7487_v8 }
  0x97   :  { %711 = vmatprep.subr.bf16.mxu0 %v7489_v10  ;;  %752 = vmatprep.subr.bf16.mxu1 %v7491_v11 }
  0x98   :  { %729 = vmatprep.mubr.bf16.mxu0 %v8641_v0  ;;  %770 = vmatprep.mubr.bf16.mxu1 %v8641_v0 }
  0x9a   :  { %712 = vmatpush1.bf16.msra.mxu0 %v7497_v12  ;;  %753 = vmatpush1.bf16.msra.mxu1 %v7499_v13 }
  0x9b   :  { %1006 = vmatprep.subr.bf16.mxu0 %v7405_v35  ;;  %1047 = vmatprep.subr.bf16.mxu1 %v7407_v36 }
  0x9d   :  { %730 = vmatmul.mubr.bf16.vlgmr.msra.gmra.mrb[16].mxu0 %v8641_v0  ;;  %771 = vmatmul.mubr.bf16.vlgmr.msra.gmra.mrb[16].mxu1 %v8641_v0 }
  0x9e   :  { %1007 = vmatpush1.bf16.msra.mxu0 %v7409_v38  ;;  %1048 = vmatpush1.bf16.msra.mxu1 %v7411_v39 }
  0x9f   :  { %1008 = vmatprep.subr.bf16.mxu0 %v7415_v40  ;;  %1049 = vmatprep.subr.bf16.mxu1 %v7417_v41 }
  0xa0   :  { %1038 = vmatprep.mubr.bf16.mxu0 %v8641_v0  ;;  %1079 = vmatprep.mubr.bf16.mxu1 %v8641_v0 }
  0xa2   :  { %1009 = vmatpush1.bf16.msra.mxu0 %v7419_v42  ;;  %1050 = vmatpush1.bf16.msra.mxu1 %v7421_v43 }
  0xa3   :  { %1010 = vmatprep.subr.bf16.mxu0 %v7427_v46  ;;  %1051 = vmatprep.subr.bf16.mxu1 %v7429_v47 }
  0xa6   :  { %1011 = vmatpush1.bf16.msra.mxu0 %v7433_v49  ;;  %1052 = vmatpush1.bf16.msra.mxu1 %v7435_v50 }
  0xa7   :  { %1012 = vmatprep.subr.bf16.mxu0 %v7439_v51  ;;  %1053 = vmatprep.subr.bf16.mxu1 %v7443_v52 }
  0xaa   :  { %1013 = vmatpush1.bf16.msra.mxu0 %v7445_v53  ;;  %1054 = vmatpush1.bf16.msra.mxu1 %v7447_v54 }
  0xab   :  { %1014 = vmatprep.subr.bf16.mxu0 %v7453_v57  ;;  %1055 = vmatprep.subr.bf16.mxu1 %v7455_v58 }
  0xae   :  { %1015 = vmatpush1.bf16.msra.mxu0 %v7459_v59  ;;  %1056 = vmatpush1.bf16.msra.mxu1 %v7461_v60 }
  0xaf   :  { %1016 = vmatprep.subr.bf16.mxu0 %v7463_v62  ;;  %1057 = vmatprep.subr.bf16.mxu1 %v7465_v63 }
  0xb2   :  { %1017 = vmatpush1.bf16.msra.mxu0 %v7471_v1  ;;  %1058 = vmatpush1.bf16.msra.mxu1 %v7473_v2 }
  0xb3   :  { %1018 = vmatprep.subr.bf16.mxu0 %v7475_v5  ;;  %1059 = vmatprep.subr.bf16.mxu1 %v7477_v6 }
  0xb6   :  { %1019 = vmatpush1.bf16.msra.mxu0 %v7485_v7  ;;  %1060 = vmatpush1.bf16.msra.mxu1 %v7487_v8 }
  0xb7   :  { %1020 = vmatprep.subr.bf16.mxu0 %v7489_v10  ;;  %1061 = vmatprep.subr.bf16.mxu1 %v7491_v11 }
  0xba   :  { %1021 = vmatpush1.bf16.msra.mxu0 %v7497_v12  ;;  %1062 = vmatpush1.bf16.msra.mxu1 %v7499_v13 }
  0xbb   :  { %1316 = vmatprep.subr.bf16.mxu0 %v7405_v35  ;;  %1357 = vmatprep.subr.bf16.mxu1 %v7407_v36 }
 0x150   :  { %v7560_v22 = vpop.f32.mrb[0].mxu0  ;;  %v7562_v23 = vpop.f32.mrb[0].mxu1 }
 0x151   :  { %v359_v26 = vpop.f32.mrb[1].mxu0  ;;  %v432_v27 = vpop.f32.mrb[1].mxu1 }
 0x152   :  { %v361_v29 = vpop.f32.mrb[2].mxu0  ;;  %v434_v30 = vpop.f32.mrb[2].mxu1 }
 0x153   :  { %v7572_v31 = vadd.f32 %v361_v29, %v146_v25  ;;  %v363_v32 = vpop.f32.mrb[3].mxu0  ;;  %v7575_v33 = vadd.f32 %v434_v30, %v7558_v21  ;;  %v436_v34 = vpop.f32.mrb[3].mxu1 }
 0x154   :  { %v7577_v37 = vadd.f32 %v363_v32, %v150_v28  ;;  %v7580_v44 = vadd.f32 %v436_v34, %v7566_v24 }
 0x158   :  { %v367_v45 = vpop.f32.mrb[4].mxu0  ;;  %v440_v48 = vpop.f32.mrb[4].mxu1 }
 0x159   :  { %v7582_v55 = vadd.f32 %v367_v45, %v146_v25  ;;  %v369_v56 = vpop.f32.mrb[5].mxu0  ;;  %v7585_v61 = vadd.f32 %v440_v48, %v7558_v21  ;;  %v442_v3 = vpop.f32.mrb[5].mxu1 }
 0x15a   :  { %v7587_v4 = vadd.f32 %v369_v56, %v150_v28  ;;  %v371_v9 = vpop.f32.mrb[6].mxu0  ;;  %v7590_v14 = vadd.f32 %v442_v3, %v7566_v24  ;;  %v444_v19 = vpop.f32.mrb[6].mxu1 }
 0x15b   :  { %v7592_v29 = vadd.f32 %v371_v9, %v146_v25  ;;  %v373_v30 = vpop.f32.mrb[7].mxu0  ;;  %v7595_v32 = vadd.f32 %v444_v19, %v7558_v21  ;;  %v446_v34 = vpop.f32.mrb[7].mxu1 }
 0x15c   :  { %8646 = vst [vmem:[#allocation22_spill] sm:$0xff] %v7590_v14  ;;  %v7597_v45 = vadd.f32 %v373_v30, %v150_v28  ;;  %v7600_v48 = vadd.f32 %v446_v34, %v7566_v24 }
 0x15d   :  { %8647 = vst [vmem:[#allocation23_spill] sm:$0xff] %v7592_v29  ;;  %8648 = vst [vmem:[#allocation24_spill] sm:$0xff] %v7595_v32 }
 0x15e   :  { %8649 = vst [vmem:[#allocation25_spill] sm:$0xff] %v7597_v45  ;;  %8650 = vst [vmem:[#allocation26_spill] sm:$0xff] %v7600_v48 }
 0x160   :  { %v377_v17 = vpop.f32.mrb[8].mxu0  ;;  %v450_v56 = vpop.f32.mrb[8].mxu1 }
 0x161   :  { %v7602_v20 = vadd.f32 %v377_v17, %v146_v25  ;;  %v379_v16 = vpop.f32.mrb[9].mxu0  ;;  %v7605_v3 = vadd.f32 %v450_v56, %v7558_v21  ;;  %v452_v9 = vpop.f32.mrb[9].mxu1 }
 0x162   :  { %v7607_v18 = vadd.f32 %v379_v16, %v150_v28  ;;  %v381_v0 = vpop.f32.mrb[10].mxu0  ;;  %v7610_v19 = vadd.f32 %v452_v9, %v7566_v24  ;;  %v454_v30 = vpop.f32.mrb[10].mxu1 }
 0x163   :  { %8651 = vst [vmem:[#allocation27_spill] sm:$0xff] %v7602_v20  ;;  %8652 = vst [vmem:[#allocation28_spill] sm:$0xff] %v7605_v3  ;;  %v7612_v15 = vadd.f32 %v381_v0, %v146_v25  ;;  %v383_v34 = vpop.f32.mrb[11].mxu0  ;;  %v7615_v48 = vadd.f32 %v454_v30, %v7558_v21  ;;  %v456_v17 = vpop.f32.mrb[11].mxu1 }
 0x164   :  { %8653 = vst [vmem:[#allocation29_spill] sm:$0xff] %v7607_v18  ;;  %8654 = vst [vmem:[#allocation30_spill] sm:$0xff] %v7610_v19  ;;  %v7617_v20 = vadd.f32 %v383_v34, %v150_v28  ;;  %v7620_v56 = vadd.f32 %v456_v17, %v7566_v24 }
 0x165   :  { %8655 = vst [vmem:[#allocation31_spill] sm:$0xff] %v7612_v15  ;;  %8656 = vst [vmem:[#allocation32_spill] sm:$0xff] %v7615_v48 }
 0x166   :  { %8657 = vst [vmem:[#allocation33_spill] sm:$0xff] %v7617_v20  ;;  %8658 = vst [vmem:[#allocation34_spill] sm:$0xff] %v7620_v56 }
 0x168   :  { %v387_v3 = vpop.f32.mrb[12].mxu0  ;;  %v460_v16 = vpop.f32.mrb[12].mxu1 }
 0x169   :  { %v7622_v18 = vadd.f32 %v387_v3, %v146_v25  ;;  %v389_v45 = vpop.f32.mrb[13].mxu0  ;;  %v7625_v9 = vadd.f32 %v460_v16, %v7558_v21  ;;  %v462_v0 = vpop.f32.mrb[13].mxu1 }
 0x16a   :  { %v7627_v15 = vadd.f32 %v389_v45, %v150_v28  ;;  %v391_v19 = vpop.f32.mrb[14].mxu0  ;;  %v7630_v30 = vadd.f32 %v462_v0, %v7566_v24  ;;  %v464_v34 = vpop.f32.mrb[14].mxu1  ;;  %v358_v45 = vadd.f32 %v7560_v22, %v146_v25  ;;  %v360_v0 = vadd.f32 %v359_v26, %v150_v28 }
 0x16b   :  { %8659 = vst [vmem:[#allocation35_spill] sm:$0xff] %v7622_v18  ;;  %8660 = vst [vmem:[#allocation36_spill] sm:$0xff] %v7625_v9  ;;  %v7632_v20 = vadd.f32 %v391_v19, %v146_v25  ;;  %v393_v17 = vpop.f32.mrb[15].mxu0  ;;  %v7635_v56 = vadd.f32 %v464_v34, %v7558_v21  ;;  %v466_v3 = vpop.f32.mrb[15].mxu1 }
 0x16c   :  { %8661 = vst [vmem:[#allocation37_spill] sm:$0xff] %v7627_v15  ;;  %8662 = vst [vmem:[#allocation38_spill] sm:$0xff] %v7630_v30  ;;  %v7637_v18 = vadd.f32 %v393_v17, %v150_v28  ;;  %v7640_v16 = vadd.f32 %v466_v3, %v7566_v24  ;;  %v431_v15 = vadd.f32 %v7562_v23, %v7558_v21 }
 0x16d   :  { %8663 = vst [vmem:[#allocation39_spill] sm:$0xff] %v7632_v20  ;;  %8664 = vst [vmem:[#allocation40_spill] sm:$0xff] %v7635_v56  ;;  %v433_v30 = vadd.f32 %v432_v27, %v7566_v24 }
 0x16e   :  { %8665 = vst [vmem:[#allocation41_spill] sm:$0xff] %v7637_v18  ;;  %8666 = vst [vmem:[#allocation42_spill] sm:$0xff] %v7640_v16 }
 0x170   :  { %v731_v19 = vpop.f32.mrb[16].mxu0  ;;  %v772_v20 = vpop.f32.mrb[16].mxu1 }
 0x171   :  { %v779_v9 = vadd.f32 %v731_v19, %v358_v45  ;;  %v781_v48 = vadd.f32 %v772_v20, %v431_v15  ;;  %v733_v34 = vpop.f32.mrb[17].mxu0  ;;  %v774_v56 = vpop.f32.mrb[17].mxu1 }
 0x172   :  { %v780_v32 = vadd.f32 %v733_v34, %v360_v0  ;;  %v782_v17 = vadd.f32 %v774_v56, %v433_v30  ;;  %v735_v18 = vpop.f32.mrb[18].mxu0  ;;  %v776_v29 = vpop.f32.mrb[18].mxu1 }
 0x173   :  { %v5966_v3 = vmul.f32 -1.442695, %v779_v9  ;;  %v736_v16 = vpop.f32.mrb[19].mxu0  ;;  %v777_v14 = vpop.f32.mrb[19].mxu1 }
 0x174   :  { %v5967_v22 = vmul.f32 -1.442695, %v780_v32  ;;  %v5968_v21 = vmul.f32 -1.442695, %v782_v17  ;;  %v8667_v16 = vmov 0  }
 0x175   :  { %6828 = vpow2.f32 %v5966_v3 }
 0x176   :  { %6830 = vpow2.f32 %v5967_v22 }
 0x177   :  { %6832 = vpow2.f32 %v5968_v21 }
 0x178   :  { %6834 = vtanh.f32 %v781_v48 }
 0x17f   :  { %v6829_v23 = vpop.eup %6828 }
 0x180   :  { %v6831_v25 = vpop.eup %6830  ;;  %v786_v24 = vadd.f32 1.0, %v6829_v23 }
 0x181   :  { %v792_v26 = vadd.f32 1.0, %v6831_v25  ;;  %v6833_v15 = vpop.eup %6832 }
 0x182   :  { %6836 = vrcp.f32 %v786_v24  ;;  %v6835_v20 = vpop.eup %6834  ;;  %v799_v29 = vadd.f32 1.0, %v6833_v15 }
 0x183   :  { %6838 = vrcp.f32 %v792_v26 }
 0x184   :  { %6840 = vrcp.f32 %v799_v29 }
 0x18c   :  { %v6837_v27 = vpop.eup %6836 }
 0x18d   :  { %v6839_v18 = vpop.eup %6838  ;;  %v803_v28 = vmul.f32 %v6837_v27, %v6835_v20 }
 0x18e   :  { %v802_v56 = vmul.f32 0.0, %v6839_v18  ;;  %v6841_v32 = vpop.eup %6840 }
 0x190   :  { %v7646_v14 = vadd.f32 %v803_v28, %v802_v56 }
 0x192   :  { %6842 = vtanh.f32 %v7646_v14 }
 0x19c   :  { %v6843_v9 = vpop.eup %6842 }
 0x19d   :  { %v806_v30 = vmul.f32 %v6843_v9, %v6841_v32 }
 0x19f   :  { %807 = vst [vmem:[#allocation12] sm:$0xff] %v806_v30  ;;  %v813_v48 = vpack.c.bf16 %v806_v30, %v806_v30 }
 0x1a1   :  { %1039 = vmatmul.mubr.bf16.vlgmr.msra.gmra.mrb[20].mxu0 %v813_v48  ;;  %1080 = vmatmul.mubr.bf16.vlgmr.msra.gmra.mrb[20].mxu1 %v813_v48 }
 0x1a2   :  { %1317 = vmatpush1.bf16.msra.mxu0 %v7409_v38  ;;  %1358 = vmatpush1.bf16.msra.mxu1 %v7411_v39 }
 0x1a3   :  { %1318 = vmatprep.subr.bf16.mxu0 %v7415_v40  ;;  %1359 = vmatprep.subr.bf16.mxu1 %v7417_v41 }
 0x1a4   :  { %1348 = vmatprep.mubr.bf16.mxu0 %v8667_v16  ;;  %1389 = vmatprep.mubr.bf16.mxu1 %v8667_v16 }
 0x1a6   :  { %1319 = vmatpush1.bf16.msra.mxu0 %v7419_v42  ;;  %1360 = vmatpush1.bf16.msra.mxu1 %v7421_v43 }
 0x1a7   :  { %1320 = vmatprep.subr.bf16.mxu0 %v7427_v46  ;;  %1361 = vmatprep.subr.bf16.mxu1 %v7429_v47 }
 0x1aa   :  { %1321 = vmatpush1.bf16.msra.mxu0 %v7433_v49  ;;  %1362 = vmatpush1.bf16.msra.mxu1 %v7435_v50 }
 0x1ab   :  { %1322 = vmatprep.subr.bf16.mxu0 %v7439_v51  ;;  %1363 = vmatprep.subr.bf16.mxu1 %v7443_v52 }
 0x1ae   :  { %1323 = vmatpush1.bf16.msra.mxu0 %v7445_v53  ;;  %1364 = vmatpush1.bf16.msra.mxu1 %v7447_v54 }
 0x1af   :  { %1324 = vmatprep.subr.bf16.mxu0 %v7453_v57  ;;  %1365 = vmatprep.subr.bf16.mxu1 %v7455_v58 }
 0x1b2   :  { %1325 = vmatpush1.bf16.msra.mxu0 %v7459_v59  ;;  %1366 = vmatpush1.bf16.msra.mxu1 %v7461_v60 }
 0x1b3   :  { %1326 = vmatprep.subr.bf16.mxu0 %v7463_v62  ;;  %1367 = vmatprep.subr.bf16.mxu1 %v7465_v63 }
 0x1b6   :  { %1327 = vmatpush1.bf16.msra.mxu0 %v7471_v1  ;;  %1368 = vmatpush1.bf16.msra.mxu1 %v7473_v2 }
 0x1b7   :  { %1328 = vmatprep.subr.bf16.mxu0 %v7475_v5  ;;  %1369 = vmatprep.subr.bf16.mxu1 %v7477_v6 }
 0x1ba   :  { %1329 = vmatpush1.bf16.msra.mxu0 %v7485_v7  ;;  %1370 = vmatpush1.bf16.msra.mxu1 %v7487_v8 }
 0x1bb   :  { %1330 = vmatprep.subr.bf16.mxu0 %v7489_v10  ;;  %1371 = vmatprep.subr.bf16.mxu1 %v7491_v11 }
 0x1be   :  { %1331 = vmatpush1.bf16.msra.mxu0 %v7497_v12  ;;  %1372 = vmatpush1.bf16.msra.mxu1 %v7499_v13 }
 0x1bf   :  { %1626 = vmatprep.subr.bf16.mxu0 %v7405_v35  ;;  %1667 = vmatprep.subr.bf16.mxu1 %v7407_v36 }
 0x274   :  { %v1040_v45 = vpop.f32.mrb[20].mxu0  ;;  %v1081_v0 = vpop.f32.mrb[20].mxu1 }
 0x275   :  { %v1088_v19 = vadd.f32 %v1040_v45, %v7572_v31  ;;  %v1090_v34 = vadd.f32 %v1081_v0, %v7575_v33  ;;  %v1042_v17 = vpop.f32.mrb[21].mxu0  ;;  %v1083_v3 = vpop.f32.mrb[21].mxu1 }
 0x276   :  { %v1089_v22 = vadd.f32 %v1042_v17, %v7577_v37  ;;  %v1091_v21 = vadd.f32 %v1083_v3, %v7580_v44  ;;  %v1044_v23 = vpop.f32.mrb[22].mxu0  ;;  %v1085_v25 = vpop.f32.mrb[22].mxu1  ;;  %v7745_v17 = vld [vmem:[#allocation9 + $0x24] ss:$16 sps:$4 sm:$0xff]   ;;  %v7747_v3 = vld [vmem:[#allocation9 + $0x2c] ss:$16 sps:$4 sm:$0xff]  }
 0x277   :  { %v6001_v24 = vmul.f32 -1.442695, %v1088_v19  ;;  %v1045_v26 = vpop.f32.mrb[23].mxu0  ;;  %v1086_v15 = vpop.f32.mrb[23].mxu1  ;;  %v7737_v19 = vld [vmem:[#allocation9] ss:$16 sps:$4 sm:$0xff]  }
 0x278   :  { %v6002_v35 = vmul.f32 -1.442695, %v1089_v22  ;;  %v6003_v36 = vmul.f32 -1.442695, %v1091_v21  ;;  %v7749_v22 = vld [vmem:[#allocation9 + $0x20] ss:$16 sps:$4 sm:$0xff]  }
 0x279   :  { %6844 = vpow2.f32 %v6001_v24  ;;  %v7751_v21 = vld [vmem:[#allocation9 + $0x28] ss:$16 sps:$4 sm:$0xff]   ;;  %v7757_v23 = vld [vmem:[#allocation9 + $0x44] ss:$16 sps:$4 sm:$0xff]   ;;  %v7759_v25 = vld [vmem:[#allocation9 + $0x4c] ss:$16 sps:$4 sm:$0xff]  }
 0x27a   :  { %6846 = vpow2.f32 %v6002_v35  ;;  %v7761_v24 = vld [vmem:[#allocation9 + $0x40] ss:$16 sps:$4 sm:$0xff]   ;;  %v7763_v26 = vld [vmem:[#allocation9 + $0x48] ss:$16 sps:$4 sm:$0xff]   ;;  %v7769_v15 = vld [vmem:[#allocation9 + $0x64] ss:$16 sps:$4 sm:$0xff]  }
 0x27b   :  { %6848 = vpow2.f32 %v6003_v36  ;;  %v7771_v35 = vld [vmem:[#allocation9 + $0x6c] ss:$16 sps:$4 sm:$0xff]   ;;  %v7773_v36 = vld [vmem:[#allocation9 + $0x60] ss:$16 sps:$4 sm:$0xff]  }
 0x27c   :  { %6850 = vtanh.f32 %v1090_v34  ;;  %v7739_v34 = vld [vmem:[#allocation9 + $0x8] ss:$16 sps:$4 sm:$0xff]  }
 0x283   :  { %v6845_v20 = vpop.eup %6844 }
 0x284   :  { %v6847_v27 = vpop.eup %6846  ;;  %v1095_v31 = vadd.f32 1.0, %v6845_v20  ;;  %v7775_v20 = vld [vmem:[#allocation9 + $0x68] ss:$16 sps:$4 sm:$0xff]  }
 0x285   :  { %v1101_v33 = vadd.f32 1.0, %v6847_v27  ;;  %v6849_v37 = vpop.eup %6848  ;;  %v7781_v27 = vld [vmem:[#allocation9 + $0x84] ss:$16 sps:$4 sm:$0xff]  }
 0x286   :  { %6852 = vrcp.f32 %v1095_v31  ;;  %v6851_v18 = vpop.eup %6850  ;;  %v1108_v56 = vadd.f32 1.0, %v6849_v37  ;;  %v7783_v31 = vld [vmem:[#allocation9 + $0x8c] ss:$16 sps:$4 sm:$0xff]   ;;  %v7787_v37 = vld [vmem:[#allocation9 + $0x88] ss:$16 sps:$4 sm:$0xff]  }
 0x287   :  { %6854 = vrcp.f32 %v1101_v33  ;;  %v7785_v33 = vld [vmem:[#allocation9 + $0x80] ss:$16 sps:$4 sm:$0xff]  }
 0x288   :  { %6856 = vrcp.f32 %v1108_v56  ;;  %v7802_v56 = vld [vmem:[#allocation9 + $0xc4] ss:$16 sps:$4 sm:$0xff]  }
 0x290   :  { %v6853_v44 = vpop.eup %6852 }
 0x291   :  { %v6855_v28 = vpop.eup %6854  ;;  %v1112_v29 = vmul.f32 %v6853_v44, %v6851_v18  ;;  %v7791_v18 = vld [vmem:[#allocation9 + $0xa4] ss:$16 sps:$4 sm:$0xff]   ;;  %v7795_v44 = vld [vmem:[#allocation9 + $0xa0] ss:$16 sps:$4 sm:$0xff]  }
 0x292   :  { %v1111_v32 = vmul.f32 %v6855_v28, %v7646_v14  ;;  %v6857_v30 = vpop.eup %6856  ;;  %v7735_v14 = vld [vmem:[#allocation9 + $0xc] ss:$16 sps:$4 sm:$0xff]   ;;  %v7797_v28 = vld [vmem:[#allocation9 + $0xa8] ss:$16 sps:$4 sm:$0xff]  }
 0x294   :  { %v7688_v9 = vadd.f32 %v1112_v29, %v1111_v32  ;;  %v7799_v29 = vld [vmem:[#allocation9 + $0xac] ss:$16 sps:$4 sm:$0xff]  }
 0x295   :  { %v7804_v32 = vld [vmem:[#allocation9 + $0xcc] ss:$16 sps:$4 sm:$0xff]  }
 0x296   :  { %6858 = vtanh.f32 %v7688_v9 }
 0x2a0   :  { %v6859_v48 = vpop.eup %6858 }
 0x2a1   :  { %v1115_v45 = vmul.f32 %v6859_v48, %v6857_v30  ;;  %v7811_v30 = vld [vmem:[#allocation9 + $0xc8] ss:$16 sps:$4 sm:$0xff]   ;;  %v7815_v48 = vld [vmem:[#allocation9 + $0xe4] ss:$16 sps:$4 sm:$0xff]  }
 0x2a3   :  { %1117 = vst [vmem:[#allocation12 + $0x8] sm:$0xff] %v1115_v45  ;;  %v1123_v0 = vpack.c.bf16 %v1115_v45, %v1115_v45  ;;  %v7817_v45 = vld [vmem:[#allocation9 + $0xec] ss:$16 sps:$4 sm:$0xff]  }
 0x2a5   :  { %1349 = vmatmul.mubr.bf16.vlgmr.msra.gmra.mrb[24].mxu0 %v1123_v0  ;;  %1390 = vmatmul.mubr.bf16.vlgmr.msra.gmra.mrb[24].mxu1 %v1123_v0  ;;  %v7821_v0 = vld [vmem:[#allocation9 + $0xe0] ss:$16 sps:$4 sm:$0xff]  }
 0x2a6   :  { %1627 = vmatpush1.bf16.msra.mxu0 %v7409_v38  ;;  %1668 = vmatpush1.bf16.msra.mxu1 %v7411_v39 }
 0x2a7   :  { %1628 = vmatprep.subr.bf16.mxu0 %v7415_v40  ;;  %1669 = vmatprep.subr.bf16.mxu1 %v7417_v41 }
 0x2a8   :  { %1658 = vmatprep.mubr.bf16.mxu0 %v8667_v16  ;;  %1699 = vmatprep.mubr.bf16.mxu1 %v8667_v16 }
 0x2aa   :  { %1629 = vmatpush1.bf16.msra.mxu0 %v7419_v42  ;;  %1670 = vmatpush1.bf16.msra.mxu1 %v7421_v43 }
 0x2ab   :  { %1630 = vmatprep.subr.bf16.mxu0 %v7427_v46  ;;  %1671 = vmatprep.subr.bf16.mxu1 %v7429_v47  ;;  %v8668_v47 = vld [vmem:[#allocation22_spill] sm:$0xff] }
 0x2ae   :  { %1631 = vmatpush1.bf16.msra.mxu0 %v7433_v49  ;;  %1672 = vmatpush1.bf16.msra.mxu1 %v7435_v50 }
 0x2af   :  { %1632 = vmatprep.subr.bf16.mxu0 %v7439_v51  ;;  %1673 = vmatprep.subr.bf16.mxu1 %v7443_v52 }
 0x2b2   :  { %1633 = vmatpush1.bf16.msra.mxu0 %v7445_v53  ;;  %1674 = vmatpush1.bf16.msra.mxu1 %v7447_v54 }
 0x2b3   :  { %1634 = vmatprep.subr.bf16.mxu0 %v7453_v57  ;;  %1675 = vmatprep.subr.bf16.mxu1 %v7455_v58 }
 0x2b6   :  { %1635 = vmatpush1.bf16.msra.mxu0 %v7459_v59  ;;  %1676 = vmatpush1.bf16.msra.mxu1 %v7461_v60 }
 0x2b7   :  { %1636 = vmatprep.subr.bf16.mxu0 %v7463_v62  ;;  %1677 = vmatprep.subr.bf16.mxu1 %v7465_v63 }
 0x2ba   :  { %1637 = vmatpush1.bf16.msra.mxu0 %v7471_v1  ;;  %1678 = vmatpush1.bf16.msra.mxu1 %v7473_v2 }
 0x2bb   :  { %1638 = vmatprep.subr.bf16.mxu0 %v7475_v5  ;;  %1679 = vmatprep.subr.bf16.mxu1 %v7477_v6 }
 0x2be   :  { %1639 = vmatpush1.bf16.msra.mxu0 %v7485_v7  ;;  %1680 = vmatpush1.bf16.msra.mxu1 %v7487_v8 }
 0x2bf   :  { %1640 = vmatprep.subr.bf16.mxu0 %v7489_v10  ;;  %1681 = vmatprep.subr.bf16.mxu1 %v7491_v11 }
 0x2c2   :  { %1641 = vmatpush1.bf16.msra.mxu0 %v7497_v12  ;;  %1682 = vmatpush1.bf16.msra.mxu1 %v7499_v13 }
 0x2c3   :  { %1977 = vmatprep.subr.bf16.mxu1 %v7735_v14 }
 0x378   :  { %v1350_v38 = vpop.f32.mrb[24].mxu0  ;;  %v1391_v39 = vpop.f32.mrb[24].mxu1 }
 0x379   :  { %v1398_v40 = vadd.f32 %v1350_v38, %v7582_v55  ;;  %v1400_v41 = vadd.f32 %v1391_v39, %v7585_v61  ;;  %v1352_v42 = vpop.f32.mrb[25].mxu0  ;;  %v1393_v43 = vpop.f32.mrb[25].mxu1  ;;  %v7823_v38 = vld [vmem:[#allocation9 + $0xe8] ss:$16 sps:$4 sm:$0xff]  }
 0x37a   :  { %v1399_v46 = vadd.f32 %v1352_v42, %v7587_v4  ;;  %v1401_v49 = vadd.f32 %v1393_v43, %v8668_v47  ;;  %v1354_v50 = vpop.f32.mrb[26].mxu0  ;;  %v1395_v51 = vpop.f32.mrb[26].mxu1  ;;  %v7733_v4 = vld [vmem:[#allocation9 + $0x4] ss:$16 sps:$4 sm:$0xff]   ;;  %v8670_v43 = vld [vmem:[#allocation24_spill] sm:$0xff] }
 0x37b   :  { %v6036_v52 = vmul.f32 -1.442695, %v1398_v40  ;;  %v1355_v53 = vpop.f32.mrb[27].mxu0  ;;  %v1396_v54 = vpop.f32.mrb[27].mxu1  ;;  %1936 = vmatprep.subr.bf16.mxu0 %v7733_v4  ;;  %v8671_v50 = vld [vmem:[#allocation25_spill] sm:$0xff] }
 0x37c   :  { %v6037_v57 = vmul.f32 -1.442695, %v1399_v46  ;;  %v6038_v58 = vmul.f32 -1.442695, %v1401_v49 }
 0x37d   :  { %6860 = vpow2.f32 %v6036_v52  ;;  %v8672_v52 = vld [vmem:[#allocation26_spill] sm:$0xff] }
 0x37e   :  { %6862 = vpow2.f32 %v6037_v57 }
 0x37f   :  { %6864 = vpow2.f32 %v6038_v58 }
 0x380   :  { %6866 = vtanh.f32 %v1400_v41  ;;  %v8669_v41 = vld [vmem:[#allocation23_spill] sm:$0xff] }
 0x387   :  { %v6861_v59 = vpop.eup %6860 }
 0x388   :  { %v6863_v60 = vpop.eup %6862  ;;  %v1405_v62 = vadd.f32 1.0, %v6861_v59 }
 0x389   :  { %v1411_v63 = vadd.f32 1.0, %v6863_v60  ;;  %v6865_v1 = vpop.eup %6864 }
 0x38a   :  { %6868 = vrcp.f32 %v1405_v62  ;;  %v6867_v2 = vpop.eup %6866  ;;  %v1418_v8 = vadd.f32 1.0, %v6865_v1 }
 0x38b   :  { %6870 = vrcp.f32 %v1411_v63 }
 0x38c   :  { %6872 = vrcp.f32 %v1418_v8 }
 0x394   :  { %v6869_v5 = vpop.eup %6868 }
 0x395   :  { %v6871_v6 = vpop.eup %6870  ;;  %v1422_v7 = vmul.f32 %v6869_v5, %v6867_v2 }
 0x396   :  { %v1421_v10 = vmul.f32 %v6871_v6, %v7688_v9  ;;  %v6873_v12 = vpop.eup %6872  ;;  %v7809_v9 = vld [vmem:[#allocation9 + $0xc0] ss:$16 sps:$4 sm:$0xff]  }
 0x398   :  { %v7728_v11 = vadd.f32 %v1422_v7, %v1421_v10 }
 0x39a   :  { %6874 = vtanh.f32 %v7728_v11 }
 0x3a4   :  { %v6875_v13 = vpop.eup %6874 }
 0x3a5   :  { %v1425_v55 = vmul.f32 %v6875_v13, %v6873_v12 }
 0x3a7   :  { %1427 = vst [vmem:[#allocation12 + $0x10] sm:$0xff] %v1425_v55  ;;  %v1433_v61 = vpack.c.bf16 %v1425_v55, %v1425_v55 }
 0x3a9   :  { %1659 = vmatmul.mubr.bf16.vlgmr.msra.gmra.mrb[28].mxu0 %v1433_v61  ;;  %1700 = vmatmul.mubr.bf16.vlgmr.msra.gmra.mrb[28].mxu1 %v1433_v61 }
 0x3aa   :  { %1968 = vmatprep.mubr.bf16.mxu0 %v8667_v16  ;;  %2009 = vmatprep.mubr.bf16.mxu1 %v8667_v16 }
 0x3ab   :  { %1937 = vmatpush1.bf16.msra.mxu0 %v7737_v19  ;;  %1978 = vmatpush1.bf16.msra.mxu1 %v7739_v34 }
 0x3ac   :  { %1938 = vmatprep.subr.bf16.mxu0 %v7745_v17  ;;  %1979 = vmatprep.subr.bf16.mxu1 %v7747_v3 }
 0x3af   :  { %1939 = vmatpush1.bf16.msra.mxu0 %v7749_v22  ;;  %1980 = vmatpush1.bf16.msra.mxu1 %v7751_v21 }
 0x3b0   :  { %1940 = vmatprep.subr.bf16.mxu0 %v7757_v23  ;;  %1981 = vmatprep.subr.bf16.mxu1 %v7759_v25 }
 0x3b3   :  { %1941 = vmatpush1.bf16.msra.mxu0 %v7761_v24  ;;  %1982 = vmatpush1.bf16.msra.mxu1 %v7763_v26 }
 0x3b4   :  { %1942 = vmatprep.subr.bf16.mxu0 %v7769_v15  ;;  %1983 = vmatprep.subr.bf16.mxu1 %v7771_v35 }
 0x3b7   :  { %1943 = vmatpush1.bf16.msra.mxu0 %v7773_v36  ;;  %1984 = vmatpush1.bf16.msra.mxu1 %v7775_v20 }
 0x3b8   :  { %1944 = vmatprep.subr.bf16.mxu0 %v7781_v27  ;;  %1985 = vmatprep.subr.bf16.mxu1 %v7783_v31 }
 0x3bb   :  { %1945 = vmatpush1.bf16.msra.mxu0 %v7785_v33  ;;  %1986 = vmatpush1.bf16.msra.mxu1 %v7787_v37 }
 0x3bc   :  { %1946 = vmatprep.subr.bf16.mxu0 %v7791_v18  ;;  %1987 = vmatprep.subr.bf16.mxu1 %v7799_v29 }
 0x3bf   :  { %1947 = vmatpush1.bf16.msra.mxu0 %v7795_v44  ;;  %1988 = vmatpush1.bf16.msra.mxu1 %v7797_v28 }
 0x3c0   :  { %1948 = vmatprep.subr.bf16.mxu0 %v7802_v56  ;;  %1989 = vmatprep.subr.bf16.mxu1 %v7804_v32 }
 0x3c3   :  { %1949 = vmatpush1.bf16.msra.mxu0 %v7809_v9  ;;  %1990 = vmatpush1.bf16.msra.mxu1 %v7811_v30 }
 0x3c4   :  { %1950 = vmatprep.subr.bf16.mxu0 %v7815_v48  ;;  %1991 = vmatprep.subr.bf16.mxu1 %v7817_v45 }
 0x3c7   :  { %1951 = vmatpush1.bf16.msra.mxu0 %v7821_v0  ;;  %1992 = vmatpush1.bf16.msra.mxu1 %v7823_v38 }
 0x3c8   :  { %2246 = vmatprep.subr.bf16.mxu0 %v7733_v4  ;;  %2287 = vmatprep.subr.bf16.mxu1 %v7735_v14 }
 0x47c   :  { %v1660_v39 = vpop.f32.mrb[28].mxu0  ;;  %v1701_v40 = vpop.f32.mrb[28].mxu1 }
 0x47d   :  { %v1708_v42 = vadd.f32 %v1660_v39, %v8669_v41  ;;  %v1710_v46 = vadd.f32 %v1701_v40, %v8670_v43  ;;  %v1662_v47 = vpop.f32.mrb[29].mxu0  ;;  %v1703_v49 = vpop.f32.mrb[29].mxu1 }
 0x47e   :  { %v1709_v51 = vadd.f32 %v1662_v47, %v8671_v50  ;;  %v1711_v53 = vadd.f32 %v1703_v49, %v8672_v52  ;;  %v1664_v54 = vpop.f32.mrb[30].mxu0  ;;  %v1705_v57 = vpop.f32.mrb[30].mxu1  ;;  %v8673_v47 = vld [vmem:[#allocation27_spill] sm:$0xff]  ;;  %v8674_v50 = vld [vmem:[#allocation28_spill] sm:$0xff] }
 0x47f   :  { %v6071_v58 = vmul.f32 -1.442695, %v1708_v42  ;;  %v1665_v59 = vpop.f32.mrb[31].mxu0  ;;  %v1706_v60 = vpop.f32.mrb[31].mxu1  ;;  %v8675_v54 = vld [vmem:[#allocation29_spill] sm:$0xff] }
 0x480   :  { %v6072_v62 = vmul.f32 -1.442695, %v1709_v51  ;;  %v6073_v63 = vmul.f32 -1.442695, %v1711_v53 }
 0x481   :  { %6876 = vpow2.f32 %v6071_v58  ;;  %v8676_v58 = vld [vmem:[#allocation30_spill] sm:$0xff] }
 0x482   :  { %6878 = vpow2.f32 %v6072_v62 }
 0x483   :  { %6880 = vpow2.f32 %v6073_v63 }
 0x484   :  { %6882 = vtanh.f32 %v1710_v46 }
 0x48b   :  { %v6877_v1 = vpop.eup %6876 }
 0x48c   :  { %v6879_v2 = vpop.eup %6878  ;;  %v1715_v5 = vadd.f32 1.0, %v6877_v1 }
 0x48d   :  { %v1721_v6 = vadd.f32 1.0, %v6879_v2  ;;  %v6881_v7 = vpop.eup %6880 }
 0x48e   :  { %6884 = vrcp.f32 %v1715_v5  ;;  %v6883_v8 = vpop.eup %6882  ;;  %v1728_v55 = vadd.f32 1.0, %v6881_v7 }
 0x48f   :  { %6886 = vrcp.f32 %v1721_v6 }
 0x490   :  { %6888 = vrcp.f32 %v1728_v55 }
 0x498   :  { %v6885_v10 = vpop.eup %6884 }
 0x499   :  { %v6887_v12 = vpop.eup %6886  ;;  %v1732_v13 = vmul.f32 %v6885_v10, %v6883_v8 }
 0x49a   :  { %v1731_v61 = vmul.f32 %v6887_v12, %v7728_v11  ;;  %v6889_v40 = vpop.eup %6888 }
 0x49c   :  { %v7836_v39 = vadd.f32 %v1732_v13, %v1731_v61 }
 0x49e   :  { %6890 = vtanh.f32 %v7836_v39 }
 0x4a8   :  { %v6891_v41 = vpop.eup %6890 }
 0x4a9   :  { %v7839_v42 = vmul.f32 %v6891_v41, %v6889_v40 }
 0x4ab   :  { %v1743_v43 = vpack.c.bf16 %v7839_v42, %v7839_v42 }
 0x4ad   :  { %1969 = vmatmul.mubr.bf16.vlgmr.msra.gmra.mrb[32].mxu0 %v1743_v43  ;;  %2010 = vmatmul.mubr.bf16.vlgmr.msra.gmra.mrb[32].mxu1 %v1743_v43 }
 0x4ae   :  { %2247 = vmatpush1.bf16.msra.mxu0 %v7737_v19  ;;  %2288 = vmatpush1.bf16.msra.mxu1 %v7739_v34 }
 0x4af   :  { %2248 = vmatprep.subr.bf16.mxu0 %v7745_v17  ;;  %2289 = vmatprep.subr.bf16.mxu1 %v7747_v3 }
 0x4b0   :  { %2278 = vmatprep.mubr.bf16.mxu0 %v8667_v16  ;;  %2319 = vmatprep.mubr.bf16.mxu1 %v8667_v16 }
 0x4b2   :  { %2249 = vmatpush1.bf16.msra.mxu0 %v7749_v22  ;;  %2290 = vmatpush1.bf16.msra.mxu1 %v7751_v21 }
 0x4b3   :  { %2250 = vmatprep.subr.bf16.mxu0 %v7757_v23  ;;  %2291 = vmatprep.subr.bf16.mxu1 %v7759_v25 }
 0x4b6   :  { %2251 = vmatpush1.bf16.msra.mxu0 %v7761_v24  ;;  %2292 = vmatpush1.bf16.msra.mxu1 %v7763_v26 }
 0x4b7   :  { %2252 = vmatprep.subr.bf16.mxu0 %v7769_v15  ;;  %2293 = vmatprep.subr.bf16.mxu1 %v7771_v35 }
 0x4ba   :  { %2253 = vmatpush1.bf16.msra.mxu0 %v7773_v36  ;;  %2294 = vmatpush1.bf16.msra.mxu1 %v7775_v20 }
 0x4bb   :  { %2254 = vmatprep.subr.bf16.mxu0 %v7781_v27  ;;  %2295 = vmatprep.subr.bf16.mxu1 %v7783_v31 }
 0x4be   :  { %2255 = vmatpush1.bf16.msra.mxu0 %v7785_v33  ;;  %2296 = vmatpush1.bf16.msra.mxu1 %v7787_v37 }
 0x4bf   :  { %2256 = vmatprep.subr.bf16.mxu0 %v7791_v18  ;;  %2297 = vmatprep.subr.bf16.mxu1 %v7799_v29 }
 0x4c2   :  { %2257 = vmatpush1.bf16.msra.mxu0 %v7795_v44  ;;  %2298 = vmatpush1.bf16.msra.mxu1 %v7797_v28 }
 0x4c3   :  { %2258 = vmatprep.subr.bf16.mxu0 %v7802_v56  ;;  %2299 = vmatprep.subr.bf16.mxu1 %v7804_v32 }
 0x4c6   :  { %2259 = vmatpush1.bf16.msra.mxu0 %v7809_v9  ;;  %2300 = vmatpush1.bf16.msra.mxu1 %v7811_v30 }
 0x4c7   :  { %2260 = vmatprep.subr.bf16.mxu0 %v7815_v48  ;;  %2301 = vmatprep.subr.bf16.mxu1 %v7817_v45 }
 0x4ca   :  { %2261 = vmatpush1.bf16.msra.mxu0 %v7821_v0  ;;  %2302 = vmatpush1.bf16.msra.mxu1 %v7823_v38 }
 0x4cb   :  { %2556 = vmatprep.subr.bf16.mxu0 %v7733_v4  ;;  %2597 = vmatprep.subr.bf16.mxu1 %v7735_v14 }
 0x580   :  { %v1970_v11 = vpop.f32.mrb[32].mxu0  ;;  %v2011_v46 = vpop.f32.mrb[32].mxu1 }
 0x581   :  { %v2018_v49 = vadd.f32 %v1970_v11, %v8673_v47  ;;  %v2020_v51 = vadd.f32 %v2011_v46, %v8674_v50  ;;  %v1972_v52 = vpop.f32.mrb[33].mxu0  ;;  %v2013_v53 = vpop.f32.mrb[33].mxu1 }
 0x582   :  { %v2019_v57 = vadd.f32 %v1972_v52, %v8675_v54  ;;  %v2021_v59 = vadd.f32 %v2013_v53, %v8676_v58  ;;  %v1974_v60 = vpop.f32.mrb[34].mxu0  ;;  %v2015_v62 = vpop.f32.mrb[34].mxu1  ;;  %v8677_v53 = vld [vmem:[#allocation31_spill] sm:$0xff] }
 0x583   :  { %v6106_v63 = vmul.f32 -1.442695, %v2018_v49  ;;  %v1975_v1 = vpop.f32.mrb[35].mxu0  ;;  %v2016_v2 = vpop.f32.mrb[35].mxu1  ;;  %v8679_v62 = vld [vmem:[#allocation33_spill] sm:$0xff] }
 0x584   :  { %v6107_v5 = vmul.f32 -1.442695, %v2019_v57  ;;  %v6108_v6 = vmul.f32 -1.442695, %v2021_v59  ;;  %v8678_v57 = vld [vmem:[#allocation32_spill] sm:$0xff]  ;;  %v8680_v1 = vld [vmem:[#allocation34_spill] sm:$0xff] }
 0x585   :  { %6892 = vpow2.f32 %v6106_v63 }
 0x586   :  { %6894 = vpow2.f32 %v6107_v5 }
 0x587   :  { %6896 = vpow2.f32 %v6108_v6 }
 0x588   :  { %6898 = vtanh.f32 %v2020_v51 }
 0x58f   :  { %v6893_v7 = vpop.eup %6892 }
 0x590   :  { %v6895_v8 = vpop.eup %6894  ;;  %v2025_v10 = vadd.f32 1.0, %v6893_v7 }
 0x591   :  { %v2031_v12 = vadd.f32 1.0, %v6895_v8  ;;  %v6897_v13 = vpop.eup %6896 }
 0x592   :  { %6900 = vrcp.f32 %v2025_v10  ;;  %v6899_v55 = vpop.eup %6898  ;;  %v2038_v43 = vadd.f32 1.0, %v6897_v13 }
 0x593   :  { %6902 = vrcp.f32 %v2031_v12 }
 0x594   :  { %6904 = vrcp.f32 %v2038_v43 }
 0x59c   :  { %v6901_v61 = vpop.eup %6900 }
 0x59d   :  { %v6903_v40 = vpop.eup %6902  ;;  %v2042_v41 = vmul.f32 %v6901_v61, %v6899_v55 }
 0x59e   :  { %v2041_v11 = vmul.f32 %v6903_v40, %v7836_v39  ;;  %v6905_v47 = vpop.eup %6904 }
 0x5a0   :  { %v7882_v46 = vadd.f32 %v2042_v41, %v2041_v11 }
 0x5a2   :  { %6906 = vtanh.f32 %v7882_v46 }
 0x5ac   :  { %v6907_v49 = vpop.eup %6906 }
 0x5ad   :  { %v7885_v50 = vmul.f32 %v6907_v49, %v6905_v47 }
 0x5af   :  { %v2053_v51 = vpack.c.bf16 %v7885_v50, %v7885_v50 }
 0x5b1   :  { %2279 = vmatmul.mubr.bf16.vlgmr.msra.gmra.mrb[36].mxu0 %v2053_v51  ;;  %2320 = vmatmul.mubr.bf16.vlgmr.msra.gmra.mrb[36].mxu1 %v2053_v51 }
 0x5b2   :  { %2557 = vmatpush1.bf16.msra.mxu0 %v7737_v19  ;;  %2598 = vmatpush1.bf16.msra.mxu1 %v7739_v34 }
 0x5b3   :  { %2558 = vmatprep.subr.bf16.mxu0 %v7745_v17  ;;  %2599 = vmatprep.subr.bf16.mxu1 %v7747_v3 }
 0x5b4   :  { %2588 = vmatprep.mubr.bf16.mxu0 %v8667_v16  ;;  %2629 = vmatprep.mubr.bf16.mxu1 %v8667_v16 }
 0x5b6   :  { %2559 = vmatpush1.bf16.msra.mxu0 %v7749_v22  ;;  %2600 = vmatpush1.bf16.msra.mxu1 %v7751_v21 }
 0x5b7   :  { %2560 = vmatprep.subr.bf16.mxu0 %v7757_v23  ;;  %2601 = vmatprep.subr.bf16.mxu1 %v7759_v25 }
 0x5ba   :  { %2561 = vmatpush1.bf16.msra.mxu0 %v7761_v24  ;;  %2602 = vmatpush1.bf16.msra.mxu1 %v7763_v26 }
 0x5bb   :  { %2562 = vmatprep.subr.bf16.mxu0 %v7769_v15  ;;  %2603 = vmatprep.subr.bf16.mxu1 %v7771_v35 }
 0x5be   :  { %2563 = vmatpush1.bf16.msra.mxu0 %v7773_v36  ;;  %2604 = vmatpush1.bf16.msra.mxu1 %v7775_v20 }
 0x5bf   :  { %2564 = vmatprep.subr.bf16.mxu0 %v7781_v27  ;;  %2605 = vmatprep.subr.bf16.mxu1 %v7783_v31 }
 0x5c2   :  { %2565 = vmatpush1.bf16.msra.mxu0 %v7785_v33  ;;  %2606 = vmatpush1.bf16.msra.mxu1 %v7787_v37 }
 0x5c3   :  { %2566 = vmatprep.subr.bf16.mxu0 %v7791_v18  ;;  %2607 = vmatprep.subr.bf16.mxu1 %v7799_v29 }
 0x5c6   :  { %2567 = vmatpush1.bf16.msra.mxu0 %v7795_v44  ;;  %2608 = vmatpush1.bf16.msra.mxu1 %v7797_v28 }
 0x5c7   :  { %2568 = vmatprep.subr.bf16.mxu0 %v7802_v56  ;;  %2609 = vmatprep.subr.bf16.mxu1 %v7804_v32 }
 0x5ca   :  { %2569 = vmatpush1.bf16.msra.mxu0 %v7809_v9  ;;  %2610 = vmatpush1.bf16.msra.mxu1 %v7811_v30 }
 0x5cb   :  { %2570 = vmatprep.subr.bf16.mxu0 %v7815_v48  ;;  %2611 = vmatprep.subr.bf16.mxu1 %v7817_v45 }
 0x5ce   :  { %2571 = vmatpush1.bf16.msra.mxu0 %v7821_v0  ;;  %2612 = vmatpush1.bf16.msra.mxu1 %v7823_v38 }
 0x5cf   :  { %2866 = vmatprep.subr.bf16.mxu0 %v7733_v4  ;;  %2907 = vmatprep.subr.bf16.mxu1 %v7735_v14 }
 0x684   :  { %v2280_v39 = vpop.f32.mrb[36].mxu0  ;;  %v2321_v52 = vpop.f32.mrb[36].mxu1 }
 0x685   :  { %v2328_v54 = vadd.f32 %v2280_v39, %v8677_v53  ;;  %v2330_v58 = vadd.f32 %v2321_v52, %v8678_v57  ;;  %v2282_v59 = vpop.f32.mrb[37].mxu0  ;;  %v2323_v60 = vpop.f32.mrb[37].mxu1 }
 0x686   :  { %v2329_v63 = vadd.f32 %v2282_v59, %v8679_v62  ;;  %v2331_v2 = vadd.f32 %v2323_v60, %v8680_v1  ;;  %v2284_v5 = vpop.f32.mrb[38].mxu0  ;;  %v2325_v6 = vpop.f32.mrb[38].mxu1  ;;  %v6684_v1 = vld [vmem:[#allocation8] ss:$16 sps:$4 sm:$0xff]  }
 0x687   :  { %v6141_v7 = vmul.f32 -1.442695, %v2328_v54  ;;  %v2285_v8 = vpop.f32.mrb[39].mxu0  ;;  %v2326_v10 = vpop.f32.mrb[39].mxu1  ;;  %v6692_v6 = vld [vmem:[#allocation8 + $0x24] ss:$16 sps:$4 sm:$0xff]  }
 0x688   :  { %v6142_v4 = vmul.f32 -1.442695, %v2329_v63  ;;  %v6143_v14 = vmul.f32 -1.442695, %v2331_v2  ;;  %v6687_v2 = vld [vmem:[#allocation8 + $0x8] ss:$16 sps:$4 sm:$0xff]  }
 0x689   :  { %6908 = vpow2.f32 %v6141_v7  ;;  %v6695_v7 = vld [vmem:[#allocation8 + $0x2c] ss:$16 sps:$4 sm:$0xff]   ;;  %v6690_v8 = vld [vmem:[#allocation8 + $0x20] ss:$16 sps:$4 sm:$0xff]   ;;  %v6693_v10 = vld [vmem:[#allocation8 + $0x28] ss:$16 sps:$4 sm:$0xff]  }
 0x68a   :  { %6910 = vpow2.f32 %v6142_v4  ;;  %v6698_v4 = vld [vmem:[#allocation8 + $0x44] ss:$16 sps:$4 sm:$0xff]  }
 0x68b   :  { %6912 = vpow2.f32 %v6143_v14  ;;  %v6701_v14 = vld [vmem:[#allocation8 + $0x4c] ss:$16 sps:$4 sm:$0xff]  }
 0x68c   :  { %6914 = vtanh.f32 %v2330_v58 }
 0x693   :  { %v6909_v12 = vpop.eup %6908 }
 0x694   :  { %v6911_v13 = vpop.eup %6910  ;;  %v2335_v55 = vadd.f32 1.0, %v6909_v12  ;;  %v6696_v12 = vld [vmem:[#allocation8 + $0x40] ss:$16 sps:$4 sm:$0xff]  }
 0x695   :  { %v2341_v61 = vadd.f32 1.0, %v6911_v13  ;;  %v6913_v40 = vpop.eup %6912  ;;  %v6699_v13 = vld [vmem:[#allocation8 + $0x48] ss:$16 sps:$4 sm:$0xff]  }
 0x696   :  { %6916 = vrcp.f32 %v2335_v55  ;;  %v6915_v41 = vpop.eup %6914  ;;  %v2348_v49 = vadd.f32 1.0, %v6913_v40  ;;  %v6704_v55 = vld [vmem:[#allocation8 + $0x64] ss:$16 sps:$4 sm:$0xff]   ;;  %v6702_v40 = vld [vmem:[#allocation8 + $0x60] ss:$16 sps:$4 sm:$0xff]  }
 0x697   :  { %6918 = vrcp.f32 %v2341_v61  ;;  %v6707_v61 = vld [vmem:[#allocation8 + $0x6c] ss:$16 sps:$4 sm:$0xff]  }
 0x698   :  { %6920 = vrcp.f32 %v2348_v49  ;;  %v6711_v49 = vld [vmem:[#allocation8 + $0x88] ss:$16 sps:$4 sm:$0xff]  }
 0x6a0   :  { %v6917_v43 = vpop.eup %6916 }
 0x6a1   :  { %v6919_v11 = vpop.eup %6918  ;;  %v2352_v47 = vmul.f32 %v6917_v43, %v6915_v41  ;;  %v6705_v41 = vld [vmem:[#allocation8 + $0x68] ss:$16 sps:$4 sm:$0xff]   ;;  %v6710_v43 = vld [vmem:[#allocation8 + $0x84] ss:$16 sps:$4 sm:$0xff]  }
 0x6a2   :  { %v2351_v51 = vmul.f32 %v6919_v11, %v7882_v46  ;;  %v6921_v52 = vpop.eup %6920  ;;  %v6713_v11 = vld [vmem:[#allocation8 + $0x8c] ss:$16 sps:$4 sm:$0xff]  }
 0x6a4   :  { %v7928_v39 = vadd.f32 %v2352_v47, %v2351_v51  ;;  %v6708_v47 = vld [vmem:[#allocation8 + $0x80] ss:$16 sps:$4 sm:$0xff]   ;;  %v6716_v51 = vld [vmem:[#allocation8 + $0xa4] ss:$16 sps:$4 sm:$0xff]  }
 0x6a6   :  { %6922 = vtanh.f32 %v7928_v39 }
 0x6b0   :  { %v6923_v53 = vpop.eup %6922 }
 0x6b1   :  { %v7931_v54 = vmul.f32 %v6923_v53, %v6921_v52  ;;  %v6714_v52 = vld [vmem:[#allocation8 + $0xa0] ss:$16 sps:$4 sm:$0xff]   ;;  %v6717_v53 = vld [vmem:[#allocation8 + $0xa8] ss:$16 sps:$4 sm:$0xff]  }
 0x6b3   :  { %v2363_v57 = vpack.c.bf16 %v7931_v54, %v7931_v54 }
 0x6b5   :  { %2589 = vmatmul.mubr.bf16.vlgmr.msra.gmra.mrb[40].mxu0 %v2363_v57  ;;  %2630 = vmatmul.mubr.bf16.vlgmr.msra.gmra.mrb[40].mxu1 %v2363_v57  ;;  %v6722_v57 = vld [vmem:[#allocation8 + $0xc4] ss:$16 sps:$4 sm:$0xff]  }
 0x6b6   :  { %2867 = vmatpush1.bf16.msra.mxu0 %v7737_v19  ;;  %2908 = vmatpush1.bf16.msra.mxu1 %v7739_v34  ;;  %v6686_v19 = vld [vmem:[#allocation8 + $0x4] ss:$16 sps:$4 sm:$0xff]   ;;  %v6689_v34 = vld [vmem:[#allocation8 + $0xc] ss:$16 sps:$4 sm:$0xff]  }
 0x6b7   :  { %2868 = vmatprep.subr.bf16.mxu0 %v7745_v17  ;;  %2909 = vmatprep.subr.bf16.mxu1 %v7747_v3 }
 0x6b8   :  { %2898 = vmatprep.mubr.bf16.mxu0 %v8667_v16  ;;  %2939 = vmatprep.mubr.bf16.mxu1 %v8667_v16 }
 0x6ba   :  { %2869 = vmatpush1.bf16.msra.mxu0 %v7749_v22  ;;  %2910 = vmatpush1.bf16.msra.mxu1 %v7751_v21  ;;  %v8681_v22 = vld [vmem:[#allocation35_spill] sm:$0xff] }
 0x6bb   :  { %2870 = vmatprep.subr.bf16.mxu0 %v7757_v23  ;;  %2911 = vmatprep.subr.bf16.mxu1 %v7759_v25  ;;  %v8682_v23 = vld [vmem:[#allocation36_spill] sm:$0xff] }
 0x6be   :  { %2871 = vmatpush1.bf16.msra.mxu0 %v7761_v24  ;;  %2912 = vmatpush1.bf16.msra.mxu1 %v7763_v26 }
 0x6bf   :  { %2872 = vmatprep.subr.bf16.mxu0 %v7769_v15  ;;  %2913 = vmatprep.subr.bf16.mxu1 %v7771_v35  ;;  %v8683_v15 = vld [vmem:[#allocation37_spill] sm:$0xff] }
 0x6c2   :  { %2873 = vmatpush1.bf16.msra.mxu0 %v7773_v36  ;;  %2914 = vmatpush1.bf16.msra.mxu1 %v7775_v20  ;;  %v8684_v36 = vld [vmem:[#allocation38_spill] sm:$0xff] }
 0x6c3   :  { %2874 = vmatprep.subr.bf16.mxu0 %v7781_v27  ;;  %2915 = vmatprep.subr.bf16.mxu1 %v7783_v31 }
 0x6c6   :  { %2875 = vmatpush1.bf16.msra.mxu0 %v7785_v33  ;;  %2916 = vmatpush1.bf16.msra.mxu1 %v7787_v37 }
 0x6c7   :  { %2876 = vmatprep.subr.bf16.mxu0 %v7791_v18  ;;  %2917 = vmatprep.subr.bf16.mxu1 %v7799_v29 }
 0x6ca   :  { %2877 = vmatpush1.bf16.msra.mxu0 %v7795_v44  ;;  %2918 = vmatpush1.bf16.msra.mxu1 %v7797_v28 }
 0x6cb   :  { %2878 = vmatprep.subr.bf16.mxu0 %v7802_v56  ;;  %2919 = vmatprep.subr.bf16.mxu1 %v7804_v32 }
 0x6ce   :  { %2879 = vmatpush1.bf16.msra.mxu0 %v7809_v9  ;;  %2920 = vmatpush1.bf16.msra.mxu1 %v7811_v30 }
 0x6cf   :  { %2880 = vmatprep.subr.bf16.mxu0 %v7815_v48  ;;  %2921 = vmatprep.subr.bf16.mxu1 %v7817_v45 }
 0x6d2   :  { %2881 = vmatpush1.bf16.msra.mxu0 %v7821_v0  ;;  %2922 = vmatpush1.bf16.msra.mxu1 %v7823_v38 }
 0x6d3   :  { %3207 = vmatprep.subr.bf16.mxu0 %v6686_v19  ;;  %3280 = vmatprep.subr.bf16.mxu1 %v6689_v34  ;;  %v6725_v19 = vld [vmem:[#allocation8 + $0xcc] ss:$16 sps:$4 sm:$0xff]   ;;  %v6720_v34 = vld [vmem:[#allocation8 + $0xc0] ss:$16 sps:$4 sm:$0xff]  }
 0x788   :  { %v2590_v17 = vpop.f32.mrb[40].mxu0  ;;  %v2631_v3 = vpop.f32.mrb[40].mxu1 }
 0x789   :  { %v2638_v21 = vadd.f32 %v2590_v17, %v8681_v22  ;;  %v2640_v25 = vadd.f32 %v2631_v3, %v8682_v23  ;;  %v2592_v24 = vpop.f32.mrb[41].mxu0  ;;  %v2633_v26 = vpop.f32.mrb[41].mxu1  ;;  %v6723_v17 = vld [vmem:[#allocation8 + $0xc8] ss:$16 sps:$4 sm:$0xff]   ;;  %v6728_v3 = vld [vmem:[#allocation8 + $0xe4] ss:$16 sps:$4 sm:$0xff]  }
 0x78a   :  { %v2639_v35 = vadd.f32 %v2592_v24, %v8683_v15  ;;  %v2641_v20 = vadd.f32 %v2633_v26, %v8684_v36  ;;  %v2594_v27 = vpop.f32.mrb[42].mxu0  ;;  %v2635_v31 = vpop.f32.mrb[42].mxu1  ;;  %v6731_v22 = vld [vmem:[#allocation8 + $0xec] ss:$16 sps:$4 sm:$0xff]   ;;  %v6729_v23 = vld [vmem:[#allocation8 + $0xe8] ss:$16 sps:$4 sm:$0xff]   ;;  %v2990_v36 = vpack.c.bf16 %v7931_v54, %v7885_v50 }
 0x78b   :  { %v6176_v33 = vmul.f32 -1.442695, %v2638_v21  ;;  %v2595_v37 = vpop.f32.mrb[43].mxu0  ;;  %v2636_v18 = vpop.f32.mrb[43].mxu1  ;;  %v6726_v21 = vld [vmem:[#allocation8 + $0xe0] ss:$16 sps:$4 sm:$0xff]  }
 0x78c   :  { %v6177_v44 = vmul.f32 -1.442695, %v2639_v35  ;;  %v6178_v28 = vmul.f32 -1.442695, %v2641_v20  ;;  %v2980_v24 = vld [vmem:[#allocation12] sm:$0xff]  ;;  %v2982_v15 = vld [vmem:[#allocation12 + $0x10] sm:$0xff] }
 0x78d   :  { %6924 = vpow2.f32 %v6176_v33  ;;  %v2989_v35 = vpack.c.bf16 %v7839_v42, %v2982_v15  ;;  %v7990_v20 = vld [vmem:[#allocation11 + $0x4] ss:$16 sps:$4 sm:$0xff]   ;;  %v7992_v27 = vld [vmem:[#allocation11 + $0xc] ss:$16 sps:$4 sm:$0xff]   ;;  %v7994_v42 = vld [vmem:[#allocation11] ss:$16 sps:$4 sm:$0xff]  }
 0x78e   :  { %6926 = vpow2.f32 %v6177_v44  ;;  %v7996_v31 = vld [vmem:[#allocation11 + $0x8] ss:$16 sps:$4 sm:$0xff]   ;;  %v8002_v50 = vld [vmem:[#allocation11 + $0x24] ss:$16 sps:$4 sm:$0xff]   ;;  %v8004_v54 = vld [vmem:[#allocation11 + $0x2c] ss:$16 sps:$4 sm:$0xff]  }
 0x78f   :  { %6928 = vpow2.f32 %v6178_v28  ;;  %v8006_v33 = vld [vmem:[#allocation11 + $0x20] ss:$16 sps:$4 sm:$0xff]   ;;  %v8008_v37 = vld [vmem:[#allocation11 + $0x28] ss:$16 sps:$4 sm:$0xff]   ;;  %v8014_v18 = vld [vmem:[#allocation11 + $0x44] ss:$16 sps:$4 sm:$0xff]  }
 0x790   :  { %6930 = vtanh.f32 %v2640_v25  ;;  %v2981_v25 = vld [vmem:[#allocation12 + $0x8] sm:$0xff]  ;;  %v8018_v28 = vld [vmem:[#allocation11 + $0x40] ss:$16 sps:$4 sm:$0xff]  }
 0x791   :  { %v2988_v26 = vpack.c.bf16 %v2981_v25, %v2980_v24  ;;  %v8016_v44 = vld [vmem:[#allocation11 + $0x4c] ss:$16 sps:$4 sm:$0xff]  }
 0x797   :  { %v6925_v29 = vpop.eup %6924 }
 0x798   :  { %v6927_v56 = vpop.eup %6926  ;;  %v2645_v32 = vadd.f32 1.0, %v6925_v29  ;;  %v8020_v29 = vld [vmem:[#allocation11 + $0x48] ss:$16 sps:$4 sm:$0xff]  }
 0x799   :  { %v2651_v9 = vadd.f32 1.0, %v6927_v56  ;;  %v6929_v30 = vpop.eup %6928  ;;  %v8026_v56 = vld [vmem:[#allocation11 + $0x64] ss:$16 sps:$4 sm:$0xff]  }
 0x79a   :  { %6932 = vrcp.f32 %v2645_v32  ;;  %v6931_v48 = vpop.eup %6930  ;;  %v2658_v46 = vadd.f32 1.0, %v6929_v30  ;;  %v8028_v32 = vld [vmem:[#allocation11 + $0x6c] ss:$16 sps:$4 sm:$0xff]   ;;  %v8032_v30 = vld [vmem:[#allocation11 + $0x68] ss:$16 sps:$4 sm:$0xff]  }
 0x79b   :  { %6934 = vrcp.f32 %v2651_v9  ;;  %v8030_v9 = vld [vmem:[#allocation11 + $0x60] ss:$16 sps:$4 sm:$0xff]  }
 0x79c   :  { %6936 = vrcp.f32 %v2658_v46  ;;  %v8050_v46 = vld [vmem:[#allocation11 + $0xa4] ss:$16 sps:$4 sm:$0xff]  }
 0x7a4   :  { %v6933_v45 = vpop.eup %6932 }
 0x7a5   :  { %v6935_v0 = vpop.eup %6934  ;;  %v2662_v38 = vmul.f32 %v6933_v45, %v6931_v48  ;;  %v8038_v48 = vld [vmem:[#allocation11 + $0x84] ss:$16 sps:$4 sm:$0xff]   ;;  %v8040_v45 = vld [vmem:[#allocation11 + $0x8c] ss:$16 sps:$4 sm:$0xff]  }
 0x7a6   :  { %v2661_v58 = vmul.f32 %v6935_v0, %v7928_v39  ;;  %v6937_v60 = vpop.eup %6936  ;;  %v6719_v39 = vld [vmem:[#allocation8 + $0xac] ss:$16 sps:$4 sm:$0xff]   ;;  %v8042_v0 = vld [vmem:[#allocation11 + $0x80] ss:$16 sps:$4 sm:$0xff]  }
 0x7a8   :  { %v7972_v59 = vadd.f32 %v2662_v38, %v2661_v58  ;;  %v8044_v38 = vld [vmem:[#allocation11 + $0x88] ss:$16 sps:$4 sm:$0xff]   ;;  %v8052_v58 = vld [vmem:[#allocation11 + $0xac] ss:$16 sps:$4 sm:$0xff]  }
 0x7aa   :  { %6938 = vtanh.f32 %v7972_v59 }
 0x7b4   :  { %v6939_v62 = vpop.eup %6938 }
 0x7b5   :  { %v7975_v63 = vmul.f32 %v6939_v62, %v6937_v60  ;;  %v8054_v60 = vld [vmem:[#allocation11 + $0xa0] ss:$16 sps:$4 sm:$0xff]   ;;  %v8056_v62 = vld [vmem:[#allocation11 + $0xa8] ss:$16 sps:$4 sm:$0xff]  }
 0x7b7   :  { %v2673_v5 = vpack.c.bf16 %v7975_v63, %v7975_v63 }
 0x7b9   :  { %2899 = vmatmul.mubr.bf16.vlgmr.msra.gmra.mrb[44].mxu0 %v2673_v5  ;;  %2940 = vmatmul.mubr.bf16.vlgmr.msra.gmra.mrb[44].mxu1 %v2673_v5  ;;  %v8066_v5 = vld [vmem:[#allocation11 + $0xc0] ss:$16 sps:$4 sm:$0xff]  }
 0x7ba   :  { %3208 = vmatpush1.bf16.msra.mxu0 %v6684_v1  ;;  %3281 = vmatpush1.bf16.msra.mxu1 %v6687_v2  ;;  %v8062_v1 = vld [vmem:[#allocation11 + $0xc4] ss:$16 sps:$4 sm:$0xff]   ;;  %v8064_v2 = vld [vmem:[#allocation11 + $0xcc] ss:$16 sps:$4 sm:$0xff]  }
 0x7bb   :  { %3209 = vmatprep.subr.bf16.mxu0 %v6692_v6  ;;  %3282 = vmatprep.subr.bf16.mxu1 %v6695_v7  ;;  %v8068_v6 = vld [vmem:[#allocation11 + $0xc8] ss:$16 sps:$4 sm:$0xff]   ;;  %v8074_v7 = vld [vmem:[#allocation11 + $0xe0] ss:$16 sps:$4 sm:$0xff]  }
 0x7bc   :  { %3239 = vmatprep.mubr.bf16.mxu0 %v8667_v16  ;;  %3312 = vmatprep.mubr.bf16.mxu1 %v8667_v16 }
 0x7be   :  { %3210 = vmatpush1.bf16.msra.mxu0 %v6690_v8  ;;  %3283 = vmatpush1.bf16.msra.mxu1 %v6693_v10  ;;  %v8076_v8 = vld [vmem:[#allocation11 + $0xe4] ss:$16 sps:$4 sm:$0xff]   ;;  %v8078_v10 = vld [vmem:[#allocation11 + $0xe8] ss:$16 sps:$4 sm:$0xff]  }
 0x7bf   :  { %3211 = vmatprep.subr.bf16.mxu0 %v6698_v4  ;;  %3284 = vmatprep.subr.bf16.mxu1 %v6701_v14  ;;  %v8080_v4 = vld [vmem:[#allocation11 + $0xec] ss:$16 sps:$4 sm:$0xff]  }
 0x7c2   :  { %3212 = vmatpush1.bf16.msra.mxu0 %v6696_v12  ;;  %3285 = vmatpush1.bf16.msra.mxu1 %v6699_v13  ;;  %v8685_v13 = vld [vmem:[#allocation39_spill] sm:$0xff] }
 0x7c3   :  { %3213 = vmatprep.subr.bf16.mxu0 %v6704_v55  ;;  %3286 = vmatprep.subr.bf16.mxu1 %v6707_v61  ;;  %v8686_v61 = vld [vmem:[#allocation40_spill] sm:$0xff] }
 0x7c6   :  { %3214 = vmatpush1.bf16.msra.mxu0 %v6702_v40  ;;  %3287 = vmatpush1.bf16.msra.mxu1 %v6705_v41 }
 0x7c7   :  { %3215 = vmatprep.subr.bf16.mxu0 %v6710_v43  ;;  %3288 = vmatprep.subr.bf16.mxu1 %v6713_v11  ;;  %v8687_v11 = vld [vmem:[#allocation41_spill] sm:$0xff] }
 0x7ca   :  { %3216 = vmatpush1.bf16.msra.mxu0 %v6708_v47  ;;  %3289 = vmatpush1.bf16.msra.mxu1 %v6711_v49  ;;  %v8688_v49 = vld [vmem:[#allocation42_spill] sm:$0xff] }
 0x7cb   :  { %3217 = vmatprep.subr.bf16.mxu0 %v6716_v51  ;;  %3290 = vmatprep.subr.bf16.mxu1 %v6719_v39 }
 0x7ce   :  { %3218 = vmatpush1.bf16.msra.mxu0 %v6714_v52  ;;  %3291 = vmatpush1.bf16.msra.mxu1 %v6717_v53 }
 0x7cf   :  { %3219 = vmatprep.subr.bf16.mxu0 %v6722_v57  ;;  %3292 = vmatprep.subr.bf16.mxu1 %v6725_v19 }
 0x7d2   :  { %3220 = vmatpush1.bf16.msra.mxu0 %v6720_v34  ;;  %3293 = vmatpush1.bf16.msra.mxu1 %v6723_v17 }
 0x7d3   :  { %3221 = vmatprep.subr.bf16.mxu0 %v6728_v3  ;;  %3294 = vmatprep.subr.bf16.mxu1 %v6731_v22 }
 0x7d6   :  { %3222 = vmatpush1.bf16.msra.mxu0 %v6726_v21  ;;  %3295 = vmatpush1.bf16.msra.mxu1 %v6729_v23 }
 0x7d7   :  { %3581 = vmatprep.subr.bf16.mxu0 %v7990_v20  ;;  %3622 = vmatprep.subr.bf16.mxu1 %v7992_v27 }
 0x7d9   :  { %3240 = vmatmul.mubr.bf16.vlgmr.msra.gmra.mrb[48].mxu0 %v2988_v26  ;;  %3313 = vmatmul.mubr.bf16.vlgmr.msra.gmra.mrb[48].mxu1 %v2988_v26 }
 0x7da   :  { %3249 = vmatprep.mubr.bf16.mxu0 %v8667_v16  ;;  %3322 = vmatprep.mubr.bf16.mxu1 %v8667_v16 }
 0x7db   :  { %3582 = vmatpush1.bf16.msra.mxu0 %v7994_v42  ;;  %3623 = vmatpush1.bf16.msra.mxu1 %v7996_v31 }
 0x7dc   :  { %3583 = vmatprep.subr.bf16.mxu0 %v8002_v50  ;;  %3624 = vmatprep.subr.bf16.mxu1 %v8004_v54 }
 0x7df   :  { %3584 = vmatpush1.bf16.msra.mxu0 %v8006_v33  ;;  %3625 = vmatpush1.bf16.msra.mxu1 %v8008_v37 }
 0x7e0   :  { %3585 = vmatprep.subr.bf16.mxu0 %v8014_v18  ;;  %3626 = vmatprep.subr.bf16.mxu1 %v8016_v44 }
 0x7e1   :  { %3250 = vmatmul.mubr.bf16.gmra.mrb[52].mxu0 %v2989_v35  ;;  %3323 = vmatmul.mubr.bf16.gmra.mrb[52].mxu1 %v2989_v35 }
 0x7e2   :  { %3259 = vmatprep.mubr.bf16.mxu0 %v8667_v16  ;;  %3332 = vmatprep.mubr.bf16.mxu1 %v8667_v16 }
 0x7e3   :  { %3586 = vmatpush1.bf16.msra.mxu0 %v8018_v28  ;;  %3627 = vmatpush1.bf16.msra.mxu1 %v8020_v29 }
 0x7e4   :  { %3587 = vmatprep.subr.bf16.mxu0 %v8026_v56  ;;  %3628 = vmatprep.subr.bf16.mxu1 %v8028_v32 }
 0x7e7   :  { %3588 = vmatpush1.bf16.msra.mxu0 %v8030_v9  ;;  %3629 = vmatpush1.bf16.msra.mxu1 %v8032_v30 }
 0x7e8   :  { %3589 = vmatprep.subr.bf16.mxu0 %v8038_v48  ;;  %3630 = vmatprep.subr.bf16.mxu1 %v8040_v45 }
 0x7e9   :  { %3260 = vmatmul.mubr.bf16.gmra.mrb[56].mxu0 %v2990_v36  ;;  %3333 = vmatmul.mubr.bf16.gmra.mrb[56].mxu1 %v2990_v36 }
 0x7ea   :  { %3269 = vmatprep.mubr.bf16.mxu0 %v8667_v16  ;;  %3342 = vmatprep.mubr.bf16.mxu1 %v8667_v16 }
 0x7eb   :  { %3590 = vmatpush1.bf16.msra.mxu0 %v8042_v0  ;;  %3631 = vmatpush1.bf16.msra.mxu1 %v8044_v38 }
 0x7ec   :  { %3591 = vmatprep.subr.bf16.mxu0 %v8050_v46  ;;  %3632 = vmatprep.subr.bf16.mxu1 %v8052_v58 }
 0x7ef   :  { %3592 = vmatpush1.bf16.msra.mxu0 %v8054_v60  ;;  %3633 = vmatpush1.bf16.msra.mxu1 %v8056_v62 }
 0x7f0   :  { %3593 = vmatprep.subr.bf16.mxu0 %v8062_v1  ;;  %3634 = vmatprep.subr.bf16.mxu1 %v8064_v2 }
 0x7f3   :  { %3594 = vmatpush1.bf16.msra.mxu0 %v8066_v5  ;;  %3635 = vmatpush1.bf16.msra.mxu1 %v8068_v6 }
 0x7f4   :  { %3595 = vmatprep.subr.bf16.mxu0 %v8076_v8  ;;  %3636 = vmatprep.subr.bf16.mxu1 %v8080_v4 }
 0x7f7   :  { %3596 = vmatpush1.bf16.msra.mxu0 %v8074_v7  ;;  %3637 = vmatpush1.bf16.msra.mxu1 %v8078_v10 }
 0x7f8   :  { %3889 = vmatprep.subr.bf16.mxu0 %v7990_v20  ;;  %3930 = vmatprep.subr.bf16.mxu1 %v7992_v27 }
 0x88c   :  { %v2900_v14 = vpop.f32.mrb[44].mxu0  ;;  %v2941_v12 = vpop.f32.mrb[44].mxu1 }
 0x88d   :  { %v2948_v55 = vadd.f32 %v2900_v14, %v8685_v13  ;;  %v2950_v40 = vadd.f32 %v2941_v12, %v8686_v61  ;;  %v2902_v41 = vpop.f32.mrb[45].mxu0  ;;  %v2943_v43 = vpop.f32.mrb[45].mxu1 }
 0x88e   :  { %v2949_v47 = vadd.f32 %v2902_v41, %v8687_v11  ;;  %v2951_v51 = vadd.f32 %v2943_v43, %v8688_v49  ;;  %v2904_v39 = vpop.f32.mrb[46].mxu0  ;;  %v2945_v52 = vpop.f32.mrb[46].mxu1 }
 0x88f   :  { %v6211_v53 = vmul.f32 -1.442695, %v2948_v55  ;;  %v2905_v57 = vpop.f32.mrb[47].mxu0  ;;  %v2946_v19 = vpop.f32.mrb[47].mxu1 }
 0x890   :  { %v6212_v34 = vmul.f32 -1.442695, %v2949_v47  ;;  %v6213_v17 = vmul.f32 -1.442695, %v2951_v51 }
 0x891   :  { %6940 = vpow2.f32 %v6211_v53 }
 0x892   :  { %6942 = vpow2.f32 %v6212_v34 }
 0x893   :  { %6944 = vpow2.f32 %v6213_v17 }
 0x894   :  { %6946 = vtanh.f32 %v2950_v40 }
 0x89b   :  { %v6941_v3 = vpop.eup %6940 }
 0x89c   :  { %v6943_v22 = vpop.eup %6942  ;;  %v2955_v21 = vadd.f32 1.0, %v6941_v3 }
 0x89d   :  { %v2961_v23 = vadd.f32 1.0, %v6943_v22  ;;  %v6945_v25 = vpop.eup %6944 }
 0x89e   :  { %6948 = vrcp.f32 %v2955_v21  ;;  %v6947_v24 = vpop.eup %6946  ;;  %v2968_v36 = vadd.f32 1.0, %v6945_v25 }
 0x89f   :  { %6950 = vrcp.f32 %v2961_v23 }
 0x8a0   :  { %6952 = vrcp.f32 %v2968_v36  ;;  %v6214_v36 = vld [vmem:[%s8633_s5 + $0x4] sm:$0xf]  ;;  %s7280_s5 = smov [#allocation13]  }
 0x8a1   :  { %s5869_s27 = sshll.u32 %s7280_s5, 4  ;;  %s5870_s27 = int_to_ptr.vmem [resolvable:$true] %s5869_s27 }
 0x8a2   :  { %s7194_s9 = scalar_lea.vmem %s5870_s27, 256  ;;  %p7199_p13 = scmp.lt.s32.totalorder %s5870_s27, %s5870_s27 }
 0x8a3   :  { %p7195_p12 = scmp.ne.s32.totalorder %s5870_s27, %s7194_s9  ;;  %p7200_p0 = scmp.lt.s32.totalorder %s7194_s9, %s7194_s9 }
 0x8a5   :  { %p7201_p1 = por %p7200_p0, %p7199_p13 }
 0x8a7   :  { %p7202_p2 = pnand %p7201_p1, %p7195_p12 }
 0x8a8   :  { %v6949_v26 = vpop.eup %6948 }
 0x8a9   :  { %v6951_v15 = vpop.eup %6950  ;;  %v2972_v35 = vmul.f32 %v6949_v26, %v6947_v24 }
 0x8aa   :  { %v2971_v14 = vmul.f32 %v6951_v15, %v7972_v59  ;;  %v6953_v57 = vpop.eup %6952 }
 0x8ac   :  { %v2973_v12 = vadd.f32 %v2972_v35, %v2971_v14  ;;  %v8093_v13 = vpop.f32.mrb[48].mxu0  ;;  %v8095_v55 = vpop.f32.mrb[48].mxu1 }
 0x8ad   :  { %v8097_v61 = vpop.f32.mrb[49].mxu0  ;;  %v8099_v40 = vpop.f32.mrb[49].mxu1 }
 0x8ae   :  { %6954 = vtanh.f32 %v2973_v12  ;;  %2979 = vst [vmem:[#allocation15] sm:$0xff] %v2973_v12  ;;  %v8101_v41 = vpop.f32.mrb[50].mxu0  ;;  %v8103_v43 = vpop.f32.mrb[50].mxu1 }
 0x8af   :  { %v8105_v11 = vpop.f32.mrb[51].mxu0  ;;  %v8107_v47 = vpop.f32.mrb[51].mxu1 }
 0x8b4   :  { %v8109_v59 = vpop.f32.mrb[52].mxu0  ;;  %v8111_v49 = vpop.f32.mrb[52].mxu1 }
 0x8b5   :  { %8689 = vst [vmem:[#allocation22_spill] sm:$0xff] %v8111_v49  ;;  %v8113_v51 = vpop.f32.mrb[53].mxu0  ;;  %v8115_v39 = vpop.f32.mrb[53].mxu1 }
 0x8b6   :  { %8690 = vst [vmem:[#allocation23_spill] sm:$0xff] %v8113_v51  ;;  %8691 = vst [vmem:[#allocation24_spill] sm:$0xff] %v8115_v39  ;;  %v8117_v52 = vpop.f32.mrb[54].mxu0  ;;  %v8119_v53 = vpop.f32.mrb[54].mxu1 }
 0x8b7   :  { %8692 = vst [vmem:[#allocation25_spill] sm:$0xff] %v8117_v52  ;;  %8693 = vst [vmem:[#allocation26_spill] sm:$0xff] %v8119_v53  ;;  %v8121_v19 = vpop.f32.mrb[55].mxu0  ;;  %v8123_v34 = vpop.f32.mrb[55].mxu1 }
 0x8b8   :  { %8694 = vst [vmem:[#allocation27_spill] sm:$0xff] %v8121_v19  ;;  %8695 = vst [vmem:[#allocation28_spill] sm:$0xff] %v8123_v34  ;;  %v6955_v17 = vpop.eup %6954 }
 0x8b9   :  { %v2975_v3 = vmul.f32 %v6955_v17, %v6953_v57 }
 0x8bb   :  { %2978 = vst [vmem:[#allocation13] sm:$0xff] %v2975_v3  ;;  %v2991_v22 = vpack.c.bf16 %v2975_v3, %v7975_v63 }
 0x8bc   :  { %v8126_v21 = vpop.f32.mrb[56].mxu0  ;;  %v8128_v23 = vpop.f32.mrb[56].mxu1 }
 0x8bd   :  { %8696 = vst [vmem:[#allocation29_spill] sm:$0xff] %v8126_v21  ;;  %8697 = vst [vmem:[#allocation30_spill] sm:$0xff] %v8128_v23  ;;  %v8130_v25 = vpop.f32.mrb[57].mxu0  ;;  %v8132_v24 = vpop.f32.mrb[57].mxu1  ;;  %3270 = vmatmul.mubr.bf16.gmra.mrb[60].mxu0 %v2991_v22  ;;  %3343 = vmatmul.mubr.bf16.gmra.mrb[60].mxu1 %v2991_v22 }
 0x8be   :  { %8698 = vst [vmem:[#allocation31_spill] sm:$0xff] %v8130_v25  ;;  %8699 = vst [vmem:[#allocation32_spill] sm:$0xff] %v8132_v24  ;;  %v8134_v26 = vpop.f32.mrb[58].mxu0  ;;  %v8136_v15 = vpop.f32.mrb[58].mxu1  ;;  %3613 = vmatprep.mubr.bf16.mxu0 %v8667_v16  ;;  %3654 = vmatprep.mubr.bf16.mxu1 %v8667_v16 }
 0x8bf   :  { %8700 = vst [vmem:[#allocation33_spill] sm:$0xff] %v8134_v26  ;;  %8701 = vst [vmem:[#allocation34_spill] sm:$0xff] %v8136_v15  ;;  %v8140_v35 = vpop.f32.mrb[59].mxu0  ;;  %v8142_v63 = vpop.f32.mrb[59].mxu1 }
 0x8c0   :  { %8702 = vst [vmem:[#allocation35_spill] sm:$0xff] %v8140_v35  ;;  %8703 = vst [vmem:[#allocation36_spill] sm:$0xff] %v8142_v63  ;;  %v8710_v63 = vld [vmem:[#allocation21_spill] sm:$0xff] }
 0x8c1   :  { %v8711_v35 = vsub.s32 0, %v8710_v63  ;;  %v8712_v26 = vsub.s32 2, %v8710_v63 }
 0x8c3   :  { %v8197_v15 = vrot.slane %v6214_v36, %v8711_v35  ;;  %v8201_v24 = vrot.slane %v6214_v36, %v8712_v26 }
 0x8c5   :  { %3614 = vmatmul.mubr.bf16.vlgmr.msra.gmra.mrb[64].mxu0 %v8667_v16  ;;  %3655 = vmatmul.mubr.bf16.vlgmr.msra.gmra.mrb[64].mxu1 %v8667_v16  ;;  %v3242_v35 = vadd.f32 %v8093_v13, %v8197_v15 }
 0x8c6   :  { %3890 = vmatpush1.bf16.msra.mxu0 %v7994_v42  ;;  %3931 = vmatpush1.bf16.msra.mxu1 %v7996_v31 }
 0x8c7   :  { %3891 = vmatprep.subr.bf16.mxu0 %v8002_v50  ;;  %3932 = vmatprep.subr.bf16.mxu1 %v8004_v54 }
 0x8c8   :  { %3921 = vmatprep.mubr.bf16.mxu0 %v8667_v16  ;;  %3962 = vmatprep.mubr.bf16.mxu1 %v8667_v16 }
 0x8ca   :  { %3892 = vmatpush1.bf16.msra.mxu0 %v8006_v33  ;;  %3933 = vmatpush1.bf16.msra.mxu1 %v8008_v37 }
 0x8cb   :  { %3893 = vmatprep.subr.bf16.mxu0 %v8014_v18  ;;  %3934 = vmatprep.subr.bf16.mxu1 %v8016_v44 }
 0x8ce   :  { %3894 = vmatpush1.bf16.msra.mxu0 %v8018_v28  ;;  %3935 = vmatpush1.bf16.msra.mxu1 %v8020_v29 }
 0x8cf   :  { %3895 = vmatprep.subr.bf16.mxu0 %v8026_v56  ;;  %3936 = vmatprep.subr.bf16.mxu1 %v8028_v32 }
 0x8d2   :  { %3896 = vmatpush1.bf16.msra.mxu0 %v8030_v9  ;;  %3937 = vmatpush1.bf16.msra.mxu1 %v8032_v30 }
 0x8d3   :  { %3897 = vmatprep.subr.bf16.mxu0 %v8038_v48  ;;  %3938 = vmatprep.subr.bf16.mxu1 %v8040_v45 }
 0x8d6   :  { %3898 = vmatpush1.bf16.msra.mxu0 %v8042_v0  ;;  %3939 = vmatpush1.bf16.msra.mxu1 %v8044_v38 }
 0x8d7   :  { %3899 = vmatprep.subr.bf16.mxu0 %v8050_v46  ;;  %3940 = vmatprep.subr.bf16.mxu1 %v8052_v58 }
 0x8da   :  { %3900 = vmatpush1.bf16.msra.mxu0 %v8054_v60  ;;  %3941 = vmatpush1.bf16.msra.mxu1 %v8056_v62 }
 0x8db   :  { %3901 = vmatprep.subr.bf16.mxu0 %v8062_v1  ;;  %3942 = vmatprep.subr.bf16.mxu1 %v8064_v2 }
 0x8de   :  { %3902 = vmatpush1.bf16.msra.mxu0 %v8066_v5  ;;  %3943 = vmatpush1.bf16.msra.mxu1 %v8068_v6 }
 0x8df   :  { %3903 = vmatprep.subr.bf16.mxu0 %v8076_v8  ;;  %3944 = vmatprep.subr.bf16.mxu1 %v8080_v4 }
 0x8e2   :  { %3904 = vmatpush1.bf16.msra.mxu0 %v8074_v7  ;;  %3945 = vmatpush1.bf16.msra.mxu1 %v8078_v10 }
 0x8e3   :  { %4197 = vmatprep.subr.bf16.mxu0 %v7990_v20  ;;  %4238 = vmatprep.subr.bf16.mxu1 %v7992_v27 }
 0x990   :  { %v8183_v14 = vpop.f32.mrb[60].mxu0  ;;  %v8185_v12 = vpop.f32.mrb[60].mxu1 }
 0x991   :  { %8704 = vst [vmem:[#allocation37_spill] sm:$0xff] %v8183_v14  ;;  %8705 = vst [vmem:[#allocation38_spill] sm:$0xff] %v8185_v12  ;;  %v8187_v57 = vpop.f32.mrb[61].mxu0  ;;  %v8189_v17 = vpop.f32.mrb[61].mxu1 }
 0x992   :  { %8706 = vst [vmem:[#allocation39_spill] sm:$0xff] %v8187_v57  ;;  %8707 = vst [vmem:[#allocation40_spill] sm:$0xff] %v8189_v17  ;;  %v8191_v3 = vpop.f32.mrb[62].mxu0  ;;  %v8193_v22 = vpop.f32.mrb[62].mxu1  ;;  %v8715_v57 = vsub.s32 1, %v8710_v63 }
 0x993   :  { %8708 = vst [vmem:[#allocation41_spill] sm:$0xff] %v8191_v3  ;;  %8709 = vst [vmem:[#allocation42_spill] sm:$0xff] %v8193_v22  ;;  %v8203_v25 = vpop.f32.mrb[63].mxu0  ;;  %v8205_v14 = vpop.f32.mrb[63].mxu1  ;;  %v8716_v3 = vsub.s32 3, %v8710_v63  ;;  %v3315_v22 = vadd.f32 %v8095_v55, %v8201_v24 }
 0x994   :  { %8713 = vst [vmem:[#allocation21_spill] sm:$0xff] %v8203_v25  ;;  %8714 = vst [vmem:[#allocation43_spill] sm:$0xff] %v8205_v14  ;;  %v8209_v12 = vrot.slane %v6214_v36, %v8715_v57 }
 0x995   :  { %v8213_v17 = vrot.slane %v6214_v36, %v8716_v3 }
 0x996   :  { %v3244_v26 = vadd.f32 %v8097_v61, %v8209_v12 }
 0x997   :  { %v3317_v14 = vadd.f32 %v8099_v40, %v8213_v17 }
 0x998   :  { %v3615_v25 = vpop.f32.mrb[64].mxu0  ;;  %v3656_v23 = vpop.f32.mrb[64].mxu1 }
 0x999   :  { %v3663_v57 = vadd.f32 %v3615_v25, %v3242_v35  ;;  %v3665_v21 = vadd.f32 %v3656_v23, %v3315_v22  ;;  %v3617_v34 = vpop.f32.mrb[65].mxu0  ;;  %v3658_v63 = vpop.f32.mrb[65].mxu1 }
 0x99a   :  { %v3664_v36 = vadd.f32 %v3617_v34, %v3244_v26  ;;  %v3666_v3 = vadd.f32 %v3658_v63, %v3317_v14  ;;  %v3619_v19 = vpop.f32.mrb[66].mxu0  ;;  %v3660_v53 = vpop.f32.mrb[66].mxu1  ;;  %v3248_v63 = vadd.f32 %v8105_v11, %v8209_v12 }
 0x99b   :  { %v6279_v13 = vmul.f32 -1.442695, %v3663_v57  ;;  %v3620_v52 = vpop.f32.mrb[67].mxu0  ;;  %v3661_v39 = vpop.f32.mrb[67].mxu1  ;;  %v3319_v57 = vadd.f32 %v8103_v43, %v8201_v24 }
 0x99c   :  { %v6280_v55 = vmul.f32 -1.442695, %v3664_v36  ;;  %v6281_v61 = vmul.f32 -1.442695, %v3666_v3  ;;  %v3321_v36 = vadd.f32 %v8107_v47, %v8213_v17 }
 0x99d   :  { %6956 = vpow2.f32 %v6279_v13 }
 0x99e   :  { %6958 = vpow2.f32 %v6280_v55 }
 0x99f   :  { %6960 = vpow2.f32 %v6281_v61 }
 0x9a0   :  { %6962 = vtanh.f32 %v3665_v21 }
 0x9a7   :  { %v6957_v51 = vpop.eup %6956 }
 0x9a8   :  { %v6959_v49 = vpop.eup %6958  ;;  %v3670_v40 = vadd.f32 1.0, %v6957_v51 }
 0x9a9   :  { %v3676_v25 = vadd.f32 1.0, %v6959_v49  ;;  %v6961_v23 = vpop.eup %6960  ;;  %v3246_v49 = vadd.f32 %v8101_v41, %v8197_v15 }
 0x9aa   :  { %6964 = vrcp.f32 %v3670_v40  ;;  %v6963_v34 = vpop.eup %6962  ;;  %v3683_v22 = vadd.f32 1.0, %v6961_v23 }
 0x9ab   :  { %6966 = vrcp.f32 %v3676_v25 }
 0x9ac   :  { %6968 = vrcp.f32 %v3683_v22 }
 0x9b4   :  { %v6965_v14 = vpop.eup %6964 }
 0x9b5   :  { %v6967_v19 = vpop.eup %6966  ;;  %v3687_v53 = vmul.f32 %v6965_v14, %v6963_v34 }
 0x9b6   :  { %v3686_v52 = vmul.f32 0.0, %v6967_v19  ;;  %v6969_v35 = vpop.eup %6968 }
 0x9b8   :  { %v8223_v39 = vadd.f32 %v3687_v53, %v3686_v52 }
 0x9ba   :  { %6970 = vtanh.f32 %v8223_v39 }
 0x9c4   :  { %v6971_v26 = vpop.eup %6970 }
 0x9c5   :  { %v3690_v51 = vmul.f32 %v6971_v26, %v6969_v35 }
 0x9c7   :  { %3691 = vst [vmem:[#allocation12] sm:$0xff] %v3690_v51  ;;  %v3696_v21 = vpack.c.bf16 %v3690_v51, %v3690_v51 }
 0x9c9   :  { %3922 = vmatmul.mubr.bf16.vlgmr.msra.gmra.mrb[68].mxu0 %v3696_v21  ;;  %3963 = vmatmul.mubr.bf16.vlgmr.msra.gmra.mrb[68].mxu1 %v3696_v21 }
 0x9ca   :  { %4198 = vmatpush1.bf16.msra.mxu0 %v7994_v42  ;;  %4239 = vmatpush1.bf16.msra.mxu1 %v7996_v31 }
 0x9cb   :  { %4199 = vmatprep.subr.bf16.mxu0 %v8002_v50  ;;  %4240 = vmatprep.subr.bf16.mxu1 %v8004_v54 }
 0x9cc   :  { %4229 = vmatprep.mubr.bf16.mxu0 %v8667_v16  ;;  %4270 = vmatprep.mubr.bf16.mxu1 %v8667_v16 }
 0x9ce   :  { %4200 = vmatpush1.bf16.msra.mxu0 %v8006_v33  ;;  %4241 = vmatpush1.bf16.msra.mxu1 %v8008_v37 }
 0x9cf   :  { %4201 = vmatprep.subr.bf16.mxu0 %v8014_v18  ;;  %4242 = vmatprep.subr.bf16.mxu1 %v8016_v44 }
 0x9d2   :  { %4202 = vmatpush1.bf16.msra.mxu0 %v8018_v28  ;;  %4243 = vmatpush1.bf16.msra.mxu1 %v8020_v29 }
 0x9d3   :  { %4203 = vmatprep.subr.bf16.mxu0 %v8026_v56  ;;  %4244 = vmatprep.subr.bf16.mxu1 %v8028_v32 }
 0x9d6   :  { %4204 = vmatpush1.bf16.msra.mxu0 %v8030_v9  ;;  %4245 = vmatpush1.bf16.msra.mxu1 %v8032_v30 }
 0x9d7   :  { %4205 = vmatprep.subr.bf16.mxu0 %v8038_v48  ;;  %4246 = vmatprep.subr.bf16.mxu1 %v8040_v45 }
 0x9da   :  { %4206 = vmatpush1.bf16.msra.mxu0 %v8042_v0  ;;  %4247 = vmatpush1.bf16.msra.mxu1 %v8044_v38 }
 0x9db   :  { %4207 = vmatprep.subr.bf16.mxu0 %v8050_v46  ;;  %4248 = vmatprep.subr.bf16.mxu1 %v8052_v58 }
 0x9de   :  { %4208 = vmatpush1.bf16.msra.mxu0 %v8054_v60  ;;  %4249 = vmatpush1.bf16.msra.mxu1 %v8056_v62 }
 0x9df   :  { %4209 = vmatprep.subr.bf16.mxu0 %v8062_v1  ;;  %4250 = vmatprep.subr.bf16.mxu1 %v8064_v2 }
 0x9e2   :  { %4210 = vmatpush1.bf16.msra.mxu0 %v8066_v5  ;;  %4251 = vmatpush1.bf16.msra.mxu1 %v8068_v6 }
 0x9e3   :  { %4211 = vmatprep.subr.bf16.mxu0 %v8076_v8  ;;  %4252 = vmatprep.subr.bf16.mxu1 %v8080_v4 }
 0x9e6   :  { %4212 = vmatpush1.bf16.msra.mxu0 %v8074_v7  ;;  %4253 = vmatpush1.bf16.msra.mxu1 %v8078_v10 }
 0x9e7   :  { %4505 = vmatprep.subr.bf16.mxu0 %v7990_v20  ;;  %4546 = vmatprep.subr.bf16.mxu1 %v7992_v27 }
 0xa9c   :  { %v3923_v3 = vpop.f32.mrb[68].mxu0  ;;  %v3964_v13 = vpop.f32.mrb[68].mxu1 }
 0xa9d   :  { %v3971_v55 = vadd.f32 %v3923_v3, %v3246_v49  ;;  %v3973_v61 = vadd.f32 %v3964_v13, %v3319_v57  ;;  %v3925_v40 = vpop.f32.mrb[69].mxu0  ;;  %v3966_v20 = vpop.f32.mrb[69].mxu1 }
 0xa9e   :  { %v3972_v25 = vadd.f32 %v3925_v40, %v3248_v63  ;;  %v3974_v27 = vadd.f32 %v3966_v20, %v3321_v36  ;;  %v3927_v23 = vpop.f32.mrb[70].mxu0  ;;  %v3968_v34 = vpop.f32.mrb[70].mxu1 }
 0xa9f   :  { %v6314_v41 = vmul.f32 -1.442695, %v3971_v55  ;;  %v3928_v14 = vpop.f32.mrb[71].mxu0  ;;  %v3969_v19 = vpop.f32.mrb[71].mxu1 }
 0xaa0   :  { %v6315_v43 = vmul.f32 -1.442695, %v3972_v25  ;;  %v6316_v11 = vmul.f32 -1.442695, %v3974_v27  ;;  %v8320_v14 = vld [vmem:[#allocation11 + $0xc] ss:$16 sps:$4 sm:$0xff]  }
 0xaa1   :  { %6972 = vpow2.f32 %v6314_v41  ;;  %v8318_v41 = vld [vmem:[#allocation11 + $0x4] ss:$16 sps:$4 sm:$0xff]   ;;  %v8322_v19 = vld [vmem:[#allocation11] ss:$16 sps:$4 sm:$0xff]  }
 0xaa2   :  { %6974 = vpow2.f32 %v6315_v43  ;;  %v8324_v43 = vld [vmem:[#allocation11 + $0x8] ss:$16 sps:$4 sm:$0xff]  }
 0xaa3   :  { %6976 = vpow2.f32 %v6316_v11  ;;  %v8330_v11 = vld [vmem:[#allocation11 + $0x24] ss:$16 sps:$4 sm:$0xff]  }
 0xaa4   :  { %6978 = vtanh.f32 %v3973_v61 }
 0xaab   :  { %v6973_v53 = vpop.eup %6972 }
 0xaac   :  { %v6975_v22 = vpop.eup %6974  ;;  %v3978_v47 = vadd.f32 1.0, %v6973_v53  ;;  %v8332_v53 = vld [vmem:[#allocation11 + $0x2c] ss:$16 sps:$4 sm:$0xff]  }
 0xaad   :  { %v3984_v52 = vadd.f32 1.0, %v6975_v22  ;;  %v6977_v35 = vpop.eup %6976  ;;  %v8334_v22 = vld [vmem:[#allocation11 + $0x20] ss:$16 sps:$4 sm:$0xff]  }
 0xaae   :  { %6980 = vrcp.f32 %v3978_v47  ;;  %v6979_v26 = vpop.eup %6978  ;;  %v3991_v57 = vadd.f32 1.0, %v6977_v35  ;;  %v8336_v47 = vld [vmem:[#allocation11 + $0x28] ss:$16 sps:$4 sm:$0xff]   ;;  %v8344_v35 = vld [vmem:[#allocation11 + $0x4c] ss:$16 sps:$4 sm:$0xff]  }
 0xaaf   :  { %6982 = vrcp.f32 %v3984_v52  ;;  %v8342_v52 = vld [vmem:[#allocation11 + $0x44] ss:$16 sps:$4 sm:$0xff]  }
 0xab0   :  { %6984 = vrcp.f32 %v3991_v57  ;;  %v8358_v57 = vld [vmem:[#allocation11 + $0x60] ss:$16 sps:$4 sm:$0xff]  }
 0xab8   :  { %v6981_v51 = vpop.eup %6980 }
 0xab9   :  { %v6983_v21 = vpop.eup %6982  ;;  %v3995_v49 = vmul.f32 %v6981_v51, %v6979_v26  ;;  %v8346_v26 = vld [vmem:[#allocation11 + $0x40] ss:$16 sps:$4 sm:$0xff]   ;;  %v8348_v51 = vld [vmem:[#allocation11 + $0x48] ss:$16 sps:$4 sm:$0xff]  }
 0xaba   :  { %v3994_v63 = vmul.f32 %v6983_v21, %v8223_v39  ;;  %v6985_v3 = vpop.eup %6984  ;;  %v8354_v21 = vld [vmem:[#allocation11 + $0x64] ss:$16 sps:$4 sm:$0xff]  }
 0xabc   :  { %v8269_v36 = vadd.f32 %v3995_v49, %v3994_v63  ;;  %v8356_v49 = vld [vmem:[#allocation11 + $0x6c] ss:$16 sps:$4 sm:$0xff]   ;;  %v8360_v63 = vld [vmem:[#allocation11 + $0x68] ss:$16 sps:$4 sm:$0xff]  }
 0xabe   :  { %6986 = vtanh.f32 %v8269_v36 }
 0xac8   :  { %v6987_v13 = vpop.eup %6986 }
 0xac9   :  { %v3998_v55 = vmul.f32 %v6987_v13, %v6985_v3  ;;  %v8368_v3 = vld [vmem:[#allocation11 + $0x8c] ss:$16 sps:$4 sm:$0xff]   ;;  %v8370_v13 = vld [vmem:[#allocation11 + $0x80] ss:$16 sps:$4 sm:$0xff]  }
 0xacb   :  { %3999 = vst [vmem:[#allocation12 + $0x8] sm:$0xff] %v3998_v55  ;;  %v4004_v61 = vpack.c.bf16 %v3998_v55, %v3998_v55  ;;  %v8372_v55 = vld [vmem:[#allocation11 + $0x88] ss:$16 sps:$4 sm:$0xff]  }
 0xacd   :  { %4230 = vmatmul.mubr.bf16.vlgmr.msra.gmra.mrb[72].mxu0 %v4004_v61  ;;  %4271 = vmatmul.mubr.bf16.vlgmr.msra.gmra.mrb[72].mxu1 %v4004_v61  ;;  %v8376_v61 = vld [vmem:[#allocation11 + $0xa4] ss:$16 sps:$4 sm:$0xff]  }
 0xace   :  { %4506 = vmatpush1.bf16.msra.mxu0 %v7994_v42  ;;  %4547 = vmatpush1.bf16.msra.mxu1 %v7996_v31  ;;  %v3252_v42 = vadd.f32 %v8109_v59, %v8197_v15  ;;  %v8717_v31 = vld [vmem:[#allocation22_spill] sm:$0xff] }
 0xacf   :  { %4507 = vmatprep.subr.bf16.mxu0 %v8002_v50  ;;  %4548 = vmatprep.subr.bf16.mxu1 %v8004_v54  ;;  %v3325_v50 = vadd.f32 %v8717_v31, %v8201_v24  ;;  %v8718_v54 = vld [vmem:[#allocation23_spill] sm:$0xff]  ;;  %v8382_v31 = vld [vmem:[#allocation11 + $0xa8] ss:$16 sps:$4 sm:$0xff]  }
 0xad0   :  { %4537 = vmatprep.mubr.bf16.mxu0 %v8667_v16  ;;  %4578 = vmatprep.mubr.bf16.mxu1 %v8667_v16 }
 0xad2   :  { %4508 = vmatpush1.bf16.msra.mxu0 %v8006_v33  ;;  %4549 = vmatpush1.bf16.msra.mxu1 %v8008_v37  ;;  %v3254_v33 = vadd.f32 %v8718_v54, %v8209_v12  ;;  %v8719_v37 = vld [vmem:[#allocation24_spill] sm:$0xff]  ;;  %v8387_v54 = vld [vmem:[#allocation11 + $0xc4] ss:$16 sps:$4 sm:$0xff]  }
 0xad3   :  { %4509 = vmatprep.subr.bf16.mxu0 %v8014_v18  ;;  %4550 = vmatprep.subr.bf16.mxu1 %v8016_v44  ;;  %v3327_v18 = vadd.f32 %v8719_v37, %v8213_v17  ;;  %v8394_v37 = vld [vmem:[#allocation11 + $0xc0] ss:$16 sps:$4 sm:$0xff]  }
 0xad6   :  { %4510 = vmatpush1.bf16.msra.mxu0 %v8018_v28  ;;  %4551 = vmatpush1.bf16.msra.mxu1 %v8020_v29 }
 0xad7   :  { %4511 = vmatprep.subr.bf16.mxu0 %v8026_v56  ;;  %4552 = vmatprep.subr.bf16.mxu1 %v8028_v32 }
 0xada   :  { %4512 = vmatpush1.bf16.msra.mxu0 %v8030_v9  ;;  %4553 = vmatpush1.bf16.msra.mxu1 %v8032_v30 }
 0xadb   :  { %4513 = vmatprep.subr.bf16.mxu0 %v8038_v48  ;;  %4554 = vmatprep.subr.bf16.mxu1 %v8040_v45 }
 0xade   :  { %4514 = vmatpush1.bf16.msra.mxu0 %v8042_v0  ;;  %4555 = vmatpush1.bf16.msra.mxu1 %v8044_v38 }
 0xadf   :  { %4515 = vmatprep.subr.bf16.mxu0 %v8050_v46  ;;  %4556 = vmatprep.subr.bf16.mxu1 %v8052_v58 }
 0xae2   :  { %4516 = vmatpush1.bf16.msra.mxu0 %v8054_v60  ;;  %4557 = vmatpush1.bf16.msra.mxu1 %v8056_v62 }
 0xae3   :  { %4517 = vmatprep.subr.bf16.mxu0 %v8062_v1  ;;  %4558 = vmatprep.subr.bf16.mxu1 %v8064_v2 }
 0xae6   :  { %4518 = vmatpush1.bf16.msra.mxu0 %v8066_v5  ;;  %4559 = vmatpush1.bf16.msra.mxu1 %v8068_v6 }
 0xae7   :  { %4519 = vmatprep.subr.bf16.mxu0 %v8076_v8  ;;  %4560 = vmatprep.subr.bf16.mxu1 %v8080_v4 }
 0xaea   :  { %4520 = vmatpush1.bf16.msra.mxu0 %v8074_v7  ;;  %4561 = vmatpush1.bf16.msra.mxu1 %v8078_v10 }
 0xaeb   :  { %4813 = vmatprep.subr.bf16.mxu0 %v8318_v41  ;;  %4854 = vmatprep.subr.bf16.mxu1 %v8320_v14 }
 0xba0   :  { %v4231_v44 = vpop.f32.mrb[72].mxu0  ;;  %v4272_v28 = vpop.f32.mrb[72].mxu1 }
 0xba1   :  { %v4279_v29 = vadd.f32 %v4231_v44, %v3252_v42  ;;  %v4281_v56 = vadd.f32 %v4272_v28, %v3325_v50  ;;  %v4233_v32 = vpop.f32.mrb[73].mxu0  ;;  %v4274_v9 = vpop.f32.mrb[73].mxu1  ;;  %v8380_v42 = vld [vmem:[#allocation11 + $0xa0] ss:$16 sps:$4 sm:$0xff]   ;;  %v8384_v50 = vld [vmem:[#allocation11 + $0xac] ss:$16 sps:$4 sm:$0xff]  }
 0xba2   :  { %v4280_v30 = vadd.f32 %v4233_v32, %v3254_v33  ;;  %v4282_v48 = vadd.f32 %v4274_v9, %v3327_v18  ;;  %v4235_v45 = vpop.f32.mrb[74].mxu0  ;;  %v4276_v0 = vpop.f32.mrb[74].mxu1  ;;  %v8389_v33 = vld [vmem:[#allocation11 + $0xcc] ss:$16 sps:$4 sm:$0xff]   ;;  %v8396_v18 = vld [vmem:[#allocation11 + $0xc8] ss:$16 sps:$4 sm:$0xff]  }
 0xba3   :  { %v6349_v38 = vmul.f32 -1.442695, %v4279_v29  ;;  %v4236_v46 = vpop.f32.mrb[75].mxu0  ;;  %v4277_v58 = vpop.f32.mrb[75].mxu1  ;;  %v8400_v44 = vld [vmem:[#allocation11 + $0xe4] ss:$16 sps:$4 sm:$0xff]  }
 0xba4   :  { %v6350_v60 = vmul.f32 -1.442695, %v4280_v30  ;;  %v6351_v62 = vmul.f32 -1.442695, %v4282_v48  ;;  %v8402_v28 = vld [vmem:[#allocation11 + $0xec] ss:$16 sps:$4 sm:$0xff]  }
 0xba5   :  { %6988 = vpow2.f32 %v6349_v38  ;;  %v8406_v29 = vld [vmem:[#allocation11 + $0xe0] ss:$16 sps:$4 sm:$0xff]   ;;  %v8721_v30 = vld [vmem:[#allocation26_spill] sm:$0xff]  ;;  %v8723_v38 = vld [vmem:[#allocation28_spill] sm:$0xff] }
 0xba6   :  { %6990 = vpow2.f32 %v6350_v60  ;;  %v8720_v32 = vld [vmem:[#allocation25_spill] sm:$0xff]  ;;  %v3329_v48 = vadd.f32 %v8721_v30, %v8201_v24  ;;  %v8722_v45 = vld [vmem:[#allocation27_spill] sm:$0xff]  ;;  %v3331_v46 = vadd.f32 %v8723_v38, %v8213_v17 }
 0xba7   :  { %6992 = vpow2.f32 %v6351_v62  ;;  %v3256_v9 = vadd.f32 %v8720_v32, %v8197_v15  ;;  %v3258_v0 = vadd.f32 %v8722_v45, %v8209_v12 }
 0xba8   :  { %6994 = vtanh.f32 %v4281_v56  ;;  %v8408_v56 = vld [vmem:[#allocation11 + $0xe8] ss:$16 sps:$4 sm:$0xff]  }
 0xbaf   :  { %v6989_v1 = vpop.eup %6988 }
 0xbb0   :  { %v6991_v2 = vpop.eup %6990  ;;  %v4286_v5 = vadd.f32 1.0, %v6989_v1 }
 0xbb1   :  { %v4292_v6 = vadd.f32 1.0, %v6991_v2  ;;  %v6993_v7 = vpop.eup %6992 }
 0xbb2   :  { %6996 = vrcp.f32 %v4286_v5  ;;  %v6995_v8 = vpop.eup %6994  ;;  %v4299_v39 = vadd.f32 1.0, %v6993_v7 }
 0xbb3   :  { %6998 = vrcp.f32 %v4292_v6 }
 0xbb4   :  { %7000 = vrcp.f32 %v4299_v39 }
 0xbbc   :  { %v6997_v10 = vpop.eup %6996 }
 0xbbd   :  { %v6999_v4 = vpop.eup %6998  ;;  %v4303_v59 = vmul.f32 %v6997_v10, %v6995_v8 }
 0xbbe   :  { %v4302_v40 = vmul.f32 %v6999_v4, %v8269_v36  ;;  %v7001_v25 = vpop.eup %7000  ;;  %v8366_v36 = vld [vmem:[#allocation11 + $0x84] ss:$16 sps:$4 sm:$0xff]  }
 0xbc0   :  { %v8313_v20 = vadd.f32 %v4303_v59, %v4302_v40 }
 0xbc2   :  { %7002 = vtanh.f32 %v8313_v20 }
 0xbcc   :  { %v7003_v27 = vpop.eup %7002 }
 0xbcd   :  { %v4306_v23 = vmul.f32 %v7003_v27, %v7001_v25 }
 0xbcf   :  { %4307 = vst [vmem:[#allocation12 + $0x10] sm:$0xff] %v4306_v23  ;;  %v4312_v34 = vpack.c.bf16 %v4306_v23, %v4306_v23 }
 0xbd1   :  { %4538 = vmatmul.mubr.bf16.vlgmr.msra.gmra.mrb[76].mxu0 %v4312_v34  ;;  %4579 = vmatmul.mubr.bf16.vlgmr.msra.gmra.mrb[76].mxu1 %v4312_v34 }
 0xbd2   :  { %4845 = vmatprep.mubr.bf16.mxu0 %v8667_v16  ;;  %4886 = vmatprep.mubr.bf16.mxu1 %v8667_v16 }
 0xbd3   :  { %4814 = vmatpush1.bf16.msra.mxu0 %v8322_v19  ;;  %4855 = vmatpush1.bf16.msra.mxu1 %v8324_v43 }
 0xbd4   :  { %4815 = vmatprep.subr.bf16.mxu0 %v8330_v11  ;;  %4856 = vmatprep.subr.bf16.mxu1 %v8332_v53 }
 0xbd7   :  { %4816 = vmatpush1.bf16.msra.mxu0 %v8334_v22  ;;  %4857 = vmatpush1.bf16.msra.mxu1 %v8336_v47 }
 0xbd8   :  { %4817 = vmatprep.subr.bf16.mxu0 %v8342_v52  ;;  %4858 = vmatprep.subr.bf16.mxu1 %v8344_v35 }
 0xbdb   :  { %4818 = vmatpush1.bf16.msra.mxu0 %v8346_v26  ;;  %4859 = vmatpush1.bf16.msra.mxu1 %v8348_v51 }
 0xbdc   :  { %4819 = vmatprep.subr.bf16.mxu0 %v8354_v21  ;;  %4860 = vmatprep.subr.bf16.mxu1 %v8356_v49 }
 0xbdf   :  { %4820 = vmatpush1.bf16.msra.mxu0 %v8358_v57  ;;  %4861 = vmatpush1.bf16.msra.mxu1 %v8360_v63 }
 0xbe0   :  { %4821 = vmatprep.subr.bf16.mxu0 %v8366_v36  ;;  %4862 = vmatprep.subr.bf16.mxu1 %v8368_v3 }
 0xbe3   :  { %4822 = vmatpush1.bf16.msra.mxu0 %v8370_v13  ;;  %4863 = vmatpush1.bf16.msra.mxu1 %v8372_v55 }
 0xbe4   :  { %4823 = vmatprep.subr.bf16.mxu0 %v8376_v61  ;;  %4864 = vmatprep.subr.bf16.mxu1 %v8384_v50 }
 0xbe7   :  { %4824 = vmatpush1.bf16.msra.mxu0 %v8380_v42  ;;  %4865 = vmatpush1.bf16.msra.mxu1 %v8382_v31 }
 0xbe8   :  { %4825 = vmatprep.subr.bf16.mxu0 %v8387_v54  ;;  %4866 = vmatprep.subr.bf16.mxu1 %v8389_v33 }
 0xbeb   :  { %4826 = vmatpush1.bf16.msra.mxu0 %v8394_v37  ;;  %4867 = vmatpush1.bf16.msra.mxu1 %v8396_v18 }
 0xbec   :  { %4827 = vmatprep.subr.bf16.mxu0 %v8400_v44  ;;  %4868 = vmatprep.subr.bf16.mxu1 %v8402_v28 }
 0xbef   :  { %4828 = vmatpush1.bf16.msra.mxu0 %v8406_v29  ;;  %4869 = vmatpush1.bf16.msra.mxu1 %v8408_v56 }
 0xbf0   :  { %5121 = vmatprep.subr.bf16.mxu0 %v8318_v41  ;;  %5162 = vmatprep.subr.bf16.mxu1 %v8320_v14 }
 0xca4   :  { %v4539_v58 = vpop.f32.mrb[76].mxu0  ;;  %v4580_v60 = vpop.f32.mrb[76].mxu1 }
 0xca5   :  { %v4587_v62 = vadd.f32 %v4539_v58, %v3256_v9  ;;  %v4589_v1 = vadd.f32 %v4580_v60, %v3329_v48  ;;  %v4541_v2 = vpop.f32.mrb[77].mxu0  ;;  %v4582_v5 = vpop.f32.mrb[77].mxu1 }
 0xca6   :  { %v4588_v6 = vadd.f32 %v4541_v2, %v3258_v0  ;;  %v4590_v7 = vadd.f32 %v4582_v5, %v3331_v46  ;;  %v4543_v8 = vpop.f32.mrb[78].mxu0  ;;  %v4584_v10 = vpop.f32.mrb[78].mxu1 }
 0xca7   :  { %v6384_v4 = vmul.f32 -1.442695, %v4587_v62  ;;  %v4544_v59 = vpop.f32.mrb[79].mxu0  ;;  %v4585_v39 = vpop.f32.mrb[79].mxu1  ;;  %v8726_v8 = vld [vmem:[#allocation31_spill] sm:$0xff] }
 0xca8   :  { %v6385_v40 = vmul.f32 -1.442695, %v4588_v6  ;;  %v6386_v25 = vmul.f32 -1.442695, %v4590_v7  ;;  %v8725_v6 = vld [vmem:[#allocation30_spill] sm:$0xff]  ;;  %v3264_v10 = vadd.f32 %v8726_v8, %v8209_v12 }
 0xca9   :  { %7004 = vpow2.f32 %v6384_v4  ;;  %v3335_v7 = vadd.f32 %v8725_v6, %v8201_v24  ;;  %v8727_v4 = vld [vmem:[#allocation32_spill] sm:$0xff] }
 0xcaa   :  { %7006 = vpow2.f32 %v6385_v40  ;;  %v3337_v59 = vadd.f32 %v8727_v4, %v8213_v17 }
 0xcab   :  { %7008 = vpow2.f32 %v6386_v25 }
 0xcac   :  { %7010 = vtanh.f32 %v4589_v1 }
 0xcb3   :  { %v7005_v27 = vpop.eup %7004 }
 0xcb4   :  { %v7007_v23 = vpop.eup %7006  ;;  %v4594_v34 = vadd.f32 1.0, %v7005_v27 }
 0xcb5   :  { %v4600_v32 = vadd.f32 1.0, %v7007_v23  ;;  %v7009_v9 = vpop.eup %7008 }
 0xcb6   :  { %7012 = vrcp.f32 %v4594_v34  ;;  %v7011_v30 = vpop.eup %7010  ;;  %v4607_v38 = vadd.f32 1.0, %v7009_v9 }
 0xcb7   :  { %7014 = vrcp.f32 %v4600_v32 }
 0xcb8   :  { %7016 = vrcp.f32 %v4607_v38 }
 0xcc0   :  { %v7013_v48 = vpop.eup %7012 }
 0xcc1   :  { %v7015_v45 = vpop.eup %7014  ;;  %v4611_v0 = vmul.f32 %v7013_v48, %v7011_v30 }
 0xcc2   :  { %v4610_v46 = vmul.f32 %v7015_v45, %v8313_v20  ;;  %v7017_v60 = vpop.eup %7016  ;;  %v8724_v20 = vld [vmem:[#allocation29_spill] sm:$0xff] }
 0xcc3   :  { %v3262_v5 = vadd.f32 %v8724_v20, %v8197_v15 }
 0xcc4   :  { %v8425_v58 = vadd.f32 %v4611_v0, %v4610_v46 }
 0xcc6   :  { %7018 = vtanh.f32 %v8425_v58 }
 0xcd0   :  { %v7019_v62 = vpop.eup %7018 }
 0xcd1   :  { %v4614_v2 = vmul.f32 %v7019_v62, %v7017_v60 }
 0xcd3   :  { %4615 = vst [vmem:[#allocation12 + $0x18] sm:$0xff] %v4614_v2  ;;  %v4620_v1 = vpack.c.bf16 %v4614_v2, %v4614_v2 }
 0xcd5   :  { %4846 = vmatmul.mubr.bf16.vlgmr.msra.gmra.mrb[80].mxu0 %v4620_v1  ;;  %4887 = vmatmul.mubr.bf16.vlgmr.msra.gmra.mrb[80].mxu1 %v4620_v1 }
 0xcd6   :  { %5122 = vmatpush1.bf16.msra.mxu0 %v8322_v19  ;;  %5163 = vmatpush1.bf16.msra.mxu1 %v8324_v43 }
 0xcd7   :  { %5123 = vmatprep.subr.bf16.mxu0 %v8330_v11  ;;  %5164 = vmatprep.subr.bf16.mxu1 %v8332_v53 }
 0xcd8   :  { %5153 = vmatprep.mubr.bf16.mxu0 %v8667_v16  ;;  %5194 = vmatprep.mubr.bf16.mxu1 %v8667_v16 }
 0xcda   :  { %5124 = vmatpush1.bf16.msra.mxu0 %v8334_v22  ;;  %5165 = vmatpush1.bf16.msra.mxu1 %v8336_v47 }
 0xcdb   :  { %5125 = vmatprep.subr.bf16.mxu0 %v8342_v52  ;;  %5166 = vmatprep.subr.bf16.mxu1 %v8344_v35 }
 0xcde   :  { %5126 = vmatpush1.bf16.msra.mxu0 %v8346_v26  ;;  %5167 = vmatpush1.bf16.msra.mxu1 %v8348_v51 }
 0xcdf   :  { %5127 = vmatprep.subr.bf16.mxu0 %v8354_v21  ;;  %5168 = vmatprep.subr.bf16.mxu1 %v8356_v49 }
 0xce2   :  { %5128 = vmatpush1.bf16.msra.mxu0 %v8358_v57  ;;  %5169 = vmatpush1.bf16.msra.mxu1 %v8360_v63 }
 0xce3   :  { %5129 = vmatprep.subr.bf16.mxu0 %v8366_v36  ;;  %5170 = vmatprep.subr.bf16.mxu1 %v8368_v3 }
 0xce6   :  { %5130 = vmatpush1.bf16.msra.mxu0 %v8370_v13  ;;  %5171 = vmatpush1.bf16.msra.mxu1 %v8372_v55 }
 0xce7   :  { %5131 = vmatprep.subr.bf16.mxu0 %v8376_v61  ;;  %5172 = vmatprep.subr.bf16.mxu1 %v8384_v50 }
 0xcea   :  { %5132 = vmatpush1.bf16.msra.mxu0 %v8380_v42  ;;  %5173 = vmatpush1.bf16.msra.mxu1 %v8382_v31 }
 0xceb   :  { %5133 = vmatprep.subr.bf16.mxu0 %v8387_v54  ;;  %5174 = vmatprep.subr.bf16.mxu1 %v8389_v33 }
 0xcee   :  { %5134 = vmatpush1.bf16.msra.mxu0 %v8394_v37  ;;  %5175 = vmatpush1.bf16.msra.mxu1 %v8396_v18 }
 0xcef   :  { %5135 = vmatprep.subr.bf16.mxu0 %v8400_v44  ;;  %5176 = vmatprep.subr.bf16.mxu1 %v8402_v28 }
 0xcf2   :  { %5136 = vmatpush1.bf16.msra.mxu0 %v8406_v29  ;;  %5177 = vmatpush1.bf16.msra.mxu1 %v8408_v56 }
 0xcf3   :  { %5429 = vmatprep.subr.bf16.mxu0 %v8318_v41  ;;  %5470 = vmatprep.subr.bf16.mxu1 %v8320_v14 }
 0xda8   :  { %v4847_v39 = vpop.f32.mrb[80].mxu0  ;;  %v4888_v40 = vpop.f32.mrb[80].mxu1 }
 0xda9   :  { %v4895_v25 = vadd.f32 %v4847_v39, %v3262_v5  ;;  %v4897_v27 = vadd.f32 %v4888_v40, %v3335_v7  ;;  %v4849_v23 = vpop.f32.mrb[81].mxu0  ;;  %v4890_v34 = vpop.f32.mrb[81].mxu1 }
 0xdaa   :  { %v4896_v32 = vadd.f32 %v4849_v23, %v3264_v10  ;;  %v4898_v9 = vadd.f32 %v4890_v34, %v3337_v59  ;;  %v4851_v30 = vpop.f32.mrb[82].mxu0  ;;  %v4892_v48 = vpop.f32.mrb[82].mxu1 }
 0xdab   :  { %v6419_v45 = vmul.f32 -1.442695, %v4895_v25  ;;  %v4852_v0 = vpop.f32.mrb[83].mxu0  ;;  %v4893_v38 = vpop.f32.mrb[83].mxu1  ;;  %v8730_v30 = vld [vmem:[#allocation35_spill] sm:$0xff] }
 0xdac   :  { %v6420_v46 = vmul.f32 -1.442695, %v4896_v32  ;;  %v6421_v60 = vmul.f32 -1.442695, %v4898_v9  ;;  %v8729_v32 = vld [vmem:[#allocation34_spill] sm:$0xff]  ;;  %v3268_v48 = vadd.f32 %v8730_v30, %v8209_v12 }
 0xdad   :  { %7020 = vpow2.f32 %v6419_v45  ;;  %v3339_v9 = vadd.f32 %v8729_v32, %v8201_v24  ;;  %v8731_v45 = vld [vmem:[#allocation36_spill] sm:$0xff] }
 0xdae   :  { %7022 = vpow2.f32 %v6420_v46  ;;  %v3341_v0 = vadd.f32 %v8731_v45, %v8213_v17 }
 0xdaf   :  { %7024 = vpow2.f32 %v6421_v60 }
 0xdb0   :  { %7026 = vtanh.f32 %v4897_v27 }
 0xdb7   :  { %v7021_v62 = vpop.eup %7020 }
 0xdb8   :  { %v7023_v2 = vpop.eup %7022  ;;  %v4902_v1 = vadd.f32 1.0, %v7021_v62 }
 0xdb9   :  { %v4908_v20 = vadd.f32 1.0, %v7023_v2  ;;  %v7025_v5 = vpop.eup %7024 }
 0xdba   :  { %7028 = vrcp.f32 %v4902_v1  ;;  %v7027_v6 = vpop.eup %7026  ;;  %v4915_v4 = vadd.f32 1.0, %v7025_v5 }
 0xdbb   :  { %7030 = vrcp.f32 %v4908_v20 }
 0xdbc   :  { %7032 = vrcp.f32 %v4915_v4 }
 0xdc4   :  { %v7029_v7 = vpop.eup %7028 }
 0xdc5   :  { %v7031_v8 = vpop.eup %7030  ;;  %v4919_v10 = vmul.f32 %v7029_v7, %v7027_v6 }
 0xdc6   :  { %v4918_v59 = vmul.f32 %v7031_v8, %v8425_v58  ;;  %v7033_v40 = vpop.eup %7032  ;;  %v8728_v58 = vld [vmem:[#allocation33_spill] sm:$0xff] }
 0xdc7   :  { %v3266_v34 = vadd.f32 %v8728_v58, %v8197_v15 }
 0xdc8   :  { %v8471_v39 = vadd.f32 %v4919_v10, %v4918_v59 }
 0xdca   :  { %7034 = vtanh.f32 %v8471_v39 }
 0xdd4   :  { %v7035_v25 = vpop.eup %7034 }
 0xdd5   :  { %v4922_v23 = vmul.f32 %v7035_v25, %v7033_v40 }
 0xdd7   :  { %4923 = vst [vmem:[#allocation12 + $0x20] sm:$0xff] %v4922_v23  ;;  %v4928_v27 = vpack.c.bf16 %v4922_v23, %v4922_v23 }
 0xdd9   :  { %5154 = vmatmul.mubr.bf16.vlgmr.msra.gmra.mrb[84].mxu0 %v4928_v27  ;;  %5195 = vmatmul.mubr.bf16.vlgmr.msra.gmra.mrb[84].mxu1 %v4928_v27 }
 0xdda   :  { %5430 = vmatpush1.bf16.msra.mxu0 %v8322_v19  ;;  %5471 = vmatpush1.bf16.msra.mxu1 %v8324_v43 }
 0xddb   :  { %5431 = vmatprep.subr.bf16.mxu0 %v8330_v11  ;;  %5472 = vmatprep.subr.bf16.mxu1 %v8332_v53 }
 0xddc   :  { %5461 = vmatprep.mubr.bf16.mxu0 %v8667_v16  ;;  %5502 = vmatprep.mubr.bf16.mxu1 %v8667_v16 }
 0xdde   :  { %5432 = vmatpush1.bf16.msra.mxu0 %v8334_v22  ;;  %5473 = vmatpush1.bf16.msra.mxu1 %v8336_v47 }
 0xddf   :  { %5433 = vmatprep.subr.bf16.mxu0 %v8342_v52  ;;  %5474 = vmatprep.subr.bf16.mxu1 %v8344_v35 }
 0xde2   :  { %5434 = vmatpush1.bf16.msra.mxu0 %v8346_v26  ;;  %5475 = vmatpush1.bf16.msra.mxu1 %v8348_v51 }
 0xde3   :  { %5435 = vmatprep.subr.bf16.mxu0 %v8354_v21  ;;  %5476 = vmatprep.subr.bf16.mxu1 %v8356_v49 }
 0xde6   :  { %5436 = vmatpush1.bf16.msra.mxu0 %v8358_v57  ;;  %5477 = vmatpush1.bf16.msra.mxu1 %v8360_v63 }
 0xde7   :  { %5437 = vmatprep.subr.bf16.mxu0 %v8366_v36  ;;  %5478 = vmatprep.subr.bf16.mxu1 %v8368_v3 }
 0xdea   :  { %5438 = vmatpush1.bf16.msra.mxu0 %v8370_v13  ;;  %5479 = vmatpush1.bf16.msra.mxu1 %v8372_v55 }
 0xdeb   :  { %5439 = vmatprep.subr.bf16.mxu0 %v8376_v61  ;;  %5480 = vmatprep.subr.bf16.mxu1 %v8384_v50 }
 0xdee   :  { %5440 = vmatpush1.bf16.msra.mxu0 %v8380_v42  ;;  %5481 = vmatpush1.bf16.msra.mxu1 %v8382_v31 }
 0xdef   :  { %5441 = vmatprep.subr.bf16.mxu0 %v8387_v54  ;;  %5482 = vmatprep.subr.bf16.mxu1 %v8389_v33 }
 0xdf2   :  { %5442 = vmatpush1.bf16.msra.mxu0 %v8394_v37  ;;  %5483 = vmatpush1.bf16.msra.mxu1 %v8396_v18 }
 0xdf3   :  { %5443 = vmatprep.subr.bf16.mxu0 %v8400_v44  ;;  %5484 = vmatprep.subr.bf16.mxu1 %v8402_v28 }
 0xdf6   :  { %5444 = vmatpush1.bf16.msra.mxu0 %v8406_v29  ;;  %5485 = vmatpush1.bf16.msra.mxu1 %v8408_v56 }
 0xdf7   :  { %5737 = vmatprep.subr.bf16.mxu0 %v8318_v41  ;;  %5778 = vmatprep.subr.bf16.mxu1 %v8320_v14 }
 0xeac   :  { %v5155_v38 = vpop.f32.mrb[84].mxu0  ;;  %v5196_v46 = vpop.f32.mrb[84].mxu1 }
 0xead   :  { %v5203_v60 = vadd.f32 %v5155_v38, %v3266_v34  ;;  %v5205_v62 = vadd.f32 %v5196_v46, %v3339_v9  ;;  %v5157_v2 = vpop.f32.mrb[85].mxu0  ;;  %v5198_v41 = vpop.f32.mrb[85].mxu1 }
 0xeae   :  { %v5204_v1 = vadd.f32 %v5157_v2, %v3268_v48  ;;  %v5206_v14 = vadd.f32 %v5198_v41, %v3341_v0  ;;  %v5159_v20 = vpop.f32.mrb[86].mxu0  ;;  %v5200_v5 = vpop.f32.mrb[86].mxu1 }
 0xeaf   :  { %v6454_v6 = vmul.f32 -1.442695, %v5203_v60  ;;  %v5160_v7 = vpop.f32.mrb[87].mxu0  ;;  %v5201_v8 = vpop.f32.mrb[87].mxu1 }
 0xeb0   :  { %v6455_v10 = vmul.f32 -1.442695, %v5204_v1  ;;  %v6456_v4 = vmul.f32 -1.442695, %v5206_v14  ;;  %v8737_v8 = vld [vmem:[#allocation42_spill] sm:$0xff] }
 0xeb1   :  { %7036 = vpow2.f32 %v6454_v6  ;;  %v8736_v6 = vld [vmem:[#allocation41_spill] sm:$0xff] }
 0xeb2   :  { %7038 = vpow2.f32 %v6455_v10  ;;  %v3276_v7 = vadd.f32 %v8736_v6, %v8197_v15  ;;  %v3349_v10 = vadd.f32 %v8737_v8, %v8201_v24 }
 0xeb3   :  { %7040 = vpow2.f32 %v6456_v4  ;;  %v8738_v4 = vld [vmem:[#allocation21_spill] sm:$0xff] }
 0xeb4   :  { %7042 = vtanh.f32 %v5205_v62 }
 0xebb   :  { %v7037_v59 = vpop.eup %7036 }
 0xebc   :  { %v7039_v40 = vpop.eup %7038  ;;  %v5210_v25 = vadd.f32 1.0, %v7037_v59  ;;  %v3278_v59 = vadd.f32 %v8738_v4, %v8209_v12 }
 0xebd   :  { %v5216_v23 = vadd.f32 1.0, %v7039_v40  ;;  %v7041_v27 = vpop.eup %7040  ;;  %v8739_v40 = vld [vmem:[#allocation43_spill] sm:$0xff] }
 0xebe   :  { %7044 = vrcp.f32 %v5210_v25  ;;  %v7043_v58 = vpop.eup %7042  ;;  %v5223_v30 = vadd.f32 1.0, %v7041_v27  ;;  %v3351_v25 = vadd.f32 %v8739_v40, %v8213_v17 }
 0xebf   :  { %7046 = vrcp.f32 %v5216_v23 }
 0xec0   :  { %7048 = vrcp.f32 %v5223_v30 }
 0xec8   :  { %v7045_v34 = vpop.eup %7044 }
 0xec9   :  { %v7047_v32 = vpop.eup %7046  ;;  %v5227_v9 = vmul.f32 %v7045_v34, %v7043_v58 }
 0xeca   :  { %v5226_v48 = vmul.f32 %v7047_v32, %v8471_v39  ;;  %v7049_v0 = vpop.eup %7048 }
 0xecc   :  { %v8517_v45 = vadd.f32 %v5227_v9, %v5226_v48 }
 0xece   :  { %7050 = vtanh.f32 %v8517_v45 }
 0xed8   :  { %v7051_v38 = vpop.eup %7050 }
 0xed9   :  { %v5230_v46 = vmul.f32 %v7051_v38, %v7049_v0 }
 0xedb   :  { %5231 = vst [vmem:[#allocation12 + $0x28] sm:$0xff] %v5230_v46  ;;  %v5236_v60 = vpack.c.bf16 %v5230_v46, %v5230_v46 }
 0xedd   :  { %5462 = vmatmul.mubr.bf16.vlgmr.msra.gmra.mrb[88].mxu0 %v5236_v60  ;;  %5503 = vmatmul.mubr.bf16.vlgmr.msra.gmra.mrb[88].mxu1 %v5236_v60 }
 0xede   :  { %5738 = vmatpush1.bf16.msra.mxu0 %v8322_v19  ;;  %5779 = vmatpush1.bf16.msra.mxu1 %v8324_v43  ;;  %v8733_v43 = vld [vmem:[#allocation38_spill] sm:$0xff] }
 0xedf   :  { %5739 = vmatprep.subr.bf16.mxu0 %v8330_v11  ;;  %5780 = vmatprep.subr.bf16.mxu1 %v8332_v53  ;;  %v3345_v11 = vadd.f32 %v8733_v43, %v8201_v24  ;;  %v8734_v53 = vld [vmem:[#allocation39_spill] sm:$0xff] }
 0xee0   :  { %5769 = vmatprep.mubr.bf16.mxu0 %v8667_v16  ;;  %5810 = vmatprep.mubr.bf16.mxu1 %v8667_v16  ;;  %v8732_v16 = vld [vmem:[#allocation37_spill] sm:$0xff] }
 0xee1   :  { %v3272_v19 = vadd.f32 %v8732_v16, %v8197_v15 }
 0xee2   :  { %5740 = vmatpush1.bf16.msra.mxu0 %v8334_v22  ;;  %5781 = vmatpush1.bf16.msra.mxu1 %v8336_v47  ;;  %v3274_v22 = vadd.f32 %v8734_v53, %v8209_v12  ;;  %v8735_v47 = vld [vmem:[#allocation40_spill] sm:$0xff] }
 0xee3   :  { %5741 = vmatprep.subr.bf16.mxu0 %v8342_v52  ;;  %5782 = vmatprep.subr.bf16.mxu1 %v8344_v35  ;;  %v3347_v52 = vadd.f32 %v8735_v47, %v8213_v17 }
 0xee6   :  { %5742 = vmatpush1.bf16.msra.mxu0 %v8346_v26  ;;  %5783 = vmatpush1.bf16.msra.mxu1 %v8348_v51 }
 0xee7   :  { %5743 = vmatprep.subr.bf16.mxu0 %v8354_v21  ;;  %5784 = vmatprep.subr.bf16.mxu1 %v8356_v49 }
 0xeea   :  { %5744 = vmatpush1.bf16.msra.mxu0 %v8358_v57  ;;  %5785 = vmatpush1.bf16.msra.mxu1 %v8360_v63 }
 0xeeb   :  { %5745 = vmatprep.subr.bf16.mxu0 %v8366_v36  ;;  %5786 = vmatprep.subr.bf16.mxu1 %v8368_v3 }
 0xeee   :  { %5746 = vmatpush1.bf16.msra.mxu0 %v8370_v13  ;;  %5787 = vmatpush1.bf16.msra.mxu1 %v8372_v55 }
 0xeef   :  { %5747 = vmatprep.subr.bf16.mxu0 %v8376_v61  ;;  %5788 = vmatprep.subr.bf16.mxu1 %v8384_v50 }
 0xef2   :  { %5748 = vmatpush1.bf16.msra.mxu0 %v8380_v42  ;;  %5789 = vmatpush1.bf16.msra.mxu1 %v8382_v31 }
 0xef3   :  { %5749 = vmatprep.subr.bf16.mxu0 %v8387_v54  ;;  %5790 = vmatprep.subr.bf16.mxu1 %v8389_v33 }
 0xef6   :  { %5750 = vmatpush1.bf16.msra.mxu0 %v8394_v37  ;;  %5791 = vmatpush1.bf16.msra.mxu1 %v8396_v18 }
 0xef7   :  { %5751 = vmatprep.subr.bf16.mxu0 %v8400_v44  ;;  %5792 = vmatprep.subr.bf16.mxu1 %v8402_v28 }
 0xefa   :  { %5752 = vmatpush1.bf16.msra.mxu0 %v8406_v29  ;;  %5793 = vmatpush1.bf16.msra.mxu1 %v8408_v56 }
 0xfb0   :  { %v5463_v35 = vpop.f32.mrb[88].mxu0  ;;  %v5504_v26 = vpop.f32.mrb[88].mxu1 }
 0xfb1   :  { %v5511_v51 = vadd.f32 %v5463_v35, %v3272_v19  ;;  %v5513_v21 = vadd.f32 %v5504_v26, %v3345_v11  ;;  %v5465_v49 = vpop.f32.mrb[89].mxu0  ;;  %v5506_v57 = vpop.f32.mrb[89].mxu1 }
 0xfb2   :  { %v5512_v63 = vadd.f32 %v5465_v49, %v3274_v22  ;;  %v5514_v36 = vadd.f32 %v5506_v57, %v3347_v52  ;;  %v5467_v3 = vpop.f32.mrb[90].mxu0  ;;  %v5508_v13 = vpop.f32.mrb[90].mxu1 }
 0xfb3   :  { %v6489_v55 = vmul.f32 -1.442695, %v5511_v51  ;;  %v5468_v61 = vpop.f32.mrb[91].mxu0  ;;  %v5509_v42 = vpop.f32.mrb[91].mxu1 }
 0xfb4   :  { %v6490_v31 = vmul.f32 -1.442695, %v5512_v63  ;;  %v6491_v50 = vmul.f32 -1.442695, %v5514_v36 }
 0xfb5   :  { %7052 = vpow2.f32 %v6489_v55 }
 0xfb6   :  { %7054 = vpow2.f32 %v6490_v31 }
 0xfb7   :  { %7056 = vpow2.f32 %v6491_v50 }
 0xfb8   :  { %7058 = vtanh.f32 %v5513_v21 }
 0xfbf   :  { %v7053_v54 = vpop.eup %7052 }
 0xfc0   :  { %v7055_v33 = vpop.eup %7054  ;;  %v5518_v37 = vadd.f32 1.0, %v7053_v54 }
 0xfc1   :  { %v5524_v18 = vadd.f32 1.0, %v7055_v33  ;;  %v7057_v44 = vpop.eup %7056 }
 0xfc2   :  { %7060 = vrcp.f32 %v5518_v37  ;;  %v7059_v28 = vpop.eup %7058  ;;  %v5531_v62 = vadd.f32 1.0, %v7057_v44 }
 0xfc3   :  { %7062 = vrcp.f32 %v5524_v18 }
 0xfc4   :  { %7064 = vrcp.f32 %v5531_v62 }
 0xfcc   :  { %v7061_v29 = vpop.eup %7060 }
 0xfcd   :  { %v7063_v56 = vpop.eup %7062  ;;  %v5535_v39 = vmul.f32 %v7061_v29, %v7059_v28 }
 0xfce   :  { %v5534_v2 = vmul.f32 %v7063_v56, %v8517_v45  ;;  %v7065_v1 = vpop.eup %7064 }
 0xfd0   :  { %v5536_v41 = vadd.f32 %v5535_v39, %v5534_v2 }
 0xfd2   :  { %7066 = vtanh.f32 %v5536_v41 }
 0xfdc   :  { %v7067_v14 = vpop.eup %7066 }
 0xfdd   :  { %v5538_v20 = vmul.f32 %v7067_v14, %v7065_v1 }
 0xfdf   :  { %5539 = vst [vmem:[#allocation12 + $0x30] sm:$0xff] %v5538_v20  ;;  %v5544_v5 = vpack.c.bf16 %v5538_v20, %v5538_v20 }
 0xfe1   :  { %5770 = vmatmul.mubr.bf16.vlgmr.msra.gmra.mrb[92].mxu0 %v5544_v5  ;;  %5811 = vmatmul.mubr.bf16.vlgmr.msra.gmra.mrb[92].mxu1 %v5544_v5 }
0x10b4   :  { %v5771_v23 = vpop.f32.mrb[92].mxu0  ;;  %v5812_v27 = vpop.f32.mrb[92].mxu1 }
0x10b5   :  { %v5819_v58 = vadd.f32 %v5771_v23, %v3276_v7  ;;  %v5821_v34 = vadd.f32 %v5812_v27, %v3349_v10  ;;  %v5773_v32 = vpop.f32.mrb[93].mxu0  ;;  %v5814_v9 = vpop.f32.mrb[93].mxu1 }
0x10b6   :  { %v5820_v30 = vadd.f32 %v5773_v32, %v3278_v59  ;;  %v5822_v48 = vadd.f32 %v5814_v9, %v3351_v25  ;;  %v5775_v45 = vpop.f32.mrb[94].mxu0  ;;  %v5816_v0 = vpop.f32.mrb[94].mxu1 }
0x10b7   :  { %v6524_v15 = vmul.f32 -1.442695, %v5819_v58  ;;  %v5776_v38 = vpop.f32.mrb[95].mxu0  ;;  %v5817_v46 = vpop.f32.mrb[95].mxu1 }
0x10b8   :  { %v6525_v24 = vmul.f32 -1.442695, %v5820_v30  ;;  %v6526_v12 = vmul.f32 -1.442695, %v5822_v48 }
0x10b9   :  { %7068 = vpow2.f32 %v6524_v15 }
0x10ba   :  { %7070 = vpow2.f32 %v6525_v24 }
0x10bb   :  { %7072 = vpow2.f32 %v6526_v12 }
0x10bc   :  { %7074 = vtanh.f32 %v5821_v34 }
0x10c3   :  { %v7069_v60 = vpop.eup %7068 }
0x10c4   :  { %v7071_v16 = vpop.eup %7070  ;;  %v5826_v17 = vadd.f32 1.0, %v7069_v60 }
0x10c5   :  { %v5832_v19 = vadd.f32 1.0, %v7071_v16  ;;  %v7073_v43 = vpop.eup %7072 }
0x10c6   :  { %7076 = vrcp.f32 %v5826_v17  ;;  %v7075_v11 = vpop.eup %7074  ;;  %v5839_v52 = vadd.f32 1.0, %v7073_v43 }
0x10c7   :  { %7078 = vrcp.f32 %v5832_v19 }
0x10c8   :  { %7080 = vrcp.f32 %v5839_v52 }
0x10d0   :  { %v7077_v53 = vpop.eup %7076 }
0x10d1   :  { %v7079_v22 = vpop.eup %7078  ;;  %v5843_v47 = vmul.f32 %v7077_v53, %v7075_v11 }
0x10d2   :  { %v5842_v35 = vmul.f32 %v7079_v22, %v5536_v41  ;;  %v7081_v51 = vpop.eup %7080 }
0x10d4   :  { %v5844_v26 = vadd.f32 %v5843_v47, %v5842_v35 }
0x10d6   :  { %5851 = vst [vmem:[#allocation15 + $0x8] sm:$0xff] %v5844_v26  ;;  %7082 = vtanh.f32 %v5844_v26 }
0x10e0   :  { %v7083_v21 = vpop.eup %7082 }
0x10e1   :  { %v5846_v49 = vmul.f32 %v7083_v21, %v7081_v51 }
0x10e3   :  { %5847 = vst [vmem:[#allocation12 + $0x38] sm:$0xff] %v5846_v49  ;;  %5849 = vst [vmem:[#allocation13 + $0x8] sm:$0xff] %v5846_v49 }
0x10e4   :  { %7205 = shalt.err (!%p7202_p2)
}
0x10e5   :  { %s7206_s0 = scalar_lea.hbm %s8635_s7, 256 }
0x10e6   :  { %p7207_p3 = scmp.ne.s32.totalorder %s8635_s7, %s7206_s0  ;;  %p7210_p4 = scmp.lt.u32.totalorder %s7206_s0, %s8635_s7 }
0x10e8   :  { %p7212_p5 = pnand %p7210_p4, %p7207_p3 }
0x10ea   :  { %7215 = shalt.err (!%p7212_p5)
}
0x10eb   :  { %5875 = dma.vmem_to_hbm [thread:$0]  %s5870_s27, 256, %s8635_s7, [#allocation14], %s7275_s3, %s7275_s3, %s7276_s20  }
0x10ec   :  { %s7216_s19 = scalar_lea.vmem %s8569_s30, 1024  ;;  %p7221_p7 = scmp.lt.s32.totalorder %s8569_s30, %s8569_s30 }
0x10ed   :  { %p7217_p6 = scmp.ne.s32.totalorder %s8569_s30, %s7216_s19  ;;  %p7222_p8 = scmp.lt.s32.totalorder %s7216_s19, %s7216_s19 }
0x10ef   :  { %p7223_p9 = por %p7222_p8, %p7221_p7 }
0x10f1   :  { %p7224_p10 = pnand %p7223_p9, %p7217_p6 }
0x10f3   :  { %7227 = shalt.err (!%p7224_p10)
}
0x10f4   :  { %s7228_s24 = scalar_lea.hbm %s8634_s6, 1024 }
0x10f5   :  { %p7229_p11 = scmp.ne.s32.totalorder %s8634_s6, %s7228_s24  ;;  %p7232_p12 = scmp.lt.u32.totalorder %s7228_s24, %s8634_s6 }
0x10f7   :  { %p7234_p13 = pnand %p7232_p12, %p7229_p11 }
0x10f9   :  { %7237 = shalt.err (!%p7234_p13)
}
0x10fa   :  { %5863 = dma.vmem_to_hbm [thread:$0]  %s8569_s30, 1024, %s8634_s6, [#allocation5], %s7275_s3, %s7275_s3, %s7276_s20  }
0x10fb   :  { %s7238_s26 = scalar_lea.vmem %s8571_s28, 256  ;;  %p7243_p1 = scmp.lt.s32.totalorder %s8571_s28, %s8571_s28 }
0x10fc   :  { %p7239_p0 = scmp.ne.s32.totalorder %s8571_s28, %s7238_s26  ;;  %p7244_p2 = scmp.lt.s32.totalorder %s7238_s26, %s7238_s26 }
0x10fe   :  { %p7245_p3 = por %p7244_p2, %p7243_p1 }
0x1100   :  { %p7246_p4 = pnand %p7245_p3, %p7239_p0 }
0x1102   :  { %7249 = shalt.err (!%p7246_p4)
}
0x1103   :  { %s7250_s29 = scalar_lea.hbm %s8636_s8, 256 }
0x1104   :  { %p7251_p5 = scmp.ne.s32.totalorder %s8636_s8, %s7250_s29  ;;  %p7254_p6 = scmp.lt.u32.totalorder %s7250_s29, %s8636_s8 }
0x1106   :  { %p7256_p7 = pnand %p7254_p6, %p7251_p5 }
0x1108   :  { %7259 = shalt.err (!%p7256_p7)
}
0x1109   :  { %5887 = dma.vmem_to_hbm [thread:$0]  %s8571_s28, 256, %s8636_s8, [#allocation14], %s7275_s3, %s7275_s3, %s7276_s20  }
0x110a   :  { %7266 = dma.done.wait [#allocation5], 1024  }
0x110b   :  { %7267 = vsyncadd [#allocation5], 4294966272 }
0x110c   :  { %7268 = dma.done.wait [#allocation14], 512  }
0x110d   :  { %7269 = vsyncadd [#allocation14], 4294966784 }
0x110e   :  { %5897 = vsyncpa [#allocation4], 1 }
0x110f   :  { %5898 = vsyncpa [#allocation7], 1 }
0x1110   :  { %5899 = vsyncpa [#allocation10], 1 }
0x1111   :  { %5900 = vsyncpa [#allocation5], 1 }
0x1112   :  { %5901 = vsyncpa [#allocation14], 1 }

</bundles_post_ra>
